<compile_context>
chip_gen: v6e
topology: v6e:2x2x1
jax: 0.10.0
libtpu: 0.0.40
codegen_flags: <defaults>
</compile_context>

<pallas_src>
import functools

import numpy as np
import jax
import jax.numpy as jnp
from jax.experimental import pallas as pl
from jax.experimental.pallas import tpu as pltpu


def _basic_block_kernel(xpad_ref, w1_ref, s1_ref, b1_ref, w2_ref, s2_ref, b2_ref,
                        out_ref, *, img_h, img_w, tile_h):
    """One (batch element, row tile) grid step, channels-on-sublanes layout.

    xpad_ref : (Cin, H+4, W+4)  bf16  zero-padded input image (batch squeezed)
    w1_ref   : (C, 9*Cin)       bf16  conv1 weights, K ordered as (kh, kw, cin)
    s1_ref   : (C, 1)           f32   folded bn1 scale
    b1_ref   : (C, 1)           f32   folded bn1 bias
    w2_ref   : (C, 9*C)         bf16  conv2 weights
    s2_ref   : (C, 1)           f32   folded bn2 scale
    b2_ref   : (C, 1)           f32   folded bn2 bias
    out_ref  : (C, TILE_H*W)    f32   output row tile (spatially flattened)
    """
    cin = xpad_ref.shape[0]
    c = out_ref.shape[0]
    th, w = tile_h, img_w
    hh, ww = th + 2, w + 2              # conv1 evaluated with a 1-pixel halo ring
    m1, m2 = hh * ww, th * w

    ht = pl.program_id(1)
    r0 = pl.multiple_of(ht * th, th)    # first output row of this tile
    # image rows [r0-2, r0+th+2)  ==  rows [r0, r0+th+4) of the 2-padded input
    x_tile = xpad_ref[:, pl.ds(r0, th + 4), :]            # (cin, th+4, w+4) bf16

    # ---- conv1 + bn1 + relu over the (th+2, w+2) halo window ----------------
    # single im2col matmul with K = 9*cin; spatial positions live on lanes.
    cols1 = jnp.concatenate(
        [x_tile[:, dh:dh + hh, dw:dw + ww].reshape(cin, m1)
         for dh in range(3) for dw in range(3)], axis=0)             # (9*cin, m1)
    acc1 = jnp.dot(w1_ref[...], cols1,
                   preferred_element_type=jnp.float32)               # (c, m1) f32
    h1 = jnp.maximum(acc1 * s1_ref[...] + b1_ref[...], 0.0).reshape(c, hh, ww)

    # Zero the halo-ring positions that fall outside the image: this discards
    # the invalid recomputed halo AND implements conv2's zero padding, so there
    # is no padded scratch buffer and no full-buffer zeroing.
    row = r0 - 1 + jax.lax.broadcasted_iota(jnp.int32, (1, hh, ww), 1)
    col = -1 + jax.lax.broadcasted_iota(jnp.int32, (1, hh, ww), 2)
    inside = (row >= 0) & (row < img_h) & (col >= 0) & (col < img_w)
    h1 = jnp.where(inside, h1, 0.0).astype(jnp.bfloat16)             # (c, hh, ww)

    # ---- conv2 over the (th, w) output tile ---------------------------------
    cols2 = jnp.concatenate(
        [h1[:, dh:dh + th, dw:dw + w].reshape(c, m2)
         for dh in range(3) for dw in range(3)], axis=0)              # (9*c, m2)
    acc2 = jnp.dot(w2_ref[...], cols2,
                   preferred_element_type=jnp.float32)                # (c, m2) f32

    # ---- bn2 affine + identity residual + relu (fused epilogue) -------------
    residual = x_tile[:, 2:2 + th, 2:2 + w].reshape(cin, m2).astype(jnp.float32)
    out_ref[...] = jnp.maximum(acc2 * s2_ref[...] + b2_ref[...] + residual, 0.0)


def _pick_tile_h(h, w):
    """Largest row tile dividing H whose flattened width is lane-aligned."""
    divisors = [t for t in range(1, h + 1) if h % t == 0]
    aligned = [t for t in divisors if (t * w) % 128 == 0] or divisors
    capped = [t for t in aligned if t * w <= 2048] or [min(aligned)]
    return max(capped)


def basic_block_pallas(x_nchw, w1_oihw, bn1_params, w2_oihw, bn2_params,
                       eps=1e-5, tile_h=None):
    """NCHW in / NCHW out, matching the PyTorch module (eval-mode BN)."""
    g1, be1, rm1, rv1 = bn1_params
    g2, be2, rm2, rv2 = bn2_params
    s1 = (g1 / jnp.sqrt(rv1 + eps)).astype(jnp.float32)
    b1 = (be1 - rm1 * s1).astype(jnp.float32)
    s2 = (g2 / jnp.sqrt(rv2 + eps)).astype(jnp.float32)
    b2 = (be2 - rm2 * s2).astype(jnp.float32)

    n, cin, h, w = x_nchw.shape
    cout = w1_oihw.shape[0]
    assert cin == cout, "BasicBlock with downsample=None requires inplanes == planes"

    if tile_h is None:
        tile_h = _pick_tile_h(h, w)
    assert h % tile_h == 0

    # bf16 activations, zero-padded by 2 rows/cols per side (conv1 halo +
    # conv2 reach).  Channels stay on the sublane axis: no layout transpose.
    xpad = jnp.pad(x_nchw.astype(jnp.bfloat16), ((0, 0), (0, 0), (2, 2), (2, 2)))

    # OIHW -> (Cout, 9*Cin); K ordering (kh, kw, cin) matches the im2col taps.
    w1 = jnp.transpose(w1_oihw, (0, 2, 3, 1)).astype(jnp.bfloat16).reshape(cout, 9 * cin)
    w2 = jnp.transpose(w2_oihw, (0, 2, 3, 1)).astype(jnp.bfloat16).reshape(cout, 9 * cout)

    kernel = functools.partial(_basic_block_kernel, img_h=h, img_w=w, tile_h=tile_h)

    out_flat = pl.pallas_call(
        kernel,
        out_shape=jax.ShapeDtypeStruct((n, cout, h * w), jnp.float32),
        grid=(n, h // tile_h),
        in_specs=[
            # Full padded image per batch element; block index is constant in
            # the row-tile axis, so it is DMA'd once per image and kept resident.
            pl.BlockSpec((None, cin, h + 4, w + 4), lambda ni, ht: (ni, 0, 0, 0)),
            pl.BlockSpec((cout, 9 * cin), lambda ni, ht: (0, 0)),
            pl.BlockSpec((cout, 1), lambda ni, ht: (0, 0)),
            pl.BlockSpec((cout, 1), lambda ni, ht: (0, 0)),
            pl.BlockSpec((cout, 9 * cout), lambda ni, ht: (0, 0)),
            pl.BlockSpec((cout, 1), lambda ni, ht: (0, 0)),
            pl.BlockSpec((cout, 1), lambda ni, ht: (0, 0)),
        ],
        # Lane-dense output: last block dim is tile_h*W (multiple of 128 for the
        # default tile choice) so stores are wide unmasked vst's.
        out_specs=pl.BlockSpec((None, cout, tile_h * w), lambda ni, ht: (ni, 0, ht)),
        compiler_params=pltpu.CompilerParams(
            dimension_semantics=("parallel", "parallel"),
            vmem_limit_bytes=64 * 1024 * 1024),
    )(xpad, w1,
      s1.reshape(cout, 1), b1.reshape(cout, 1),
      w2,
      s2.reshape(cout, 1), b2.reshape(cout, 1))

    return out_flat.reshape(n, cout, h, w)        # free reshape back to NCHW


def basic_block_reference(x, w1, bn1_params, w2, bn2_params, eps=1e-5):
    """Pure-JAX fp32 reference (NCHW, same as PyTorch) for correctness checking."""
    def conv(inp, w):
        return jax.lax.conv_general_dilated(
            inp, w, window_strides=(1, 1), padding=((1, 1), (1, 1)),
            dimension_numbers=('NCHW', 'OIHW', 'NCHW'),
            precision=jax.lax.Precision.HIGHEST)

    def bn(inp, params):
        g, b, m, v = params
        return ((inp - m[None, :, None, None]) / jnp.sqrt(v[None, :, None, None] + eps)
                * g[None, :, None, None] + b[None, :, None, None])

    out = jax.nn.relu(bn(conv(x, w1), bn1_params))
    out = bn(conv(out, w2), bn2_params)
    return jax.nn.relu(out + x)


if __name__ == "__main__":
    N, C, H, W = 2, 8, 32, 16          # inplanes == planes == 8, stride == 1
    key = jax.random.PRNGKey(0)
    (kx, kw1, kw2, kg1, kb1, km1, kv1, kg2, kb2, km2, kv2) = jax.random.split(key, 11)

    # Round inputs/weights to bf16-representable f32 so the kernel's bf16 cast
    # is lossless; the only remaining difference vs the fp32 reference is the
    # bf16 staging of the conv1 activation (accumulation is f32 on both paths).
    rt = lambda a: a.astype(jnp.bfloat16).astype(jnp.float32)

    x = rt(jax.random.normal(kx, (N, C, H, W), jnp.float32))
    w1 = rt(jax.random.normal(kw1, (C, C, 3, 3), jnp.float32) * 0.1)   # conv1 OIHW
    w2 = rt(jax.random.normal(kw2, (C, C, 3, 3), jnp.float32) * 0.1)   # conv2 OIHW

    bn1 = (jax.random.uniform(kg1, (C,), jnp.float32, 0.5, 1.5),       # gamma
           jax.random.normal(kb1, (C,), jnp.float32) * 0.1,            # beta
           jax.random.normal(km1, (C,), jnp.float32) * 0.1,            # running_mean
           jax.random.uniform(kv1, (C,), jnp.float32, 0.5, 1.5))       # running_var
    bn2 = (jax.random.uniform(kg2, (C,), jnp.float32, 0.5, 1.5),
           jax.random.normal(kb2, (C,), jnp.float32) * 0.1,
           jax.random.normal(km2, (C,), jnp.float32) * 0.1,
           jax.random.uniform(kv2, (C,), jnp.float32, 0.5, 1.5))

    # tile_h=8 -> 4 row tiles per image (top edge, two interiors, bottom edge),
    # with a lane-aligned 8*16 = 128 output block per step.
    out = jax.block_until_ready(basic_block_pallas(x, w1, bn1, w2, bn2, tile_h=8))
    ref = jax.block_until_ready(basic_block_reference(x, w1, bn1, w2, bn2))

    np.testing.assert_allclose(np.asarray(out), np.asarray(ref), rtol=2e-2, atol=2e-2)
    print("KERNEL_OK")
</pallas_src>

<mosaic_0001>
module attributes {stable_mosaic.version = 11 : i64} {
  func.func @_basic_block_kernel(%arg0: i32, %arg1: i32, %arg2: memref<1x8x36x20xbf16, #tpu.memory_space<vmem>>, %arg3: memref<8x72xbf16, #tpu.memory_space<vmem>>, %arg4: memref<8x1xf32, #tpu.memory_space<vmem>>, %arg5: memref<8x1xf32, #tpu.memory_space<vmem>>, %arg6: memref<8x72xbf16, #tpu.memory_space<vmem>>, %arg7: memref<8x1xf32, #tpu.memory_space<vmem>>, %arg8: memref<8x1xf32, #tpu.memory_space<vmem>>, %arg9: memref<1x8x128xf32, #tpu.memory_space<vmem>>) attributes {dimension_semantics = [#tpu.dimension_semantics<parallel>, #tpu.dimension_semantics<parallel>], iteration_bounds = array<i64: 2, 4>, scalar_prefetch = 0 : i64, scratch_operands = 0 : i64, tpu.core_type = #tpu.core_type<tc>, window_params = [{transform_indices = @transform_0, window_bounds = array<i64: 1, 8, 36, 20>}, {pipeline_mode = #tpu.pipeline_mode<synchronous>, transform_indices = @transform_1, window_bounds = array<i64: 8, 72>}, {pipeline_mode = #tpu.pipeline_mode<synchronous>, transform_indices = @transform_2, window_bounds = array<i64: 8, 1>}, {pipeline_mode = #tpu.pipeline_mode<synchronous>, transform_indices = @transform_3, window_bounds = array<i64: 8, 1>}, {pipeline_mode = #tpu.pipeline_mode<synchronous>, transform_indices = @transform_4, window_bounds = array<i64: 8, 72>}, {pipeline_mode = #tpu.pipeline_mode<synchronous>, transform_indices = @transform_5, window_bounds = array<i64: 8, 1>}, {pipeline_mode = #tpu.pipeline_mode<synchronous>, transform_indices = @transform_6, window_bounds = array<i64: 8, 1>}, {transform_indices = @transform_7, window_bounds = array<i64: 1, 8, 128>}]} {
    %c8_i32 = arith.constant 8 : i32
    %0 = arith.muli %arg1, %c8_i32 : i32
    %1 = tpu.assume_multiple %0, 8 : i32
    %c0 = arith.constant 0 : index
    %c0_0 = arith.constant 0 : index
    %2 = arith.index_cast %1 : i32 to index
    %c0_1 = arith.constant 0 : index
    %3 = vector.load %arg2[%c0, %c0_0, %2, %c0_1] : memref<1x8x36x20xbf16, #tpu.memory_space<vmem>>, vector<1x8x12x20xbf16>
    %4 = vector.shape_cast %3 : vector<1x8x12x20xbf16> to vector<8x12x20xbf16>
    %5 = vector.extract_strided_slice %4 {offsets = [0, 0, 0], sizes = [8, 10, 18], strides = [1, 1, 1]} : vector<8x12x20xbf16> to vector<8x10x18xbf16>
    %6 = vector.shape_cast %5 : vector<8x10x18xbf16> to vector<8x180xbf16>
    %7 = vector.extract_strided_slice %4 {offsets = [0, 0, 1], sizes = [8, 10, 18], strides = [1, 1, 1]} : vector<8x12x20xbf16> to vector<8x10x18xbf16>
    %8 = vector.shape_cast %7 : vector<8x10x18xbf16> to vector<8x180xbf16>
    %9 = vector.extract_strided_slice %4 {offsets = [0, 0, 2], sizes = [8, 10, 18], strides = [1, 1, 1]} : vector<8x12x20xbf16> to vector<8x10x18xbf16>
    %10 = vector.shape_cast %9 : vector<8x10x18xbf16> to vector<8x180xbf16>
    %11 = vector.extract_strided_slice %4 {offsets = [0, 1, 0], sizes = [8, 10, 18], strides = [1, 1, 1]} : vector<8x12x20xbf16> to vector<8x10x18xbf16>
    %12 = vector.shape_cast %11 : vector<8x10x18xbf16> to vector<8x180xbf16>
    %13 = vector.extract_strided_slice %4 {offsets = [0, 1, 1], sizes = [8, 10, 18], strides = [1, 1, 1]} : vector<8x12x20xbf16> to vector<8x10x18xbf16>
    %14 = vector.shape_cast %13 : vector<8x10x18xbf16> to vector<8x180xbf16>
    %15 = vector.extract_strided_slice %4 {offsets = [0, 1, 2], sizes = [8, 10, 18], strides = [1, 1, 1]} : vector<8x12x20xbf16> to vector<8x10x18xbf16>
    %16 = vector.shape_cast %15 : vector<8x10x18xbf16> to vector<8x180xbf16>
    %17 = vector.extract_strided_slice %4 {offsets = [0, 2, 0], sizes = [8, 10, 18], strides = [1, 1, 1]} : vector<8x12x20xbf16> to vector<8x10x18xbf16>
    %18 = vector.shape_cast %17 : vector<8x10x18xbf16> to vector<8x180xbf16>
    %19 = vector.extract_strided_slice %4 {offsets = [0, 2, 1], sizes = [8, 10, 18], strides = [1, 1, 1]} : vector<8x12x20xbf16> to vector<8x10x18xbf16>
    %20 = vector.shape_cast %19 : vector<8x10x18xbf16> to vector<8x180xbf16>
    %21 = vector.extract_strided_slice %4 {offsets = [0, 2, 2], sizes = [8, 10, 18], strides = [1, 1, 1]} : vector<8x12x20xbf16> to vector<8x10x18xbf16>
    %22 = vector.shape_cast %21 : vector<8x10x18xbf16> to vector<8x180xbf16>
    %23 = tpu.concatenate %6, %8, %10, %12, %14, %16, %18, %20, %22 in 0 : vector<8x180xbf16>, vector<8x180xbf16>, vector<8x180xbf16>, vector<8x180xbf16>, vector<8x180xbf16>, vector<8x180xbf16>, vector<8x180xbf16>, vector<8x180xbf16>, vector<8x180xbf16> -> vector<72x180xbf16>
    %c0_2 = arith.constant 0 : index
    %c0_3 = arith.constant 0 : index
    %24 = vector.load %arg3[%c0_2, %c0_3] : memref<8x72xbf16, #tpu.memory_space<vmem>>, vector<8x72xbf16>
    %cst = arith.constant dense<0.000000e+00> : vector<8x180xf32>
    %25 = tpu.matmul %24, %23, %cst {dimension_numbers = #tpu.dot_dimension_numbers<[1], [0], [0], [1], [0, 0, 1, 1], [], []>} : vector<8x72xbf16>, vector<72x180xbf16>, vector<8x180xf32> -> vector<8x180xf32>
    %c0_4 = arith.constant 0 : index
    %c0_5 = arith.constant 0 : index
    %26 = vector.load %arg4[%c0_4, %c0_5] : memref<8x1xf32, #tpu.memory_space<vmem>>, vector<8x1xf32>
    %27 = vector.broadcast %26 : vector<8x1xf32> to vector<8x180xf32>
    %28 = arith.mulf %25, %27 : vector<8x180xf32>
    %c0_6 = arith.constant 0 : index
    %c0_7 = arith.constant 0 : index
    %29 = vector.load %arg5[%c0_6, %c0_7] : memref<8x1xf32, #tpu.memory_space<vmem>>, vector<8x1xf32>
    %30 = vector.broadcast %29 : vector<8x1xf32> to vector<8x180xf32>
    %31 = arith.addf %28, %30 : vector<8x180xf32>
    %cst_8 = arith.constant 0.000000e+00 : f32
    %32 = vector.broadcast %cst_8 : f32 to vector<8x180xf32>
    %33 = arith.maximumf %31, %32 : vector<8x180xf32>
    %34 = vector.shape_cast %33 : vector<8x180xf32> to vector<8x10x18xf32>
    %c1_i32 = arith.constant 1 : i32
    %35 = arith.subi %1, %c1_i32 : i32
    %36 = tpu.iota {dimensions = array<i32: 1>} : vector<1x10x18xi32>
    %37 = vector.broadcast %35 : i32 to vector<1x10x18xi32>
    %38 = arith.addi %37, %36 : vector<1x10x18xi32>
    %39 = tpu.iota {dimensions = array<i32: 2>} : vector<1x10x18xi32>
    %c-1_i32 = arith.constant -1 : i32
    %40 = vector.broadcast %c-1_i32 : i32 to vector<1x10x18xi32>
    %41 = arith.addi %40, %39 : vector<1x10x18xi32>
    %c0_i32 = arith.constant 0 : i32
    %42 = vector.broadcast %c0_i32 : i32 to vector<1x10x18xi32>
    %43 = arith.cmpi sge, %38, %42 : vector<1x10x18xi32>
    %c32_i32 = arith.constant 32 : i32
    %44 = vector.broadcast %c32_i32 : i32 to vector<1x10x18xi32>
    %45 = arith.cmpi slt, %38, %44 : vector<1x10x18xi32>
    %46 = arith.andi %43, %45 : vector<1x10x18xi1>
    %c0_i32_9 = arith.constant 0 : i32
    %47 = vector.broadcast %c0_i32_9 : i32 to vector<1x10x18xi32>
    %48 = arith.cmpi sge, %41, %47 : vector<1x10x18xi32>
    %49 = arith.andi %46, %48 : vector<1x10x18xi1>
    %c16_i32 = arith.constant 16 : i32
    %50 = vector.broadcast %c16_i32 : i32 to vector<1x10x18xi32>
    %51 = arith.cmpi slt, %41, %50 : vector<1x10x18xi32>
    %52 = arith.andi %49, %51 : vector<1x10x18xi1>
    %cst_10 = arith.constant 0.000000e+00 : f32
    %53 = vector.shape_cast %52 : vector<1x10x18xi1> to vector<1x10x18xi1>
    %54 = vector.broadcast %53 : vector<1x10x18xi1> to vector<8x10x18xi1>
    %55 = vector.broadcast %cst_10 : f32 to vector<8x10x18xf32>
    %56 = arith.select %54, %34, %55 : vector<8x10x18xi1>, vector<8x10x18xf32>
    %57 = arith.truncf %56 : vector<8x10x18xf32> to vector<8x10x18xbf16>
    %58 = vector.extract_strided_slice %57 {offsets = [0, 0, 0], sizes = [8, 8, 16], strides = [1, 1, 1]} : vector<8x10x18xbf16> to vector<8x8x16xbf16>
    %59 = vector.shape_cast %58 : vector<8x8x16xbf16> to vector<8x128xbf16>
    %60 = vector.extract_strided_slice %57 {offsets = [0, 0, 1], sizes = [8, 8, 16], strides = [1, 1, 1]} : vector<8x10x18xbf16> to vector<8x8x16xbf16>
    %61 = vector.shape_cast %60 : vector<8x8x16xbf16> to vector<8x128xbf16>
    %62 = vector.extract_strided_slice %57 {offsets = [0, 0, 2], sizes = [8, 8, 16], strides = [1, 1, 1]} : vector<8x10x18xbf16> to vector<8x8x16xbf16>
    %63 = vector.shape_cast %62 : vector<8x8x16xbf16> to vector<8x128xbf16>
    %64 = vector.extract_strided_slice %57 {offsets = [0, 1, 0], sizes = [8, 8, 16], strides = [1, 1, 1]} : vector<8x10x18xbf16> to vector<8x8x16xbf16>
    %65 = vector.shape_cast %64 : vector<8x8x16xbf16> to vector<8x128xbf16>
    %66 = vector.extract_strided_slice %57 {offsets = [0, 1, 1], sizes = [8, 8, 16], strides = [1, 1, 1]} : vector<8x10x18xbf16> to vector<8x8x16xbf16>
    %67 = vector.shape_cast %66 : vector<8x8x16xbf16> to vector<8x128xbf16>
    %68 = vector.extract_strided_slice %57 {offsets = [0, 1, 2], sizes = [8, 8, 16], strides = [1, 1, 1]} : vector<8x10x18xbf16> to vector<8x8x16xbf16>
    %69 = vector.shape_cast %68 : vector<8x8x16xbf16> to vector<8x128xbf16>
    %70 = vector.extract_strided_slice %57 {offsets = [0, 2, 0], sizes = [8, 8, 16], strides = [1, 1, 1]} : vector<8x10x18xbf16> to vector<8x8x16xbf16>
    %71 = vector.shape_cast %70 : vector<8x8x16xbf16> to vector<8x128xbf16>
    %72 = vector.extract_strided_slice %57 {offsets = [0, 2, 1], sizes = [8, 8, 16], strides = [1, 1, 1]} : vector<8x10x18xbf16> to vector<8x8x16xbf16>
    %73 = vector.shape_cast %72 : vector<8x8x16xbf16> to vector<8x128xbf16>
    %74 = vector.extract_strided_slice %57 {offsets = [0, 2, 2], sizes = [8, 8, 16], strides = [1, 1, 1]} : vector<8x10x18xbf16> to vector<8x8x16xbf16>
    %75 = vector.shape_cast %74 : vector<8x8x16xbf16> to vector<8x128xbf16>
    %76 = tpu.concatenate %59, %61, %63, %65, %67, %69, %71, %73, %75 in 0 : vector<8x128xbf16>, vector<8x128xbf16>, vector<8x128xbf16>, vector<8x128xbf16>, vector<8x128xbf16>, vector<8x128xbf16>, vector<8x128xbf16>, vector<8x128xbf16>, vector<8x128xbf16> -> vector<72x128xbf16>
    %c0_11 = arith.constant 0 : index
    %c0_12 = arith.constant 0 : index
    %77 = vector.load %arg6[%c0_11, %c0_12] : memref<8x72xbf16, #tpu.memory_space<vmem>>, vector<8x72xbf16>
    %cst_13 = arith.constant dense<0.000000e+00> : vector<8x128xf32>
    %78 = tpu.matmul %77, %76, %cst_13 {dimension_numbers = #tpu.dot_dimension_numbers<[1], [0], [0], [1], [0, 0, 1, 1], [], []>} : vector<8x72xbf16>, vector<72x128xbf16>, vector<8x128xf32> -> vector<8x128xf32>
    %79 = vector.extract_strided_slice %4 {offsets = [0, 2, 2], sizes = [8, 8, 16], strides = [1, 1, 1]} : vector<8x12x20xbf16> to vector<8x8x16xbf16>
    %80 = vector.shape_cast %79 : vector<8x8x16xbf16> to vector<8x128xbf16>
    %81 = arith.extf %80 : vector<8x128xbf16> to vector<8x128xf32>
    %c0_14 = arith.constant 0 : index
    %c0_15 = arith.constant 0 : index
    %82 = vector.load %arg7[%c0_14, %c0_15] : memref<8x1xf32, #tpu.memory_space<vmem>>, vector<8x1xf32>
    %83 = vector.broadcast %82 : vector<8x1xf32> to vector<8x128xf32>
    %84 = arith.mulf %78, %83 : vector<8x128xf32>
    %c0_16 = arith.constant 0 : index
    %c0_17 = arith.constant 0 : index
    %85 = vector.load %arg8[%c0_16, %c0_17] : memref<8x1xf32, #tpu.memory_space<vmem>>, vector<8x1xf32>
    %86 = vector.broadcast %85 : vector<8x1xf32> to vector<8x128xf32>
    %87 = arith.addf %84, %86 : vector<8x128xf32>
    %88 = arith.addf %87, %81 : vector<8x128xf32>
    %cst_18 = arith.constant 0.000000e+00 : f32
    %89 = vector.broadcast %cst_18 : f32 to vector<8x128xf32>
    %90 = arith.maximumf %88, %89 : vector<8x128xf32>
    %c0_19 = arith.constant 0 : index
    %c0_20 = arith.constant 0 : index
    %c0_21 = arith.constant 0 : index
    %91 = vector.load %arg9[%c0_19, %c0_20, %c0_21] : memref<1x8x128xf32, #tpu.memory_space<vmem>>, vector<1x8x128xf32>
    %92 = vector.shape_cast %91 : vector<1x8x128xf32> to vector<8x128xf32>
    %93 = vector.shape_cast %90 : vector<8x128xf32> to vector<1x8x128xf32>
    tpu.vector_store %arg9[%c0_19, %c0_20, %c0_21], %93 {strides = array<i32>} : memref<1x8x128xf32, #tpu.memory_space<vmem>>, vector<1x8x128xf32>,
    return
  }
  func.func @transform_0(%arg0: i32, %arg1: i32) -> (i32, i32, i32, i32) {
    %c0_i32 = arith.constant 0 : i32
    %c0_i32_0 = arith.constant 0 : i32
    %c0_i32_1 = arith.constant 0 : i32
    %c0_i32_2 = arith.constant 0 : i32
    return %arg0, %c0_i32, %c0_i32_0, %c0_i32_1 : i32, i32, i32, i32
  }
  func.func @transform_1(%arg0: i32, %arg1: i32) -> (i32, i32) {
    %c0_i32 = arith.constant 0 : i32
    %c0_i32_0 = arith.constant 0 : i32
    %c0_i32_1 = arith.constant 0 : i32
    return %c0_i32, %c0_i32_0 : i32, i32
  }
  func.func @transform_2(%arg0: i32, %arg1: i32) -> (i32, i32) {
    %c0_i32 = arith.constant 0 : i32
    %c0_i32_0 = arith.constant 0 : i32
    %c0_i32_1 = arith.constant 0 : i32
    return %c0_i32, %c0_i32_0 : i32, i32
  }
  func.func @transform_3(%arg0: i32, %arg1: i32) -> (i32, i32) {
    %c0_i32 = arith.constant 0 : i32
    %c0_i32_0 = arith.constant 0 : i32
    %c0_i32_1 = arith.constant 0 : i32
    return %c0_i32, %c0_i32_0 : i32, i32
  }
  func.func @transform_4(%arg0: i32, %arg1: i32) -> (i32, i32) {
    %c0_i32 = arith.constant 0 : i32
    %c0_i32_0 = arith.constant 0 : i32
    %c0_i32_1 = arith.constant 0 : i32
    return %c0_i32, %c0_i32_0 : i32, i32
  }
  func.func @transform_5(%arg0: i32, %arg1: i32) -> (i32, i32) {
    %c0_i32 = arith.constant 0 : i32
    %c0_i32_0 = arith.constant 0 : i32
    %c0_i32_1 = arith.constant 0 : i32
    return %c0_i32, %c0_i32_0 : i32, i32
  }
  func.func @transform_6(%arg0: i32, %arg1: i32) -> (i32, i32) {
    %c0_i32 = arith.constant 0 : i32
    %c0_i32_0 = arith.constant 0 : i32
    %c0_i32_1 = arith.constant 0 : i32
    return %c0_i32, %c0_i32_0 : i32, i32
  }
  func.func @transform_7(%arg0: i32, %arg1: i32) -> (i32, i32, i32) {
    %c0_i32 = arith.constant 0 : i32
    %c0_i32_0 = arith.constant 0 : i32
    return %arg0, %c0_i32, %arg1 : i32, i32, i32
  }
}

</mosaic_0001>

<bundles_post_ra>
// kernel: tpu_custom_call.1
= control target key start
LH: loop header
LB: loop body
LE: loop exit
PB: predicated region body
PF: predicated region fallthrough
CT: control target
= control target key end

     0   :  { %s7521_s0 = inlined_call_operand.vmem [shape: bf16[2,8,36,20], index: 0, kind: input, shape index: {}]   ;;  %s7522_s1 = inlined_call_operand.vmem [shape: bf16[8,72], index: 1, kind: input, shape index: {}]   ;;  %s7523_s2 = inlined_call_operand.vmem [shape: f32[8,1], index: 2, kind: input, shape index: {}]   ;;  %s7524_s3 = inlined_call_operand.vmem [shape: f32[8,1], index: 3, kind: input, shape index: {}]   ;;  %s7525_s4 = inlined_call_operand.vmem [shape: bf16[8,72], index: 4, kind: input, shape index: {}]   ;;  %s7526_s5 = inlined_call_operand.vmem [shape: f32[8,1], index: 5, kind: input, shape index: {}]   ;;  %s7527_s6 = inlined_call_operand.vmem [shape: f32[8,1], index: 6, kind: input, shape index: {}]   ;;  %s7528_s7 = inlined_call_operand.hbm [shape: f32[2,8,512], index: 7, kind: output, shape index: {}]  }
   0x1   :  { %7556 = sst [smem:[#allocation22_spill]] %s7521_s0 }
   0x2   :  { %12 = vsyncpa [#allocation3], 0 }
   0x3   :  { %14 = vsyncpa [#allocation3 + $0x1], 0  ;;  %s5010_s24 = smov 0   ;;  %s5012_s25 = smov 0  }
   0x4   :  { %s5014_s26 = smov 0   ;;  %s5016_s27 = smov 0  }
   0x5   :  { %s5018_s28 = smov 0   ;;  %s5020_s29 = smov 0  }
   0x6   :  { %s5022_s30 = smov 0   ;;  %s5024_s8 = smov 0  }
   0x7 LB: > { %s4588_s9 = sadd.s32 4294967295, %s4938_s8   ;;  %s4589_s10 = sadd.s32 4294967294, %s4938_s8   ;;  %s4938_s8 = sphi %s5024_s8, %s20_s8   ;;  %s4934_s30 = sphi %s5022_s30, %s7644_s30   ;;  %s4930_s29 = sphi %s5020_s29, %s7643_s29   ;;  %s4926_s28 = sphi %s5018_s28, %s7642_s28   ;;  %s4922_s27 = sphi %s5016_s27, %s7641_s27   ;;  %s4918_s26 = sphi %s5014_s26, %s7640_s26   ;;  %s4914_s25 = sphi %s5012_s25, %s7639_s25   ;;  %s4910_s24 = sphi %s5010_s24, %s7638_s24  }
   0x8   : > { %s29_s11 = sadd.s32 1, %s4930_s29  ;;  %s32_s12 = sadd.s32 1, %s4934_s30 }
   0x9   : > { %p30_p0 = scmp.ge.s32.totalorder %s29_s11, 4  ;;  %p203_p1 = scmp.ne.s32.totalorder %s4918_s26, %s4914_s25 }
   0xa   : > { %p204_p2 = scmp.eq.s32.totalorder %s4588_s9, 7  ;;  %p209_p5 = scmp.ne.s32.totalorder %s4914_s25, %s4910_s24 }
   0xb   : > { %s7646_s11 = smov (%p30_p0, %s29_s11), 0  ;;  %s7648_s12 = smov (!%p30_p0, %s32_s12), %s4934_s30 }
   0xc   : > { %s189_s13 = ssub.s32 %s4930_s29, %s7646_s11  ;;  %p5061_p3 = por %p204_p2, %p203_p1 }
   0xd   : > { %p34_p4 = scmp.ge.s32.totalorder %s7648_s12, 2  ;;  %p210_p6 = scmp.eq.s32.totalorder %s4589_s10, 7 }
   0xe   : > { %p4592_p7 = scmp.ge.s32.totalorder %s4938_s8, 1  ;;  %p254_p9 = scmp.lt.s32.totalorder %s4938_s8, 9 }
   0xf   : > { %s7650_s12 = smov (%p34_p4, %s7648_s12), 0  ;;  %p5070_p8 = por %p210_p6, %p209_p5 }
  0x10   : > { %s188_s16 = ssub.s32 %s4934_s30, %s7650_s12  ;;  %s193_s17 = sadd.s32 1, %s4918_s26 }
  0x11   : > { %s190_s18 = sor.u32 %s189_s13, %s188_s16  ;;  %p255_p10 = pnand %p4592_p7, %p254_p9 }
  0x12   : > { %p191_p11 = scmp.eq.s32.totalorder %s190_s18, 0 }
  0x13   : > { %258 = sbr.rel (%p255_p10) target bundleno = 1465 (0x5b9), region = 48 }
  0x14   : > { %s5079_s19 = scalar_select %p191_p11, %s4918_s26, %s193_s17  }
  0x18   : > { %p286_p12 = scmp.lt.s32.totalorder %s4926_s28, 1  ;;  %s7548_s20 = sshll.u32 %s4922_s27, 3  ;;  %v7529_v0 = vlaneseq  ;;  %vm1907_vm0 = vcmask 1042432   ;;  %vm1908_vm1 = vcmask 1046532   ;;  %v4940_v2 = vmov 1983009808  }
  0x19   : > { %s293_s21 = sshra.s32 %s7548_s20, 3  ;;  %s7559_s0 = sld [smem:[#allocation22_spill]]  ;;  %vm5091_vm2 = vmor %vm1907_vm0, %vm1908_vm1  ;;  %v315_v3 = vunpack.c.l.s4 %v4940_v2  ;;  %vm1037_vm3 = vsmask.f32 3328  ;;  %vm1038_vm4 = vsmask.f32 7440 }
  0x1a   : > { %s287_s22 = scalar_select %p286_p12, %s4926_s28, 1  ;;  %v5096_v4 = vshrl.u32 %v7529_v0, 7  ;;  %vm5265_vm5 = vmor %vm1037_vm3, %vm1038_vm4  ;;  %vm495_vm6 = vcmask 146432   ;;  %vm499_vm7 = vcmask 293888   ;;  %vm502_vm8 = vcmask 441344  }
  0x1b   : > { %s4596_s9 = sshll.u32 %s293_s21, 2  ;;  %v316_v22 = vunpack.c.0.s8 %v315_v3  ;;  %s4941_s18 = smov 126   ;;  %vm505_vm9 = vcmask 588800   ;;  %vm508_vm10 = vcmask 736256   ;;  %vm511_vm11 = vcmask 883712  }
  0x1c   : > { %s4719_s23 = smul.u32 160, %s287_s22  ;;  %7562 = vst [vmem:[#allocation5_spill] sm:$0xff] %v5096_v4  ;;  %s7546_s21 = smov 127   ;;  %vm517_vm12 = vcmask 130048   ;;  %vm514_vm13 = vcmask 1031168   ;;  %vm520_vm14 = vcmask 277504  }
  0x1d   : > { %v5181_v38 = vsub.s32 %v316_v22, %v5096_v4  ;;  %s4945_s22 = smov 36   ;;  %s4948_s10 = smov 72   ;;  %vm2681_vm15 = vcmask 1043456   ;;  %vm2797_vm0 = vcmask 15360  }
  0x1e   : > { %s4949_s13 = smov 90   ;;  %s4952_s20 = smov 34  }
  0x1f   : > { %s290_s16 = scalar_lea.vmem %s7559_s0, %s4719_s23  ;;  %s4946_s23 = smov 18  }
  0x20   : > { %s5089_s17 = scalar_lea.vmem %s290_s16, %s4596_s9  ;;  %s4947_s9 = smov 54  }
  0x21   : > { %v5099_v5 = vld [vmem:[%s5089_s17 + $0x28] sm:$0xf]  ;;  %v5102_v6 = vld [vmem:[%s5089_s17 + $0x2c] sm:$0x3]  ;;  %v5105_v7 = vld [vmem:[%s5089_s17] sm:$0xf] }
  0x22   : > { %v4653_v8 = vrot.slane %v5099_v5, 9  ;;  %v1922_v9 = vrot.slane %v5102_v6, 5  ;;  %v5110_v10 = vld [vmem:[%s5089_s17 + $0x4] sm:$0x3]  ;;  %v4651_v11 = vrot.slane %v5105_v7, 9  ;;  %v1041_v12 = vshrl.u32 %v5105_v7, 16 }
  0x23   : > { %v1912_v13 = vrot.slane %v5110_v10, 5  ;;  %v5116_v14 = vld [vmem:[%s5089_s17 + $0x3c] sm:$0xf]  ;;  %v5119_v15 = vld [vmem:[%s5089_s17 + $0x40] sm:$0x3]  ;;  %v1044_v16 = vshll.u32 %v5105_v7, 16 }
  0x24   : > { %v5126_v17 = vsel %vm5091_vm2, %v4653_v8, %v1922_v9  ;;  %v4654_v18 = vrot.slane %v5116_v14, 9  ;;  %v1927_v19 = vrot.slane %v5119_v15, 5  ;;  %v5131_v20 = vld [vmem:[%s5089_s17 + $0x14] sm:$0xf]  ;;  %v5134_v21 = vld [vmem:[%s5089_s17 + $0x18] sm:$0x3] }
  0x25   : > { %2424 = vrot.lane.b32.xlu1 %v5126_v17, %s4941_s18  ;;  %v5142_v23 = vsel %vm5091_vm2, %v4651_v11, %v1912_v13  ;;  %v4652_v24 = vrot.slane %v5131_v20, 9  ;;  %v1917_v25 = vrot.slane %v5134_v21, 5  ;;  %v5147_v26 = vld [vmem:[%s5089_s17 + $0x64] sm:$0xf]  ;;  %v5150_v27 = vld [vmem:[%s5089_s17 + $0x68] sm:$0x3] }
  0x26   : > { %2416 = vrot.lane.b32.xlu0 %v5142_v23, %s4941_s18  ;;  %v5158_v28 = vsel %vm5091_vm2, %v4654_v18, %v1927_v19  ;;  %v4656_v29 = vrot.slane %v5147_v26, 9  ;;  %v1937_v30 = vrot.slane %v5150_v27, 5  ;;  %v5163_v31 = vld [vmem:[%s5089_s17 + $0x50] sm:$0xf]  ;;  %v5166_v32 = vld [vmem:[%s5089_s17 + $0x54] sm:$0x3] }
  0x27   : > { %v1918_v33 = vsel %vm5091_vm2, %v4652_v24, %v1917_v25  ;;  %v4655_v34 = vrot.slane %v5163_v31, 9  ;;  %v1932_v35 = vrot.slane %v5166_v32, 5  ;;  %v5175_v36 = vld [vmem:[%s5089_s17 + $0x8c] sm:$0xf]  ;;  %v5178_v37 = vld [vmem:[%s5089_s17 + $0x90] sm:$0x3] }
  0x28   : > { %v5187_v39 = vsel %vm5091_vm2, %v4656_v29, %v1937_v30  ;;  %v4658_v40 = vrot.slane %v5175_v36, 9  ;;  %v1947_v41 = vrot.slane %v5178_v37, 5  ;;  %v5192_v42 = vld [vmem:[%s5089_s17 + $0x78] sm:$0xf]  ;;  %v5195_v43 = vld [vmem:[%s5089_s17 + $0x7c] sm:$0x3] }
  0x29   : > { %2428 = vrot.lane.b32.xlu1 %v5158_v28, %s4941_s18  ;;  %v2000_v44 = vcombine.low %v1918_v33, %v5187_v39  ;;  %v5204_v45 = vsel %vm5091_vm2, %v4655_v34, %v1932_v35  ;;  %v4657_v46 = vrot.slane %v5192_v42, 9  ;;  %v1942_v47 = vrot.slane %v5195_v43, 5  ;;  %s4950_s16 = smov 108  }
  0x2a   : > { %2420 = vrot.lane.b32.xlu0 %v1918_v33, %s4941_s18  ;;  %v1966_v48 = vcombine.low %v5142_v23, %v5204_v45  ;;  %v5215_v49 = vsel %vm5091_vm2, %v4658_v40, %v1947_v41  ;;  %v1060_v50 = vshrl.u32 %v5131_v20, 16  ;;  %v1063_v51 = vshll.u32 %v5131_v20, 16 }
  0x2b   : > { %v5220_v52 = vrot.slane %v2000_v44, %v5181_v38  ;;  %v2008_v53 = vcombine.low %v5158_v28, %v5215_v49  ;;  %v5228_v54 = vsel %vm5091_vm2, %v4657_v46, %v1942_v47  ;;  %v1069_v60 = vshll.u32 %v5134_v21, 16 }
  0x2c   : > { %v5231_v55 = vrot.slane %v1966_v48, %v5181_v38  ;;  %v1974_v56 = vcombine.low %v5126_v17, %v5228_v54  ;;  %v1062_v57 = vrot.slane %v1060_v50, 4  ;;  %v1065_v58 = vrot.slane %v1063_v51, 5 }
  0x2d   : > { %2436 = vrot.lane.b32.xlu1 %v5187_v39, %s4941_s18  ;;  %v5238_v59 = vrot.slane %v2008_v53, %v5181_v38  ;;  %v1043_v61 = vrot.slane %v1041_v12, 4  ;;  %v1046_v62 = vrot.slane %v1044_v16, 5  ;;  %v1050_v2 = vshll.u32 %v5110_v10, 16 }
  0x2e   : > { %2432 = vrot.lane.b32.xlu0 %v5204_v45, %s4941_s18  ;;  %v5244_v63 = vrot.slane %v1974_v56, %v5181_v38  ;;  %v1066_v1 = vor.u32 %v1065_v58, %v1062_v57  ;;  %v1098_v3 = vshrl.u32 %v5116_v14, 16  ;;  %v1101_v12 = vshll.u32 %v5116_v14, 16 }
  0x2f   : > { %v2017_v11 = vcombine.high %v5220_v52, %v5238_v59  ;;  %v1047_v18 = vor.u32 %v1046_v62, %v1043_v61  ;;  %v5259_v29 = vrot.slane %v1069_v60, 5  ;;  %v5269_v44 = vrot.slane %v1050_v2, 5 }
  0x30   : > { %v1983_v22 = vcombine.high %v5231_v55, %v5244_v63  ;;  %v1067_v24 = vrot.slane %v1066_v1, 4  ;;  %v1100_v34 = vrot.slane %v1098_v3, 4  ;;  %v1103_v46 = vrot.slane %v1101_v12, 5 }
  0x31   : > { %2444 = vrot.lane.b32.xlu1 %v5215_v49, %s4941_s18  ;;  %v1048_v48 = vrot.slane %v1047_v18, 4  ;;  %v1107_v50 = vshll.u32 %v5119_v15, 16  ;;  %v1079_v51 = vshrl.u32 %v5099_v5, 16  ;;  %v1082_v53 = vshll.u32 %v5099_v5, 16 }
  0x32   : > { %2440 = vrot.lane.b32.xlu0 %v5228_v54, %s4941_s18  ;;  %v1104_v56 = vor.u32 %v1103_v46, %v1100_v34  ;;  %v1088_v57 = vshll.u32 %v5102_v6, 16  ;;  %v1136_v58 = vshrl.u32 %v5147_v26, 16  ;;  %v1139_v60 = vshll.u32 %v5147_v26, 16 }
  0x33   : > { %v5281_v61 = vsel %vm5265_vm5, %v1067_v24, %v5259_v29  ;;  %v1081_v62 = vrot.slane %v1079_v51, 4  ;;  %v1084_v1 = vrot.slane %v1082_v53, 5  ;;  %v1145_v2 = vshll.u32 %v5150_v27, 16 }
  0x34   : > { %v1105_v3 = vrot.slane %v1104_v56, 4  ;;  %v5286_v18 = vrot.slane %v1107_v50, 5  ;;  %v1138_v12 = vrot.slane %v1136_v58, 4  ;;  %v1141_v34 = vrot.slane %v1139_v60, 5 }
  0x35   : > { %2171 = vrot.lane.b32.xlu1 %v1918_v33, %s7546_s21  ;;  %v5291_v33 = vsel %vm5265_vm5, %v1048_v48, %v5269_v44  ;;  %v5293_v46 = vrot.slane %v1088_v57, 5  ;;  %v1117_v24 = vshrl.u32 %v5163_v31, 16  ;;  %v1120_v51 = vshll.u32 %v5163_v31, 16 }
  0x36   : > { %2167 = vrot.lane.b32.xlu0 %v5142_v23, %s7546_s21  ;;  %v1142_v53 = vor.u32 %v1141_v34, %v1138_v12  ;;  %v5297_v0 = vrot.slane %v1145_v2, 5  ;;  %v1126_v23 = vshll.u32 %v5166_v32, 16  ;;  %v1174_v50 = vshrl.u32 %v5175_v36, 16 }
  0x37   : > { %v1085_v56 = vor.u32 %v1084_v1, %v1081_v62  ;;  %v1119_v58 = vrot.slane %v1117_v24, 4  ;;  %v1122_v48 = vrot.slane %v1120_v51, 5  ;;  %v1177_v57 = vshll.u32 %v5175_v36, 16 }
  0x38   : > { %v5309_v60 = vsel %vm5265_vm5, %v1105_v3, %v5286_v18  ;;  %v1143_v2 = vrot.slane %v1142_v53, 4  ;;  %v1176_v12 = vrot.slane %v1174_v50, 4  ;;  %v1183_v34 = vshll.u32 %v5178_v37, 16 }
  0x39   : > { %2179 = vrot.lane.b32.xlu1 %v5158_v28, %s7546_s21  ;;  %v1123_v16 = vor.u32 %v1122_v48, %v1119_v58  ;;  %v5312_v8 = vrot.slane %v1126_v23, 5  ;;  %v1179_v28 = vrot.slane %v1177_v57, 5  ;;  %v1155_v62 = vshrl.u32 %v5192_v42, 16 }
  0x3a   : > { %2175 = vrot.lane.b32.xlu0 %v5126_v17, %s7546_s21  ;;  %v5318_v1 = vsel %vm5265_vm5, %v1143_v2, %v5297_v0  ;;  %v5320_v17 = vrot.slane %v1183_v34, 5  ;;  %v1158_v3 = vshll.u32 %v5192_v42, 16  ;;  %v1164_v24 = vshll.u32 %v5195_v43, 16 }
  0x3b   : > { %v1242_v51 = vcombine.low %v5281_v61, %v5318_v1  ;;  %v1124_v53 = vrot.slane %v1123_v16, 4  ;;  %v1180_v23 = vor.u32 %v1179_v28, %v1176_v12  ;;  %v1157_v50 = vrot.slane %v1155_v62, 4 }
  0x3c   : > { %v1086_v58 = vrot.slane %v1085_v56, 4  ;;  %v1160_v48 = vrot.slane %v1158_v3, 5  ;;  %v5330_v57 = vrot.slane %v1164_v24, 5  ;;  %v5334_v2 = vrot.slane %v1917_v25, 4 }
  0x3d   : > { %2187 = vrot.lane.b32.xlu1 %v5187_v39, %s7546_s21  ;;  %v5339_v39 = vsel %vm5265_vm5, %v1124_v53, %v5312_v8  ;;  %v1181_v34 = vrot.slane %v1180_v23, 4  ;;  %v5343_v16 = vrot.slane %v1912_v13, 4  ;;  %v5353_v25 = vrot.slane %v1922_v9, 4 }
  0x3e   : > { %2183 = vrot.lane.b32.xlu0 %v5204_v45, %s7546_s21  ;;  %v5347_v45 = vrot.slane %v1927_v19, 4  ;;  %v1208_v56 = vcombine.low %v5291_v33, %v5339_v39  ;;  %v1161_v12 = vor.u32 %v1160_v48, %v1157_v50  ;;  %v5357_v28 = vrot.slane %v1937_v30, 4 }
  0x3f   : > { %v5364_v13 = vsel %vm5265_vm5, %v1181_v34, %v5320_v17  ;;  %v5368_v19 = vrot.slane %v1932_v35, 4  ;;  %v5372_v9 = vrot.slane %v1947_v41, 4  ;;  %v5376_v30 = vrot.slane %v1942_v47, 4 }
  0x40   : > { %v1250_v62 = vcombine.low %v5309_v60, %v5364_v13  ;;  %v1162_v3 = vrot.slane %v1161_v12, 4  ;;  %v2058_v35 = vcombine.low %v5334_v2, %v5357_v28  ;;  %v5405_v23 = vrot.slane %v1208_v56, %v5181_v38 }
  0x41   : > { %2195 = vrot.lane.b32.xlu1 %v5215_v49, %s7546_s21  ;;  %v5381_v49 = vrot.slane %v1242_v51, %v5181_v38  ;;  %v2034_v41 = vcombine.low %v5343_v16, %v5368_v19  ;;  %v2066_v47 = vcombine.low %v5347_v45, %v5372_v9  ;;  %v7530_v12 = vmov 0  }
  0x42   : > { %2191 = vrot.lane.b32.xlu0 %v5228_v54, %s7546_s21  ;;  %v1091_v54 = vsel %vm5265_vm5, %v1086_v58, %v5293_v46  ;;  %v5397_v51 = vrot.slane %v1250_v62, %v5181_v38  ;;  %v1167_v53 = vsel %vm5265_vm5, %v1162_v3, %v5330_v57  ;;  %2746 = vmatprep.mubr.bf16.mxu0 %v7530_v12  ;;  %v1073_v62 = vshrl.u32 %v5134_v21, 16 }
  0x43   : > { %v1216_v50 = vcombine.low %v1091_v54, %v1167_v53  ;;  %4820 = vset.pattern.permute.xlu1 %v7530_v12  ;;  %4821 = vset.pattern.permute.xlu0 %v7530_v12  ;;  %v1054_v3 = vshrl.u32 %v5110_v10, 16  ;;  %v1111_v58 = vshrl.u32 %v5119_v15, 16  ;;  %v1092_v56 = vshrl.u32 %v5102_v6, 16 }
  0x44   : > { %v4944_v48 = vmov 1934713408   ;;  %v1149_v24 = vshrl.u32 %v5150_v27, 16 }
  0x45   : > { %1662 = vrot.lane.b32.xlu1 %v5281_v61, %s4941_s18  ;;  %v5414_v34 = vrot.slane %v1216_v50, %v5181_v38  ;;  %v1075_v50 = vrot.slane %v1073_v62, 4  ;;  %v1056_v40 = vrot.slane %v1054_v3, 4  ;;  %v1113_v12 = vrot.slane %v1111_v58, 4 }
  0x46   : > { %1658 = vrot.lane.b32.xlu0 %v5291_v33, %s4941_s18  ;;  %v1094_v62 = vrot.slane %v1092_v56, 4  ;;  %v1187_v58 = vshrl.u32 %v5178_v37, 16 }
  0x49   : > { %1670 = vrot.lane.b32.xlu1 %v5309_v60, %s4941_s18 }
  0x4a   : > { %1666 = vrot.lane.b32.xlu0 %v1091_v54, %s4941_s18 }
  0x4d   : > { %1678 = vrot.lane.b32.xlu1 %v5318_v1, %s4941_s18 }
  0x4e   : > { %1674 = vrot.lane.b32.xlu0 %v5339_v39, %s4941_s18 }
  0x51   : > { %1686 = vrot.lane.b32.xlu1 %v5364_v13, %s4941_s18 }
  0x52   : > { %1682 = vrot.lane.b32.xlu0 %v1167_v53, %s4941_s18 }
  0x55   : > { %2422 = vrot.lane.b32.xlu1 %v5334_v2, %s4941_s18 }
  0x56   : > { %2418 = vrot.lane.b32.xlu0 %v5343_v16, %s4941_s18 }
  0x59   : > { %2430 = vrot.lane.b32.xlu1 %v5347_v45, %s4941_s18 }
  0x5a   : > { %2426 = vrot.lane.b32.xlu0 %v5353_v25, %s4941_s18 }
  0x5d   : > { %2438 = vrot.lane.b32.xlu1 %v5357_v28, %s4941_s18 }
  0x5e   : > { %2434 = vrot.lane.b32.xlu0 %v5368_v19, %s4941_s18 }
  0x61   : > { %2446 = vrot.lane.b32.xlu1 %v5372_v9, %s4941_s18 }
  0x62   : > { %2442 = vrot.lane.b32.xlu0 %v5376_v30, %s4941_s18 }
  0x65   : > { %2173 = vrot.lane.b32.xlu1 %v5334_v2, %s7546_s21  ;;  %v7573_v2 = vmov 0  }
  0x66   : > { %2169 = vrot.lane.b32.xlu0 %v5343_v16, %s7546_s21 }
  0x69   : > { %2181 = vrot.lane.b32.xlu1 %v5347_v45, %s7546_s21 }
  0x6a   : > { %2177 = vrot.lane.b32.xlu0 %v5353_v25, %s7546_s21 }
  0x6d   : > { %2189 = vrot.lane.b32.xlu1 %v5357_v28, %s7546_s21 }
  0x6e   : > { %2185 = vrot.lane.b32.xlu0 %v5368_v19, %s7546_s21 }
  0x71   : > { %2197 = vrot.lane.b32.xlu1 %v5372_v9, %s7546_s21 }
  0x72   : > { %2193 = vrot.lane.b32.xlu0 %v5376_v30, %s7546_s21 }
  0x75   : > { %1413 = vrot.lane.b32.xlu1 %v5281_v61, %s7546_s21  ;;  %v332_v61 = vunpack.c.l.s4 %v4944_v48 }
  0x76   : > { %1409 = vrot.lane.b32.xlu0 %v5291_v33, %s7546_s21  ;;  %v1076_v33 = vor.u32 %v1075_v50, %v5259_v29  ;;  %v1151_v29 = vrot.slane %v1149_v24, 4  ;;  %v1189_v24 = vrot.slane %v1187_v58, 4 }
  0x77   : > { %v333_v3 = vunpack.c.0.s8 %v332_v61 }
  0x78   : > { %v5486_v48 = vrot.slane %v1076_v33, 4 }
  0x79   : > { %1421 = vrot.lane.b32.xlu1 %v5309_v60, %s7546_s21  ;;  %v1057_v60 = vor.u32 %v1056_v40, %v5269_v44  ;;  %v1095_v44 = vor.u32 %v1094_v62, %v5293_v46  ;;  %v1168_v40 = vshrl.u32 %v5195_v43, 16  ;;  %v5496_v56 = vsub.s32 %v333_v3, %v5096_v4 }
  0x7a   : > { %1417 = vrot.lane.b32.xlu0 %v1091_v54, %s7546_s21  ;;  %v1130_v54 = vshrl.u32 %v5166_v32, 16  ;;  %7565 = vst [vmem:[#allocation6_spill] sm:$0xff] %v5486_v48  ;;  %v2073_v3 = vrot.slane %v2066_v47, %v5181_v38 }
  0x7b   : > { %v5491_v50 = vrot.slane %v1057_v60, 4  ;;  %v2031_v61 = vrot.slane %v2017_v11, %v5496_v56  ;;  %v1997_v33 = vrot.slane %v1983_v22, %v5496_v56  ;;  %v1190_v60 = vor.u32 %v1189_v24, %v5320_v17 }
  0x7c   : > { %v2065_v17 = vrot.slane %v2058_v35, %v5181_v38 }
  0x7d   : > { %1429 = vrot.lane.b32.xlu1 %v5318_v1, %s7546_s21  ;;  %v1114_v1 = vor.u32 %v1113_v12, %v5286_v18  ;;  %7566 = vst [vmem:[#allocation7_spill] sm:$0xff] %v5491_v50  ;;  %v1152_v18 = vor.u32 %v1151_v29, %v5297_v0  ;;  %v1170_v12 = vrot.slane %v1168_v40, 4  ;;  %v5526_v11 = vpack.i.b16 %v2031_v61, %v1997_v33 }
  0x7e   : > { %1425 = vrot.lane.b32.xlu0 %v5339_v39, %s7546_s21  ;;  %v1132_v39 = vrot.slane %v1130_v54, 4  ;;  %v5530_v22 = vrot.slane %v1190_v60, 4  ;;  %v1999_v28 = vcombine.high %v1997_v33, %v7573_v2  ;;  %v2033_v35 = vcombine.high %v2031_v61, %v7573_v2 }
  0x7f   : > { %v5518_v0 = vrot.slane %v1152_v18, 4  ;;  %v1171_v62 = vor.u32 %v1170_v12, %v5330_v57  ;;  %v2041_v57 = vrot.slane %v2034_v41, %v5181_v38  ;;  %v2097_v41 = vshrl.u32 %v1997_v33, 16 }
  0x80   : > { %v1133_v46 = vor.u32 %v1132_v39, %v5312_v8  ;;  %7570 = vst [vmem:[#allocation11_spill] sm:$0xff] %v5530_v22  ;;  %v2103_v16 = vshrl.u32 %v1999_v28, 16  ;;  %v2104_v19 = vshrl.u32 %v2033_v35, 16  ;;  %v2098_v58 = vshrl.u32 %v2031_v61, 16 }
  0x81   : > { %1437 = vrot.lane.b32.xlu1 %v5364_v13, %s7546_s21  ;;  %v5500_v13 = vrot.slane %v1114_v1, 4  ;;  %v5534_v54 = vrot.slane %v1171_v62, 4  ;;  %v7572_v1 = vcombine.low %v5353_v25, %v5376_v30  ;;  %v2074_v30 = vcombine.low %v2065_v17, %v2073_v3 }
  0x82   : > { %1433 = vrot.lane.b32.xlu0 %v1167_v53, %s7546_s21  ;;  %v5505_v53 = vrot.slane %v1095_v44, 4  ;;  %v5523_v8 = vrot.slane %v1133_v46, 4  ;;  %v5562_v9 = vpack.i.b16 %v2104_v19, %v2103_v16  ;;  %v5564_v47 = vpack.i.b16 %v2098_v58, %v2097_v41 }
  0x83   : > { %7567 = vst [vmem:[#allocation8_spill] sm:$0xff] %v5500_v13  ;;  %7571 = vst [vmem:[#allocation12_spill] sm:$0xff] %v5534_v54  ;;  %v2049_v29 = vrot.slane %v7572_v1, %v5181_v38  ;;  %v2081_v40 = vrot.slane %v2074_v30, %v5496_v56  ;;  %v5578_v61 = vpack.i.b16 %v2033_v35, %v1999_v28 }
  0x84   : > { %7568 = vst [vmem:[#allocation9_spill] sm:$0xff] %v5505_v53  ;;  %7569 = vst [vmem:[#allocation10_spill] sm:$0xff] %v5523_v8 }
  0x85   : > { %1664 = vrot.lane.b32.xlu1 %v5486_v48, %s4941_s18  ;;  %v2050_v25 = vcombine.low %v2041_v57, %v2049_v29  ;;  %v2110_v62 = vshrl.u32 %v2081_v40, 16 }
  0x86   : > { %1660 = vrot.lane.b32.xlu0 %v5491_v50, %s4941_s18 }
  0x87   : > { %v2057_v39 = vrot.slane %v2050_v25, %v5496_v56 }
  0x89   : > { %1672 = vrot.lane.b32.xlu1 %v5500_v13, %s4941_s18  ;;  %v5572_v24 = vpack.i.b16 %v2081_v40, %v2057_v39  ;;  %v2109_v60 = vshrl.u32 %v2057_v39, 16 }
  0x8a   : > { %1668 = vrot.lane.b32.xlu0 %v5505_v53, %s4941_s18 }
  0x8b   : > { %v5584_v57 = vpack.i.b16 %v2110_v62, %v2109_v60 }
  0x8d   : > { %1680 = vrot.lane.b32.xlu1 %v5518_v0, %s4941_s18 }
  0x8e   : > { %1676 = vrot.lane.b32.xlu0 %v5523_v8, %s4941_s18 }
  0x91   : > { %1688 = vrot.lane.b32.xlu1 %v5530_v22, %s4941_s18 }
  0x92   : > { %1684 = vrot.lane.b32.xlu0 %v5534_v54, %s4941_s18 }
  0x95   : > { %792 = vrot.lane.b32.xlu1 %v5131_v20, %s4941_s18 }
  0x96   : > { %788 = vrot.lane.b32.xlu0 %v5105_v7, %s4941_s18 }
  0x97   : > { %v2425_v45 = vpop.permute.xlu1 %2424 }
  0x98   : > { %v2417_v44 = vpop.permute.xlu0 %2416 }
  0x99   : > { %800 = vrot.lane.b32.xlu1 %v5116_v14, %s4941_s18 }
  0x9a   : > { %796 = vrot.lane.b32.xlu0 %v5099_v5, %s4941_s18 }
  0x9b   : > { %v2429_v18 = vpop.permute.xlu1 %2428 }
  0x9c   : > { %v2421_v46 = vpop.permute.xlu0 %2420 }
  0x9d   : > { %808 = vrot.lane.b32.xlu1 %v5147_v26, %s4941_s18 }
  0x9e   : > { %804 = vrot.lane.b32.xlu0 %v5163_v31, %s4941_s18 }
  0x9f   : > { %v2437_v12 = vpop.permute.xlu1 %2436 }
  0xa0   : > { %v2433_v33 = vpop.permute.xlu0 %2432  ;;  %v2498_v29 = vcombine.low %v2421_v46, %v2437_v12 }
  0xa1   : > { %816 = vrot.lane.b32.xlu1 %v5175_v36, %s4941_s18  ;;  %v2464_v16 = vcombine.low %v2417_v44, %v2433_v33 }
  0xa2   : > { %812 = vrot.lane.b32.xlu0 %v5192_v42, %s4941_s18  ;;  %v5597_v25 = vrot.slane %v2498_v29, %v5181_v38 }
  0xa3   : > { %v2445_v17 = vpop.permute.xlu1 %2444  ;;  %v5600_v30 = vrot.slane %v2464_v16, %v5181_v38 }
  0xa4   : > { %v2506_v3 = vcombine.low %v2429_v18, %v2445_v17  ;;  %v2441_v1 = vpop.permute.xlu0 %2440 }
  0xa5   : > { %v2472_v19 = vcombine.low %v2425_v45, %v2441_v1  ;;  %1415 = vrot.lane.b32.xlu1 %v5486_v48, %s7546_s21 }
  0xa6   : > { %1411 = vrot.lane.b32.xlu0 %v5491_v50, %s7546_s21  ;;  %v5591_v28 = vrot.slane %v2506_v3, %v5181_v38 }
  0xa7   : > { %v5594_v35 = vrot.slane %v2472_v19, %v5181_v38  ;;  %v2172_v41 = vpop.permute.xlu1 %2171 }
  0xa8   : > { %v2168_v58 = vpop.permute.xlu0 %2167  ;;  %v2514_v45 = vcombine.low %v5597_v25, %v5591_v28 }
  0xa9   : > { %1423 = vrot.lane.b32.xlu1 %v5500_v13, %s7546_s21  ;;  %v2480_v44 = vcombine.low %v5600_v30, %v5594_v35 }
  0xaa   : > { %1419 = vrot.lane.b32.xlu0 %v5505_v53, %s7546_s21  ;;  %v5615_v18 = vrot.slane %v2514_v45, %v5496_v56 }
  0xab   : > { %v2180_v39 = vpop.permute.xlu1 %2179  ;;  %v5618_v46 = vrot.slane %v2480_v44, %v5496_v56 }
  0xac   : > { %v2176_v40 = vpop.permute.xlu0 %2175 }
  0xad   : > { %1431 = vrot.lane.b32.xlu1 %v5518_v0, %s7546_s21  ;;  %v5626_v3 = vpack.i.b16 %v5615_v18, %v5618_v46 }
  0xae   : > { %1427 = vrot.lane.b32.xlu0 %v5523_v8, %s7546_s21 }
  0xaf   : > { %v2188_v12 = vpop.permute.xlu1 %2187  ;;  %7574 = vst [vmem:[#allocation13_spill] sm:$0xff] %v5626_v3 }
  0xb0   : > { %v2184_v33 = vpop.permute.xlu0 %2183  ;;  %v2249_v60 = vcombine.low %v2172_v41, %v2188_v12 }
  0xb1   : > { %1439 = vrot.lane.b32.xlu1 %v5530_v22, %s7546_s21  ;;  %v2215_v62 = vcombine.low %v2168_v58, %v2184_v33 }
  0xb2   : > { %1435 = vrot.lane.b32.xlu0 %v5534_v54, %s7546_s21  ;;  %v5631_v19 = vrot.slane %v2249_v60, %v5181_v38 }
  0xb3   : > { %v2196_v17 = vpop.permute.xlu1 %2195  ;;  %v5639_v58 = vrot.slane %v2215_v62, %v5181_v38  ;;  %v7577_v62 = vcombine.high %v5381_v49, %v5397_v51 }
  0xb4   : > { %v2257_v1 = vcombine.low %v2180_v39, %v2196_v17  ;;  %v2192_v29 = vpop.permute.xlu0 %2191 }
  0xb5   : > { %v2223_v16 = vcombine.low %v2176_v40, %v2192_v29  ;;  %543 = vrot.lane.b32.xlu1 %v5131_v20, %s7546_s21  ;;  %v1273_v17 = vrot.slane %v7577_v62, %v5496_v56 }
  0xb6   : > { %v5634_v41 = vrot.slane %v2257_v1, %v5181_v38  ;;  %539 = vrot.lane.b32.xlu0 %v5105_v7, %s7546_s21 }
  0xb7   : > { %v5642_v45 = vrot.slane %v2223_v16, %v5181_v38  ;;  %v1663_v44 = vpop.permute.xlu1 %1662  ;;  %v1275_v53 = vcombine.high %v1273_v17, %v7573_v2 }
  0xb8   : > { %v2265_v39 = vcombine.low %v5631_v19, %v5634_v41  ;;  %v1659_v20 = vpop.permute.xlu0 %1658 }
  0xb9   : > { %v2231_v40 = vcombine.low %v5639_v58, %v5642_v45  ;;  %551 = vrot.lane.b32.xlu1 %v5116_v14, %s7546_s21  ;;  %v1346_v54 = vshrl.u32 %v1275_v53, 16 }
  0xba   : > { %v5651_v12 = vrot.slane %v2265_v39, %v5496_v56  ;;  %547 = vrot.lane.b32.xlu0 %v5099_v5, %s7546_s21  ;;  %v7578_v5 = vcombine.high %v5405_v23, %v5414_v34 }
  0xbb   : > { %v5656_v7 = vrot.slane %v2231_v40, %v5496_v56  ;;  %v1671_v33 = vpop.permute.xlu1 %1670 }
  0xbc   : > { %7575 = vst [vmem:[#allocation14_spill] sm:$0xff] %v5651_v12  ;;  %v1667_v60 = vpop.permute.xlu0 %1666  ;;  %v1239_v1 = vrot.slane %v7578_v5, %v5496_v56 }
  0xbd   : > { %7576 = vst [vmem:[#allocation15_spill] sm:$0xff] %v5656_v7  ;;  %559 = vrot.lane.b32.xlu1 %v5147_v26, %s7546_s21 }
  0xbe   : > { %555 = vrot.lane.b32.xlu0 %v5163_v31, %s7546_s21  ;;  %v5676_v31 = vpack.i.b16 %v1273_v17, %v1239_v1 }
  0xbf   : > { %v1679_v29 = vpop.permute.xlu1 %1678 }
  0xc0   : > { %v1675_v16 = vpop.permute.xlu0 %1674  ;;  %7579 = vst [vmem:[#allocation16_spill] sm:$0xff] %v5676_v31  ;;  %v1740_v62 = vcombine.low %v1663_v44, %v1679_v29  ;;  %v1241_v31 = vcombine.high %v1239_v1, %v7573_v2 }
  0xc1   : > { %567 = vrot.lane.b32.xlu1 %v5175_v36, %s7546_s21  ;;  %v1706_v5 = vcombine.low %v1659_v20, %v1675_v16 }
  0xc2   : > { %563 = vrot.lane.b32.xlu0 %v5192_v42, %s7546_s21  ;;  %v5697_v44 = vrot.slane %v1740_v62, %v5181_v38 }
  0xc3   : > { %v1687_v26 = vpop.permute.xlu1 %1686  ;;  %v5700_v20 = vrot.slane %v1706_v5, %v5181_v38 }
  0xc4   : > { %v1683_v39 = vpop.permute.xlu0 %1682  ;;  %v1748_v40 = vcombine.low %v1671_v33, %v1687_v26  ;;  %v1339_v33 = vshrl.u32 %v1239_v1, 16 }
  0xc5   : > { %v1714_v14 = vcombine.low %v1667_v60, %v1683_v39  ;;  %794 = vrot.lane.b32.xlu1 %v5134_v21, %s4941_s18  ;;  %v1340_v60 = vshrl.u32 %v1273_v17, 16 }
  0xc6   : > { %790 = vrot.lane.b32.xlu0 %v5110_v10, %s4941_s18  ;;  %v5687_v42 = vrot.slane %v1748_v40, %v5181_v38 }
  0xc7   : > { %v5682_v4 = vpop.permute.xlu1 %2422  ;;  %v5690_v3 = vrot.slane %v1714_v14, %v5181_v38  ;;  %v5704_v16 = vpack.i.b16 %v1340_v60, %v1339_v33 }
  0xc8   : > { %v5684_v36 = vpop.permute.xlu0 %2418  ;;  %v1756_v26 = vcombine.low %v5697_v44, %v5687_v42 }
  0xc9   : > { %802 = vrot.lane.b32.xlu1 %v5119_v15, %s4941_s18  ;;  %7580 = vst [vmem:[#allocation17_spill] sm:$0xff] %v5704_v16  ;;  %v1722_v39 = vcombine.low %v5700_v20, %v5690_v3 }
  0xca   : > { %798 = vrot.lane.b32.xlu0 %v5102_v6, %s4941_s18  ;;  %v5721_v5 = vrot.slane %v1756_v26, %v5496_v56  ;;  %v2583_v26 = vshrl.u32 %v5618_v46, 16 }
  0xcb   : > { %v5702_v29 = vpop.permute.xlu1 %2430  ;;  %v5724_v33 = vrot.slane %v1722_v39, %v5496_v56  ;;  %v1345_v39 = vshrl.u32 %v1241_v31, 16 }
  0xcc   : > { %v5706_v14 = vpop.permute.xlu0 %2426 }
  0xcd   : > { %810 = vrot.lane.b32.xlu1 %v5150_v27, %s4941_s18  ;;  %v5746_v50 = vpack.i.b16 %v1346_v54, %v1345_v39  ;;  %v2584_v54 = vshrl.u32 %v5615_v18, 16  ;;  %v5762_v39 = vpack.i.b16 %v1275_v53, %v1241_v31  ;;  %v2334_v31 = vshrl.u32 %v5656_v7, 16 }
  0xce   : > { %806 = vrot.lane.b32.xlu0 %v5166_v32, %s4941_s18 }
  0xcf   : > { %v5716_v40 = vpop.permute.xlu1 %2438  ;;  %7581 = vst [vmem:[#allocation18_spill] sm:$0xff] %v5746_v50  ;;  %v2585_v53 = vpack.i.b16 %v2584_v54, %v2583_v26 }
  0xd0   : > { %v5718_v62 = vpop.permute.xlu0 %2434 }
  0xd1   : > { %818 = vrot.lane.b32.xlu1 %v5178_v37, %s4941_s18 }
  0xd2   : > { %814 = vrot.lane.b32.xlu0 %v5195_v43, %s4941_s18 }
  0xd3   : > { %v5730_v60 = vpop.permute.xlu1 %2446 }
  0xd4   : > { %v5732_v16 = vpop.permute.xlu0 %2442 }
  0xd5   : > { %545 = vrot.lane.b32.xlu1 %v5134_v21, %s7546_s21  ;;  %v2496_v21 = vcombine.high %v5618_v46, %v7573_v2 }
  0xd6   : > { %541 = vrot.lane.b32.xlu0 %v5110_v10, %s7546_s21  ;;  %v2530_v10 = vcombine.high %v5615_v18, %v7573_v2 }
  0xd7   : > { %v5742_v13 = vpop.permute.xlu1 %2173  ;;  %v2589_v50 = vshrl.u32 %v2496_v21, 16 }
  0xd8   : > { %v5744_v22 = vpop.permute.xlu0 %2169  ;;  %v2590_v8 = vshrl.u32 %v2530_v10, 16  ;;  %v2588_v46 = vpack.i.b16 %v2530_v10, %v2496_v21  ;;  %v5808_v10 = vcombine.low %v2585_v53, %v2585_v53  ;;  %v2564_v53 = vcombine.low %v5702_v29, %v5730_v60 }
  0xd9   : > { %553 = vrot.lane.b32.xlu1 %v5119_v15, %s7546_s21  ;;  %v2481_v15 = vcombine.high %v5600_v30, %v5594_v35 }
  0xda   : > { %549 = vrot.lane.b32.xlu0 %v5102_v6, %s7546_s21  ;;  %v2515_v6 = vcombine.high %v5597_v25, %v5591_v28  ;;  %v7582_v28 = vcombine.low %v5220_v52, %v5238_v59  ;;  %v2591_v52 = vpack.i.b16 %v2590_v8, %v2589_v50  ;;  %v5800_v21 = vcombine.low %v2588_v46, %v2588_v46 }
  0xdb   : > { %v5756_v17 = vpop.permute.xlu1 %2181  ;;  %v2495_v26 = vrot.slane %v2481_v15, %v5496_v56  ;;  %7585 = vst [vmem:[#allocation20_spill] sm:$0xff] %v5808_v10  ;;  %v2571_v60 = vrot.slane %v2564_v53, %v5181_v38 }
  0xdc   : > { %v5758_v1 = vpop.permute.xlu0 %2177  ;;  %v5782_v35 = vrot.slane %v7582_v28, %v5496_v56  ;;  %v5793_v30 = vrot.slane %v2515_v6, %v5496_v56  ;;  %7584 = vst [vmem:[#allocation19_spill] sm:$0xff] %v5800_v21  ;;  %v5816_v8 = vcombine.low %v2591_v52, %v2591_v52 }
  0xdd   : > { %561 = vrot.lane.b32.xlu1 %v5150_v27, %s7546_s21  ;;  %v2335_v27 = vshrl.u32 %v5651_v12, 16 }
  0xde   : > { %557 = vrot.lane.b32.xlu0 %v5166_v32, %s7546_s21  ;;  %v7583_v32 = vcombine.low %v5231_v55, %v5244_v63  ;;  %v2247_v55 = vcombine.high %v5656_v7, %v7573_v2  ;;  %v2281_v63 = vcombine.high %v5651_v12, %v7573_v2  ;;  %v2086_v50 = vshrl.u32 %v5782_v35, 16 }
  0xdf   : > { %v5772_v48 = vpop.permute.xlu1 %2189  ;;  %v2336_v54 = vpack.i.b16 %v2335_v27, %v2334_v31  ;;  %v2594_v6 = vpack.i.b16 %v5793_v30, %v2495_v26  ;;  %v5825_v46 = vcombine.high %v5782_v35, %v7573_v2  ;;  %v2540_v31 = vcombine.low %v5706_v14, %v5732_v16 }
  0xe0   : > { %v5774_v18 = vpop.permute.xlu0 %2185  ;;  %v5788_v25 = vrot.slane %v7583_v32, %v5496_v56  ;;  %v2340_v28 = vshrl.u32 %v2247_v55, 16  ;;  %v2341_v32 = vshrl.u32 %v2281_v63, 16  ;;  %v2556_v7 = vcombine.low %v5682_v4, %v5716_v40 }
  0xe1   : > { %569 = vrot.lane.b32.xlu1 %v5178_v37, %s7546_s21  ;;  %v2532_v12 = vcombine.low %v5684_v36, %v5718_v62  ;;  %v2596_v14 = vshrl.u32 %v5793_v30, 16  ;;  %v5849_v40 = vcombine.low %v2594_v6, %v2594_v6  ;;  %v2266_v62 = vcombine.high %v5631_v19, %v5634_v41 }
  0xe2   : > { %565 = vrot.lane.b32.xlu0 %v5195_v43, %s7546_s21  ;;  %v2085_v43 = vshrl.u32 %v5788_v25, 16  ;;  %v5821_v15 = vcombine.high %v5788_v25, %v7573_v2  ;;  %v2342_v36 = vpack.i.b16 %v2341_v32, %v2340_v28  ;;  %v2497_v6 = vcombine.high %v2495_v26, %v7573_v2  ;;  %s4951_s21 = smov 16  }
  0xe3   : > { %v5798_v59 = vpop.permute.xlu1 %2197  ;;  %v2539_v53 = vrot.slane %v2532_v12, %v5181_v38  ;;  %v2531_v19 = vcombine.high %v5793_v30, %v7573_v2 }
  0xe4   : > { %v5806_v37 = vpop.permute.xlu0 %2193  ;;  %v2087_v29 = vpack.i.b16 %v2086_v50, %v2085_v43  ;;  %v2090_v16 = vpack.i.b16 %v5825_v46, %v5821_v15  ;;  %v2595_v43 = vshrl.u32 %v2495_v26, 16  ;;  %v2563_v50 = vrot.slane %v2556_v7, %v5181_v38 }
  0xe5   : > { %2616 = vrot.lane.b32.xlu1 %v5800_v21, %s4945_s22  ;;  %v4668_v21 = vcombine.low %v2336_v54, %v2336_v54  ;;  %v5868_v7 = vrot.slane %v2266_v62, %v5496_v56  ;;  %v2601_v32 = vshrl.u32 %v2497_v6, 16  ;;  %v2315_v62 = vcombine.low %v5756_v17, %v5798_v59 }
  0xe6   : > { %2612 = vrot.lane.b32.xlu0 %v5808_v10, %s4946_s23  ;;  %v2339_v10 = vpack.i.b16 %v2281_v63, %v2247_v55  ;;  %v2547_v55 = vrot.slane %v2540_v31, %v5181_v38  ;;  %v4659_v41 = vcombine.low %v2087_v29, %v2087_v29  ;;  %v4670_v31 = vcombine.low %v2342_v36, %v2342_v36 }
  0xe7   : > { %v5831_v27 = vpop.permute.xlu1 %1413  ;;  %v2597_v26 = vpack.i.b16 %v2596_v14, %v2595_v43  ;;  %v4660_v30 = vcombine.low %v2090_v16, %v2090_v16  ;;  %v2600_v29 = vpack.i.b16 %v2531_v19, %v2497_v6  ;;  %v2291_v14 = vcombine.low %v5758_v1, %v5806_v37 }
  0xe8   : > { %v5833_v52 = vpop.permute.xlu0 %1409  ;;  %v4669_v54 = vcombine.low %v2339_v10, %v2339_v10  ;;  %v2092_v6 = vshrl.u32 %v5825_v46, 16  ;;  %v2283_v17 = vcombine.low %v5744_v22, %v5774_v18  ;;  %v5904_v59 = vcombine.high %v5868_v7, %v7573_v2 }
  0xe9   : > { %2620 = vrot.lane.b32.xlu1 %v5816_v8, %s4947_s9  ;;  %v5887_v16 = vcombine.low %v2597_v26, %v2597_v26  ;;  %v5900_v1 = vcombine.low %v2600_v29, %v2600_v29  ;;  %v2322_v18 = vrot.slane %v2315_v62, %v5181_v38  ;;  %v2298_v46 = vrot.slane %v2291_v14, %v5181_v38 }
  0xea   : > { %2363 = vrot.lane.b32.xlu0 %v4668_v21, %s4946_s23  ;;  %v2232_v21 = vcombine.high %v5639_v58, %v5642_v45  ;;  %v2572_v58 = vcombine.low %v2563_v50, %v2571_v60  ;;  %v2548_v45 = vcombine.low %v2539_v53, %v2547_v55  ;;  %v2091_v53 = vshrl.u32 %v5821_v15, 16 }
  0xeb   : > { %v5847_v4 = vpop.permute.xlu1 %1421  ;;  %7586 = vst [vmem:[#allocation21_spill] sm:$0xff] %v5900_v1 }
  0xec   : > { %v5855_v63 = vpop.permute.xlu0 %1417  ;;  %v5871_v12 = vrot.slane %v2232_v21, %v5496_v56  ;;  %v5878_v60 = vrot.slane %v2572_v58, %v5496_v56  ;;  %v5881_v55 = vrot.slane %v2548_v45, %v5496_v56 }
  0xed   : > { %2624 = vrot.lane.b32.xlu1 %v5849_v40, %s4948_s10 }
  0xee   : > { %2367 = vrot.lane.b32.xlu0 %v4669_v54, %s4945_s22  ;;  %v2602_v54 = vshrl.u32 %v2531_v19, 16  ;;  %v2345_v43 = vpack.i.b16 %v5868_v7, %v5871_v12  ;;  %v2307_v19 = vcombine.low %v5742_v13, %v5772_v48  ;;  %v2606_v15 = vpack.i.b16 %v5878_v60, %v5881_v55 }
  0xef   : > { %v5865_v10 = vpop.permute.xlu1 %1429  ;;  %v1825_v48 = vshrl.u32 %v5724_v33, 16  ;;  %v1826_v13 = vshrl.u32 %v5721_v5, 16  ;;  %v5914_v22 = vcombine.high %v5871_v12, %v7573_v2  ;;  %v2346_v26 = vshrl.u32 %v5871_v12, 16 }
  0xf0   : > { %v5873_v28 = vpop.permute.xlu0 %1425  ;;  %v2603_v50 = vpack.i.b16 %v2602_v54, %v2601_v32  ;;  %v4671_v58 = vcombine.low %v2345_v43, %v2345_v43  ;;  %v2314_v32 = vrot.slane %v2307_v19, %v5181_v38  ;;  %v2290_v54 = vrot.slane %v2283_v17, %v5181_v38 }
  0xf1   : > { %2371 = vrot.lane.b32.xlu1 %v4670_v31, %s4947_s9  ;;  %v2093_v31 = vpack.i.b16 %v2092_v6, %v2091_v53  ;;  %v4684_v43 = vcombine.low %v2606_v15, %v2606_v15  ;;  %v2352_v53 = vshrl.u32 %v5914_v22, 16  ;;  %v2353_v12 = vshrl.u32 %v5904_v59, 16 }
  0xf2   : > { %2114 = vrot.lane.b32.xlu0 %v4659_v41, %s4946_s23  ;;  %v5922_v45 = vcombine.low %v2603_v50, %v2603_v50  ;;  %v1827_v50 = vpack.i.b16 %v1826_v13, %v1825_v48  ;;  %v2323_v6 = vcombine.low %v2314_v32, %v2322_v18  ;;  %v1491_v19 = vcombine.low %v5831_v27, %v5865_v10 }
  0xf3   : > { %v1438_v36 = vpop.permute.xlu1 %1437  ;;  %v2608_v27 = vshrl.u32 %v5878_v60, 16  ;;  %v2354_v48 = vpack.i.b16 %v2353_v12, %v2352_v53 }
  0xf4   : > { %v1434_v21 = vpop.permute.xlu0 %1433  ;;  %v1499_v29 = vcombine.low %v5847_v4, %v1438_v36  ;;  %v1457_v4 = vcombine.low %v5833_v52, %v5873_v28  ;;  %v2607_v52 = vshrl.u32 %v5881_v55, 16  ;;  %v4642_v28 = vcombine.low %v1827_v50, %v1827_v50 }
  0xf5   : > { %2118 = vrot.lane.b32.xlu1 %v4660_v30, %s4945_s22  ;;  %v2347_v30 = vshrl.u32 %v5868_v7, 16  ;;  %v1465_v62 = vcombine.low %v5855_v63, %v1434_v21  ;;  %v2299_v7 = vcombine.low %v2290_v54, %v2298_v46  ;;  %v4661_v63 = vcombine.low %v2093_v31, %v2093_v31 }
  0xf6   : > { %2628 = vrot.lane.b32.xlu0 %v5887_v16, %s4949_s13  ;;  %v5943_v21 = vrot.slane %v1499_v29, %v5181_v38  ;;  %v2330_v13 = vrot.slane %v2323_v6, %v5496_v56  ;;  %v5957_v46 = vrot.slane %v1491_v19, %v5181_v38  ;;  %v2609_v32 = vpack.i.b16 %v2608_v27, %v2607_v52 }
  0xf7   : > { %v5906_v37 = vpop.permute.xlu1 %1664  ;;  %v5946_v17 = vrot.slane %v1465_v62, %v5181_v38  ;;  %v2348_v15 = vpack.i.b16 %v2347_v30, %v2346_v26  ;;  %v2306_v18 = vrot.slane %v2299_v7, %v5496_v56  ;;  %v4674_v30 = vcombine.low %v2354_v48, %v2354_v48 }
  0xf8   : > { %v5918_v41 = vpop.permute.xlu0 %1660  ;;  %v1507_v60 = vcombine.low %v5957_v46, %v5943_v21  ;;  %v1772_v50 = vcombine.high %v5721_v5, %v7573_v2  ;;  %v2359_v6 = vshrl.u32 %v2330_v13, 16  ;;  %v4662_v52 = vcombine.low %v5526_v11, %v5526_v11 }
  0xf9   : > { %2632 = vrot.lane.b32.xlu1 %v5900_v1, %s4950_s16  ;;  %v4672_v29 = vcombine.low %v2348_v15, %v2348_v15  ;;  %v2357_v62 = vpack.i.b16 %v2330_v13, %v2306_v18  ;;  %v2358_v7 = vshrl.u32 %v2306_v18, 16 }
  0xfa   : > { %2375 = vrot.lane.b32.xlu0 %v4671_v58, %s4948_s10  ;;  %v5960_v58 = vrot.slane %v1457_v4, %v5181_v38  ;;  %v5980_v53 = vrot.slane %v1507_v60, %v5496_v56  ;;  %v4685_v4 = vcombine.low %v2609_v32, %v2609_v32  ;;  %v1832_v18 = vshrl.u32 %v1772_v50, 16 }
  0xfb   : > { %v5931_v14 = vpop.permute.xlu1 %1672  ;;  %v4675_v15 = vcombine.low %v2357_v62, %v2357_v62  ;;  %v2360_v60 = vpack.i.b16 %v2359_v6, %v2358_v7  ;;  %v2351_v32 = vpack.i.b16 %v5904_v59, %v5914_v22  ;;  %v7587_v7 = vcombine.low %v5405_v23, %v5414_v34 }
  0xfc   : > { %v5939_v36 = vpop.permute.xlu0 %1668  ;;  %v1473_v55 = vcombine.low %v5960_v58, %v5946_v17  ;;  %v1577_v62 = vshrl.u32 %v5980_v53, 16  ;;  %v6006_v22 = vcombine.high %v5980_v53, %v7573_v2  ;;  %v4665_v34 = vcombine.low %v5562_v9, %v5562_v9 }
  0xfd   : > { %2640 = vrot.lane.b32.xlu1 %v4684_v43, %s4951_s21  ;;  %v1738_v43 = vcombine.high %v5724_v33, %v7573_v2  ;;  %v4673_v6 = vcombine.low %v2351_v32, %v2351_v32 }
  0xfe   : > { %2636 = vrot.lane.b32.xlu0 %v5922_v45, %s4941_s18  ;;  %v5983_v12 = vrot.slane %v1473_v55, %v5496_v56 }
  0xff   : > { %v5952_v10 = vpop.permute.xlu1 %1680  ;;  %v1830_v27 = vpack.i.b16 %v1772_v50, %v1738_v43  ;;  %v1831_v13 = vshrl.u32 %v1738_v43, 16 }
 0x100   : > { %v5962_v31 = vpop.permute.xlu0 %1676  ;;  %v6002_v59 = vcombine.high %v5983_v12, %v7573_v2 }
 0x101   : > { %2122 = vrot.lane.b32.xlu1 %v4661_v63, %s4947_s9 }
 0x102   : > { %1854 = vrot.lane.b32.xlu0 %v4642_v28, %s4946_s23 }
 0x103   : > { %v5970_v26 = vpop.permute.xlu1 %1688 }
 0x104   : > { %v5972_v54 = vpop.permute.xlu0 %1684 }
 0x105   : > { %2387 = vrot.lane.b32.xlu1 %v4674_v30, %s4941_s18  ;;  %v4643_v30 = vcombine.low %v1830_v27, %v1830_v27  ;;  %v6012_v27 = vrot.slane %v7587_v7, %v5496_v56  ;;  %v1782_v9 = vcombine.low %v5939_v36, %v5972_v54  ;;  %v1798_v36 = vcombine.low %v5906_v37, %v5952_v10 }
 0x106   : > { %2379 = vrot.lane.b32.xlu0 %v4672_v29, %s4949_s13  ;;  %v1576_v29 = vshrl.u32 %v5983_v12, 16 }
 0x107   : > { %v793_v19 = vpop.permute.xlu1 %792  ;;  %v1789_v10 = vrot.slane %v1782_v9, %v5181_v38 }
 0x108   : > { %v789_v63 = vpop.permute.xlu0 %788  ;;  %v1578_v43 = vpack.i.b16 %v1577_v62, %v1576_v29  ;;  %v7588_v62 = vcombine.low %v5381_v49, %v5397_v51  ;;  %v1581_v49 = vpack.i.b16 %v6006_v22, %v6002_v59  ;;  %v1806_v51 = vcombine.low %v5931_v14, %v5970_v26 }
 0x109   : > { %2644 = vrot.lane.b32.xlu1 %v4685_v4, %s4952_s20  ;;  %v4676_v4 = vcombine.low %v2360_v60, %v2360_v60  ;;  %v1327_v14 = vshrl.u32 %v6012_v27, 16  ;;  %v1774_v26 = vcombine.low %v5918_v41, %v5962_v31 }
 0x10a   : > { %2391 = vrot.lane.b32.xlu0 %v4675_v15, %s4951_s21  ;;  %v1833_v15 = vpack.i.b16 %v1832_v18, %v1831_v13  ;;  %v1723_v18 = vcombine.high %v5700_v20, %v5690_v3  ;;  %v4633_v29 = vcombine.low %v1578_v43, %v1578_v43  ;;  %v4666_v43 = vcombine.low %v5572_v24, %v5572_v24 }
 0x10b   : > { %v801_v48 = vpop.permute.xlu1 %800  ;;  %v1813_v37 = vrot.slane %v1806_v51, %v5181_v38  ;;  %v4664_v24 = vcombine.low %v5578_v61, %v5578_v61  ;;  %v1582_v51 = vshrl.u32 %v6002_v59, 16  ;;  %v1583_v61 = vshrl.u32 %v6006_v22, 16 }
 0x10c   : > { %v797_v55 = vpop.permute.xlu0 %796  ;;  %v4644_v13 = vcombine.low %v1833_v15, %v1833_v15 }
 0x10d   : > { %2126 = vrot.lane.b32.xlu1 %v4662_v52, %s4948_s10 }
 0x10e   : > { %1858 = vrot.lane.b32.xlu0 %v4643_v30, %s4945_s22 }
 0x10f   : > { %v809_v11 = vpop.permute.xlu1 %808 }
 0x110   : > { %v805_v28 = vpop.permute.xlu0 %804  ;;  %v870_v50 = vcombine.low %v793_v19, %v809_v11  ;;  %v1757_v19 = vcombine.high %v5697_v44, %v5687_v42  ;;  %v6022_v11 = vrot.slane %v7588_v62, %v5496_v56  ;;  %v4663_v44 = vcombine.low %v5564_v47, %v5564_v47 }
 0x111   : > { %2395 = vrot.lane.b32.xlu1 %v4676_v4, %s4952_s20  ;;  %v836_v52 = vcombine.low %v789_v63, %v805_v28  ;;  %v1737_v47 = vrot.slane %v1723_v18, %v5496_v56 }
 0x112   : > { %2383 = vrot.lane.b32.xlu0 %v4673_v6, %s4950_s16  ;;  %v6028_v42 = vrot.slane %v870_v50, %v5181_v38  ;;  %v1328_v15 = vshrl.u32 %v6022_v11, 16  ;;  %v4634_v50 = vcombine.low %v1581_v49, %v1581_v49 }
 0x113   : > { %v817_v60 = vpop.permute.xlu1 %816  ;;  %v6043_v20 = vrot.slane %v836_v52, %v5181_v38  ;;  %v1837_v18 = vshrl.u32 %v1737_v47, 16  ;;  %v1739_v9 = vcombine.high %v1737_v47, %v7573_v2 }
 0x114   : > { %v878_v30 = vcombine.low %v801_v48, %v817_v60  ;;  %v813_v32 = vpop.permute.xlu0 %812  ;;  %v1771_v48 = vrot.slane %v1757_v19, %v5496_v56  ;;  %v1805_v60 = vrot.slane %v1798_v36, %v5181_v38  ;;  %v1329_v19 = vpack.i.b16 %v1328_v15, %v1327_v14 }
 0x115   : > { %v844_v23 = vcombine.low %v797_v55, %v813_v32  ;;  %1862 = vrot.lane.b32.xlu1 %v4644_v13, %s4947_s9  ;;  %v1781_v13 = vrot.slane %v1774_v26, %v5181_v38  ;;  %v4667_v14 = vcombine.low %v5584_v57, %v5584_v57  ;;  %v1474_v26 = vcombine.high %v5960_v58, %v5946_v17 }
 0x116   : > { %v6031_v3 = vrot.slane %v878_v30, %v5181_v38  ;;  %1605 = vrot.lane.b32.xlu0 %v4633_v29, %s4946_s23  ;;  %v1836_v52 = vpack.i.b16 %v1771_v48, %v1737_v47  ;;  %v1838_v30 = vshrl.u32 %v1771_v48, 16  ;;  %v1814_v29 = vcombine.low %v1805_v60, %v1813_v37 }
 0x117   : > { %v6046_v63 = vrot.slane %v844_v23, %v5181_v38  ;;  %v6048_v28 = vpop.permute.xlu1 %1415  ;;  %v1790_v62 = vcombine.low %v1781_v13, %v1789_v10  ;;  %v1584_v15 = vpack.i.b16 %v1583_v61, %v1582_v51  ;;  %v1240_v57 = vcombine.high %v6012_v27, %v7573_v2 }
 0x118   : > { %v886_v55 = vcombine.low %v6028_v42, %v6031_v3  ;;  %v6054_v4 = vpop.permute.xlu0 %1411  ;;  %v4645_v49 = vcombine.low %v1836_v52, %v1836_v52  ;;  %v1839_v36 = vpack.i.b16 %v1838_v30, %v1837_v18  ;;  %v1821_v59 = vrot.slane %v1814_v29, %v5496_v56 }
 0x119   : > { %v852_v54 = vcombine.low %v6043_v20, %v6046_v63  ;;  %2138 = vrot.lane.b32.xlu1 %v4665_v34, %s4941_s18  ;;  %v1773_v34 = vcombine.high %v1771_v48, %v7573_v2  ;;  %v1508_v48 = vcombine.high %v5957_v46, %v5943_v21  ;;  %v1797_v22 = vrot.slane %v1790_v62, %v5496_v56 }
 0x11a   : > { %v6066_v6 = vrot.slane %v886_v55, %v5496_v56  ;;  %2130 = vrot.lane.b32.xlu0 %v4663_v44, %s4949_s13  ;;  %v4624_v55 = vcombine.low %v1329_v19, %v1329_v19  ;;  %v1274_v21 = vcombine.high %v6022_v11, %v7573_v2  ;;  %v6116_v46 = vrot.slane %v1474_v26, %v5496_v56 }
 0x11b   : > { %v6074_v41 = vrot.slane %v852_v54, %v5496_v56  ;;  %v6076_v31 = vpop.permute.xlu1 %1423  ;;  %v1844_v37 = vshrl.u32 %v1773_v34, 16  ;;  %v6113_v17 = vrot.slane %v1508_v48, %v5496_v56  ;;  %v4646_v10 = vcombine.low %v1839_v36, %v1839_v36 }
 0x11c   : > { %v6078_v7 = vpop.permute.xlu0 %1419  ;;  %v4635_v60 = vcombine.low %v1584_v15, %v1584_v15  ;;  %v1850_v19 = vshrl.u32 %v1821_v59, 16  ;;  %v1849_v18 = vshrl.u32 %v1797_v22, 16  ;;  %v1334_v36 = vshrl.u32 %v1274_v21, 16 }
 0x11d   : > { %1609 = vrot.lane.b32.xlu1 %v4634_v50, %s4945_s22  ;;  %v1848_v50 = vpack.i.b16 %v1821_v59, %v1797_v22  ;;  %v1587_v62 = vpack.i.b16 %v6113_v17, %v6116_v46  ;;  %v6131_v48 = vcombine.high %v6113_v17, %v7573_v2  ;;  %v7589_v22 = vld [vmem:[#allocation6_spill] sm:$0xff] }
 0x11e   : > { %2142 = vrot.lane.b32.xlu0 %v4666_v43, %s4951_s21  ;;  %v1843_v43 = vshrl.u32 %v1739_v9, 16 }
 0x11f   : > { %v6088_v23 = vpop.permute.xlu1 %1431  ;;  %v4649_v29 = vcombine.low %v1848_v50, %v1848_v50  ;;  %v4636_v15 = vcombine.low %v1587_v62, %v1587_v62  ;;  %v1589_v50 = vshrl.u32 %v6113_v17, 16 }
 0x120   : > { %v6091_v44 = vpop.permute.xlu0 %1427  ;;  %v1845_v13 = vpack.i.b16 %v1844_v37, %v1843_v43  ;;  %v1549_v26 = vcombine.low %v6048_v28, %v6088_v23  ;;  %v1851_v43 = vpack.i.b16 %v1850_v19, %v1849_v18  ;;  %v1842_v37 = vpack.i.b16 %v1773_v34, %v1739_v9  ;;  %v7591_v19 = vld [vmem:[#allocation7_spill] sm:$0xff] }
 0x121   : > { %2134 = vrot.lane.b32.xlu1 %v4664_v24, %s4950_s16  ;;  %v1332_v24 = vpack.i.b16 %v1274_v21, %v1240_v57  ;;  %v1525_v59 = vcombine.low %v6054_v4, %v6091_v44  ;;  %v955_v4 = vshrl.u32 %v6074_v41, 16  ;;  %v956_v44 = vshrl.u32 %v6066_v6, 16 }
 0x122   : > { %1866 = vrot.lane.b32.xlu0 %v4645_v49, %s4948_s10  ;;  %v1556_v34 = vrot.slane %v1549_v26, %v5181_v38  ;;  %v7592_v26 = vld [vmem:[#allocation11_spill] sm:$0xff] }
 0x123   : > { %v1440_v47 = vpop.permute.xlu1 %1439  ;;  %v1532_v9 = vrot.slane %v1525_v59, %v5181_v38  ;;  %v7593_v59 = vld [vmem:[#allocation8_spill] sm:$0xff] }
 0x124   : > { %v1436_v54 = vpop.permute.xlu0 %1435  ;;  %v1557_v49 = vcombine.low %v6076_v31, %v1440_v47  ;;  %v4625_v31 = vcombine.low %v1332_v24, %v1332_v24  ;;  %v1300_v47 = vcombine.low %v7589_v22, %v5518_v0  ;;  %v1588_v0 = vshrl.u32 %v6116_v46, 16  ;;  %v7590_v24 = vld [vmem:[#allocation10_spill] sm:$0xff]  ;;  %v7594_v22 = vld [vmem:[#allocation12_spill] sm:$0xff] }
 0x125   : > { %1356 = vrot.lane.b32.xlu1 %v4624_v55, %s4946_s23  ;;  %v1533_v51 = vcombine.low %v6078_v7, %v1436_v54  ;;  %v4648_v55 = vcombine.low %v1845_v13, %v1845_v13  ;;  %v6140_v7 = vcombine.high %v6116_v46, %v7573_v2  ;;  %v1276_v18 = vcombine.low %v7591_v19, %v7590_v24 }
 0x126   : > { %2146 = vrot.lane.b32.xlu0 %v4667_v14, %s4952_s20  ;;  %v1333_v14 = vshrl.u32 %v1240_v57, 16  ;;  %v1564_v57 = vrot.slane %v1557_v49, %v5181_v38  ;;  %v4650_v49 = vcombine.low %v1851_v43, %v1851_v43  ;;  %v4647_v46 = vcombine.low %v1842_v37, %v1842_v37 }
 0x127   : > { %v6118_v58 = vpop.permute.xlu1 %543  ;;  %v1540_v28 = vrot.slane %v1533_v51, %v5181_v38  ;;  %v1594_v13 = vshrl.u32 %v6140_v7, 16  ;;  %v1590_v37 = vpack.i.b16 %v1589_v50, %v1588_v0 }
 0x128   : > { %v6120_v52 = vpop.permute.xlu0 %539  ;;  %v1335_v21 = vpack.i.b16 %v1334_v36, %v1333_v14  ;;  %v1565_v51 = vcombine.low %v1556_v34, %v1564_v57  ;;  %v957_v36 = vpack.i.b16 %v956_v44, %v955_v4  ;;  %v6186_v4 = vcombine.high %v6066_v6, %v7573_v2 }
 0x129   : > { %1870 = vrot.lane.b32.xlu1 %v4646_v10, %s4949_s13  ;;  %v1595_v10 = vshrl.u32 %v6131_v48, 16  ;;  %v1541_v17 = vcombine.low %v1532_v9, %v1540_v28  ;;  %v1283_v9 = vrot.slane %v1276_v18, %v5181_v38 }
 0x12a   : > { %1613 = vrot.lane.b32.xlu0 %v4635_v60, %s4947_s9  ;;  %v4626_v24 = vcombine.low %v1335_v21, %v1335_v21  ;;  %v1572_v44 = vrot.slane %v1565_v51, %v5496_v56  ;;  %v4615_v50 = vcombine.low %v957_v36, %v957_v36 }
 0x12b   : > { %v552_v30 = vpop.permute.xlu1 %551  ;;  %v1548_v21 = vrot.slane %v1541_v17, %v5496_v56  ;;  %v4637_v17 = vcombine.low %v1590_v37, %v1590_v37  ;;  %v4830_v37 = vld [vmem:[%s5089_s17] sm:$0xf] }
 0x12c   : > { %v548_v61 = vpop.permute.xlu0 %547 }
 0x12d   : > { %1882 = vrot.lane.b32.xlu1 %v4649_v29, %s4951_s21 }
 0x12e   : > { %1878 = vrot.lane.b32.xlu0 %v4648_v55, %s4941_s18 }
 0x12f   : > { %v560_v54 = vpop.permute.xlu1 %559 }
 0x130   : > { %v556_v23 = vpop.permute.xlu0 %555  ;;  %v621_v60 = vcombine.low %v6118_v58, %v560_v54  ;;  %v1308_v58 = vcombine.low %v7593_v59, %v7592_v26  ;;  %v1593_v59 = vpack.i.b16 %v6131_v48, %v6140_v7  ;;  %v4833_v48 = vld [vmem:[%s5089_s17 + $0x78] sm:$0xf] }
 0x131   : > { %1617 = vrot.lane.b32.xlu1 %v4636_v15, %s4948_s10  ;;  %v587_v29 = vcombine.low %v6120_v52, %v556_v23  ;;  %v6182_v23 = vcombine.high %v6074_v41, %v7573_v2 }
 0x132   : > { %1360 = vrot.lane.b32.xlu0 %v4625_v31, %s4945_s22  ;;  %v7595_v31 = vld [vmem:[#allocation9_spill] sm:$0xff]  ;;  %v6166_v52 = vrot.slane %v621_v60, %v5181_v38  ;;  %v1315_v18 = vrot.slane %v1308_v58, %v5181_v38 }
 0x133   : > { %v568_v62 = vpop.permute.xlu1 %567  ;;  %v1284_v54 = vcombine.low %v7595_v31, %v7594_v22  ;;  %v6173_v57 = vrot.slane %v587_v29, %v5181_v38  ;;  %v1601_v31 = vshrl.u32 %v1572_v44, 16 }
 0x134   : > { %v629_v55 = vcombine.low %v552_v30, %v568_v62  ;;  %v564_v14 = vpop.permute.xlu0 %563  ;;  %v1596_v30 = vpack.i.b16 %v1595_v10, %v1594_v13 }
 0x135   : > { %v595_v15 = vcombine.low %v548_v61, %v564_v14  ;;  %1886 = vrot.lane.b32.xlu1 %v4650_v49, %s4952_s20  ;;  %v1291_v60 = vrot.slane %v1284_v54, %v5181_v38  ;;  %v960_v49 = vpack.i.b16 %v6186_v4, %v6182_v23  ;;  %v1600_v54 = vshrl.u32 %v1548_v21, 16 }
 0x136   : > { %v6169_v43 = vrot.slane %v629_v55, %v5181_v38  ;;  %1874 = vrot.lane.b32.xlu0 %v4647_v46, %s4950_s16  ;;  %v4639_v62 = vcombine.low %v1596_v30, %v1596_v30  ;;  %v1307_v46 = vrot.slane %v1300_v47, %v5181_v38  ;;  %v1599_v55 = vpack.i.b16 %v1572_v44, %v1548_v21  ;;  %v7596_v21 = vld [vmem:[#allocation16_spill] sm:$0xff] }
 0x137   : > { %v6176_v28 = vrot.slane %v595_v15, %v5181_v38  ;;  %v6178_v61 = vpop.permute.xlu1 %794  ;;  %v1292_v14 = vcombine.low %v1283_v9, %v1291_v60  ;;  %v4616_v47 = vcombine.low %v960_v49, %v960_v49  ;;  %v4834_v9 = vld [vmem:[%s5089_s17 + $0x14] sm:$0xf]  ;;  %v4835_v60 = vld [vmem:[%s5089_s17 + $0x64] sm:$0xf]  ;;  %v4836_v49 = vld [vmem:[%s5089_s17 + $0x3c] sm:$0xf]  ;;  %v1602_v36 = vpack.i.b16 %v1601_v31, %v1600_v54 }
 0x138   : > { %v637_v10 = vcombine.low %v6166_v52, %v6169_v43  ;;  %v6192_v0 = vpop.permute.xlu0 %790  ;;  %v1316_v30 = vcombine.low %v1307_v46, %v1315_v18  ;;  %v4638_v18 = vcombine.low %v1593_v59, %v1593_v59 }
 0x139   : > { %v603_v34 = vcombine.low %v6173_v57, %v6176_v28  ;;  %1364 = vrot.lane.b32.xlu1 %v4626_v24, %s4947_s9  ;;  %v4640_v24 = vcombine.low %v1599_v55, %v1599_v55  ;;  %v4627_v55 = vcombine.low %v7596_v21, %v7596_v21  ;;  %v4641_v54 = vcombine.low %v1602_v36, %v1602_v36 }
 0x13a   : > { %v6200_v13 = vrot.slane %v637_v10, %v5496_v56  ;;  %984 = vrot.lane.b32.xlu0 %v4615_v50, %s4946_s23  ;;  %v4831_v10 = vld [vmem:[%s5089_s17 + $0x50] sm:$0xf] }
 0x13b   : > { %v6204_v19 = vrot.slane %v603_v34, %v5496_v56  ;;  %v6206_v29 = vpop.permute.xlu1 %802  ;;  %v313_v50 = vcombine.low %v4830_v37, %v4831_v10  ;;  %v4832_v34 = vld [vmem:[%s5089_s17 + $0x28] sm:$0xf]  ;;  %v1299_v37 = vrot.slane %v1292_v14, %v5496_v56 }
 0x13c   : > { %v6212_v51 = vpop.permute.xlu0 %798  ;;  %v707_v22 = vshrl.u32 %v6200_v13, 16  ;;  %v321_v7 = vcombine.low %v4832_v34, %v4833_v48  ;;  %v961_v34 = vshrl.u32 %v6182_v23, 16  ;;  %v962_v48 = vshrl.u32 %v6186_v4, 16 }
 0x13d   : > { %1629 = vrot.lane.b32.xlu1 %v4639_v62, %s4941_s18  ;;  %v706_v58 = vshrl.u32 %v6204_v19, 16  ;;  %v347_v62 = vcombine.low %v4834_v9, %v4835_v60  ;;  %v1323_v9 = vrot.slane %v1316_v30, %v5496_v56  ;;  %v887_v23 = vcombine.high %v6028_v42, %v6031_v3 }
 0x13e   : > { %1621 = vrot.lane.b32.xlu0 %v4637_v17, %s4949_s13  ;;  %v4837_v17 = vld [vmem:[%s5089_s17 + $0x8c] sm:$0xf]  ;;  %v6249_v60 = vrot.slane %v321_v7, %v5181_v38  ;;  %v853_v4 = vcombine.high %v6043_v20, %v6046_v63  ;;  %v963_v30 = vpack.i.b16 %v962_v48, %v961_v34  ;;  %v7597_v7 = vld [vmem:[#allocation17_spill] sm:$0xff]  ;;  %v619_v21 = vcombine.high %v6204_v19, %v7573_v2 }
 0x13f   : > { %v6218_v26 = vpop.permute.xlu1 %810  ;;  %v355_v44 = vcombine.low %v4836_v49, %v4837_v17  ;;  %v6252_v59 = vrot.slane %v347_v62, %v5181_v38  ;;  %v4628_v62 = vcombine.low %v7597_v7, %v7597_v7  ;;  %v6275_v3 = vrot.slane %v887_v23, %v5496_v56  ;;  %v7598_v23 = vld [vmem:[#allocation18_spill] sm:$0xff] }
 0x140   : > { %v6224_v15 = vpop.permute.xlu0 %806  ;;  %v6278_v20 = vrot.slane %v853_v4, %v5496_v56  ;;  %v4617_v17 = vcombine.low %v963_v30, %v963_v30  ;;  %v4630_v4 = vcombine.low %v7598_v23, %v7598_v23 }
 0x141   : > { %988 = vrot.lane.b32.xlu1 %v4616_v47, %s4945_s22  ;;  %v708_v47 = vpack.i.b16 %v707_v22, %v706_v58  ;;  %v6255_v14 = vrot.slane %v355_v44, %v5181_v38 }
 0x142   : > { %1633 = vrot.lane.b32.xlu0 %v4640_v24, %s4951_s21  ;;  %v6246_v24 = vrot.slane %v313_v50, %v5181_v38  ;;  %v1350_v50 = vpack.i.b16 %v1323_v9, %v1299_v37 }
 0x143   : > { %v6238_v46 = vpop.permute.xlu1 %818  ;;  %v4606_v22 = vcombine.low %v708_v47, %v708_v47  ;;  %v363_v42 = vcombine.low %v6252_v59, %v6255_v14  ;;  %v1352_v47 = vshrl.u32 %v1323_v9, 16 }
 0x144   : > { %v815_v10 = vpop.permute.xlu0 %814  ;;  %v329_v49 = vcombine.low %v6246_v24, %v6249_v60  ;;  %v4631_v44 = vcombine.low %v1350_v50, %v1350_v50 }
 0x145   : > { %1625 = vrot.lane.b32.xlu1 %v4638_v18, %s4950_s16  ;;  %v1351_v18 = vshrl.u32 %v1299_v37, 16  ;;  %v6293_v48 = vrot.slane %v363_v42, %v5496_v56  ;;  %v936_v37 = vcombine.low %v6206_v29, %v6238_v46  ;;  %v912_v9 = vcombine.low %v6212_v51, %v815_v10 }
 0x146   : > { %1368 = vrot.lane.b32.xlu0 %v4627_v55, %s4948_s10  ;;  %v653_v55 = vcombine.high %v6200_v13, %v7573_v2  ;;  %v6290_v34 = vrot.slane %v329_v49, %v5496_v56  ;;  %v928_v42 = vcombine.low %v6178_v61, %v6218_v26  ;;  %v869_v29 = vcombine.high %v6278_v20, %v7573_v2 }
 0x147   : > { %v6262_v58 = vpop.permute.xlu1 %545  ;;  %v1353_v7 = vpack.i.b16 %v1352_v47, %v1351_v18  ;;  %v433_v49 = vshrl.u32 %v6293_v48, 16  ;;  %v903_v51 = vcombine.high %v6275_v3, %v7573_v2  ;;  %v943_v47 = vrot.slane %v936_v37, %v5181_v38 }
 0x148   : > { %v6264_v31 = vpop.permute.xlu0 %541  ;;  %v711_v50 = vpack.i.b16 %v653_v55, %v619_v21  ;;  %v713_v18 = vshrl.u32 %v653_v55, 16  ;;  %v919_v23 = vrot.slane %v912_v9, %v5181_v38  ;;  %v935_v32 = vrot.slane %v928_v42, %v5181_v38 }
 0x149   : > { %735 = vrot.lane.b32.xlu1 %v4606_v22, %s4946_s23  ;;  %v974_v55 = vshrl.u32 %v903_v51, 16  ;;  %v345_v9 = vcombine.high %v6290_v34, %v7573_v2  ;;  %v968_v42 = vshrl.u32 %v6275_v3, 16 }
 0x14a   : > { %1637 = vrot.lane.b32.xlu0 %v4641_v54, %s4952_s20  ;;  %v966_v54 = vpack.i.b16 %v6275_v3, %v6278_v20  ;;  %v4607_v26 = vcombine.low %v711_v50, %v711_v50  ;;  %v379_v50 = vcombine.high %v6293_v48, %v7573_v2 }
 0x14b   : > { %v6280_v63 = vpop.permute.xlu1 %553 }
 0x14c   : > { %v6282_v36 = vpop.permute.xlu0 %549  ;;  %v4618_v10 = vcombine.low %v966_v54, %v966_v54 }
 0x14d   : > { %1372 = vrot.lane.b32.xlu1 %v4628_v62, %s4949_s13  ;;  %v432_v62 = vshrl.u32 %v6290_v34, 16 }
 0x14e   : > { %992 = vrot.lane.b32.xlu0 %v4617_v17, %s4947_s9  ;;  %v904_v17 = vcombine.low %v6192_v0, %v6224_v15  ;;  %v4632_v0 = vcombine.low %v1353_v7, %v1353_v7  ;;  %v4629_v15 = vcombine.low %v5762_v39, %v5762_v39  ;;  %v944_v7 = vcombine.low %v935_v32, %v943_v47 }
 0x14f   : > { %v6298_v22 = vpop.permute.xlu1 %561 }
 0x150   : > { %v6305_v30 = vpop.permute.xlu0 %557  ;;  %v911_v1 = vrot.slane %v904_v17, %v5181_v38  ;;  %v951_v47 = vrot.slane %v944_v7, %v5496_v56  ;;  %v679_v7 = vcombine.low %v6262_v58, %v6298_v22 }
 0x151   : > { %1384 = vrot.lane.b32.xlu1 %v4631_v44, %s4951_s21  ;;  %v712_v44 = vshrl.u32 %v619_v21, 16  ;;  %v973_v21 = vshrl.u32 %v869_v29, 16 }
 0x152   : > { %1380 = vrot.lane.b32.xlu0 %v4630_v4, %s4941_s18  ;;  %v434_v4 = vpack.i.b16 %v433_v49, %v432_v62  ;;  %v920_v39 = vcombine.low %v911_v1, %v919_v23  ;;  %v967_v49 = vshrl.u32 %v6278_v20, 16 }
 0x153   : > { %v570_v46 = vpop.permute.xlu1 %569  ;;  %v714_v37 = vpack.i.b16 %v713_v18, %v712_v44  ;;  %v638_v44 = vcombine.high %v6166_v52, %v6169_v43  ;;  %v604_v18 = vcombine.high %v6173_v57, %v6176_v28 }
 0x154   : > { %v566_v61 = vpop.permute.xlu0 %565  ;;  %v4597_v17 = vcombine.low %v434_v4, %v434_v4  ;;  %v927_v20 = vrot.slane %v920_v39, %v5496_v56  ;;  %v969_v23 = vpack.i.b16 %v968_v42, %v967_v49  ;;  %v687_v57 = vcombine.low %v6280_v63, %v570_v46 }
 0x155   : > { %996 = vrot.lane.b32.xlu1 %v4618_v10, %s4948_s10  ;;  %v975_v10 = vpack.i.b16 %v974_v55, %v973_v21  ;;  %v4608_v1 = vcombine.low %v714_v37, %v714_v37  ;;  %v6352_v52 = vrot.slane %v638_v44, %v5496_v56  ;;  %v6355_v43 = vrot.slane %v604_v18, %v5496_v56 }
 0x156   : > { %739 = vrot.lane.b32.xlu0 %v4607_v26, %s4945_s22  ;;  %v437_v26 = vpack.i.b16 %v379_v50, %v345_v9  ;;  %v663_v28 = vcombine.low %v6282_v36, %v566_v61  ;;  %v4619_v21 = vcombine.low %v969_v23, %v969_v23  ;;  %v978_v55 = vpack.i.b16 %v951_v47, %v927_v20 }
 0x157   : > { %v6327_v54 = vpop.permute.xlu1 %2616  ;;  %v655_v39 = vcombine.low %v6264_v31, %v6305_v30  ;;  %v438_v49 = vshrl.u32 %v345_v9, 16  ;;  %v439_v42 = vshrl.u32 %v379_v50, 16  ;;  %v972_v63 = vpack.i.b16 %v903_v51, %v869_v29 }
 0x158   : > { %v6333_v62 = vpop.permute.xlu0 %2612  ;;  %v4598_v37 = vcombine.low %v437_v26, %v437_v26  ;;  %v330_v36 = vcombine.high %v6246_v24, %v6249_v60  ;;  %v364_v46 = vcombine.high %v6252_v59, %v6255_v14  ;;  %v694_v61 = vrot.slane %v687_v57, %v5181_v38 }
 0x159   : > { %1388 = vrot.lane.b32.xlu1 %v4632_v0, %s4952_s20  ;;  %v4621_v0 = vcombine.low %v975_v10, %v975_v10  ;;  %v670_v58 = vrot.slane %v663_v28, %v5181_v38  ;;  %v6379_v31 = vcombine.high %v6355_v43, %v7573_v2  ;;  %v6383_v30 = vcombine.high %v6352_v52, %v7573_v2 }
 0x15a   : > { %1376 = vrot.lane.b32.xlu0 %v4629_v15, %s4950_s16  ;;  %v980_v29 = vshrl.u32 %v951_v47, 16  ;;  %v979_v51 = vshrl.u32 %v927_v20, 16  ;;  %v4622_v60 = vcombine.low %v978_v55, %v978_v55  ;;  %v717_v59 = vpack.i.b16 %v6352_v52, %v6355_v43 }
 0x15b   : > { %v6343_v32 = vpop.permute.xlu1 %2620  ;;  %v686_v14 = vrot.slane %v679_v7, %v5181_v38  ;;  %v662_v9 = vrot.slane %v655_v39, %v5181_v38  ;;  %v440_v50 = vpack.i.b16 %v439_v42, %v438_v49  ;;  %v6394_v10 = vrot.slane %v330_v36, %v5496_v56  ;;  %v4839_v7 = vld [vmem:[%s5089_s17 + $0x54] sm:$0x3]  ;;  %v4840_v49 = vld [vmem:[%s5089_s17 + $0x2c] sm:$0x3]  ;;  %v4841_v42 = vld [vmem:[%s5089_s17 + $0x7c] sm:$0x3] }
 0x15c   : > { %v6347_v3 = vpop.permute.xlu0 %2363  ;;  %v6397_v44 = vrot.slane %v364_v46, %v5496_v56  ;;  %v724_v20 = vshrl.u32 %v6379_v31, 16  ;;  %v725_v23 = vshrl.u32 %v6383_v30, 16  ;;  %v981_v57 = vpack.i.b16 %v980_v29, %v979_v51  ;;  %v4842_v36 = vld [vmem:[%s5089_s17 + $0x18] sm:$0x3]  ;;  %v4843_v46 = vld [vmem:[%s5089_s17 + $0x68] sm:$0x3] }
 0x15d   : > { %743 = vrot.lane.b32.xlu1 %v4608_v1, %s4947_s9  ;;  %v695_v18 = vcombine.low %v686_v14, %v694_v61  ;;  %v671_v1 = vcombine.low %v662_v9, %v670_v58  ;;  %v718_v28 = vshrl.u32 %v6355_v43, 16  ;;  %v4599_v55 = vcombine.low %v440_v50, %v440_v50  ;;  %v4844_v58 = vld [vmem:[%s5089_s17 + $0x40] sm:$0x3]  ;;  %v4845_v29 = vld [vmem:[%s5089_s17 + $0x90] sm:$0x3] }
 0x15e   : > { %461 = vrot.lane.b32.xlu0 %v4597_v17, %s4946_s23  ;;  %v4620_v17 = vcombine.low %v972_v63, %v972_v63  ;;  %v389_v63 = vcombine.low %v4840_v49, %v4841_v42  ;;  %v405_v61 = vcombine.low %v4842_v36, %v4843_v46  ;;  %v413_v51 = vcombine.low %v4844_v58, %v4845_v29  ;;  %s4958_s23 = smov 38  }
 0x15f   : > { %v6359_v15 = vpop.permute.xlu1 %2624  ;;  %v702_v43 = vrot.slane %v695_v18, %v5496_v56  ;;  %v4623_v9 = vcombine.low %v981_v57, %v981_v57  ;;  %v444_v46 = vshrl.u32 %v6394_v10, 16 }
 0x160   : > { %v6361_v4 = vpop.permute.xlu0 %2367 }
 0x161   : > { %1008 = vrot.lane.b32.xlu1 %v4621_v0, %s4941_s18  ;;  %v4609_v0 = vcombine.low %v717_v59, %v717_v59  ;;  %v726_v59 = vpack.i.b16 %v725_v23, %v724_v20  ;;  %v412_v20 = vrot.slane %v405_v61, %v5181_v38  ;;  %v420_v23 = vrot.slane %v413_v51, %v5181_v38  ;;  %v7599_v61 = vld [vmem:[#allocation13_spill] sm:$0xff] }
 0x162   : > { %1000 = vrot.lane.b32.xlu0 %v4619_v21, %s4949_s13  ;;  %v719_v21 = vshrl.u32 %v6352_v52, 16  ;;  %v678_v52 = vrot.slane %v671_v1, %v5496_v56  ;;  %v396_v1 = vrot.slane %v389_v63, %v5181_v38  ;;  %v731_v57 = vshrl.u32 %v702_v43, 16 }
 0x163   : > { %v6375_v22 = vpop.permute.xlu1 %2371  ;;  %v2648_v29 = vsel %vm495_vm6, %v7599_v61, %v6333_v62 }
 0x164   : > { %v6385_v24 = vpop.permute.xlu0 %2114  ;;  %v720_v50 = vpack.i.b16 %v719_v21, %v718_v28  ;;  %v730_v28 = vshrl.u32 %v678_v52, 16  ;;  %v729_v42 = vpack.i.b16 %v702_v43, %v678_v52 }
 0x165   : > { %465 = vrot.lane.b32.xlu1 %v4598_v37, %s4945_s22  ;;  %v4838_v37 = vld [vmem:[%s5089_s17 + $0x4] sm:$0x3]  ;;  %s4956_s17 = smov 74   ;;  %s4957_s22 = smov 92  }
 0x166   : > { %1012 = vrot.lane.b32.xlu0 %v4622_v60, %s4951_s21  ;;  %v381_v39 = vcombine.low %v4838_v37, %v4839_v7  ;;  %v380_v37 = vcombine.high %v6397_v44, %v7573_v2  ;;  %v4610_v49 = vcombine.low %v720_v50, %v720_v50  ;;  %v732_v52 = vpack.i.b16 %v731_v57, %v730_v28 }
 0x167   : > { %v6399_v47 = vpop.permute.xlu1 %2118  ;;  %v2650_v50 = vsel %vm499_vm7, %v2648_v29, %v6327_v54 }
 0x168   : > { %v6403_v26 = vpop.permute.xlu0 %2628  ;;  %v388_v18 = vrot.slane %v381_v39, %v5181_v38  ;;  %v445_v39 = vshrl.u32 %v6397_v44, 16  ;;  %v451_v58 = vshrl.u32 %v380_v37, 16  ;;  %v4614_v54 = vcombine.low %v732_v52, %v732_v52 }
 0x169   : > { %1004 = vrot.lane.b32.xlu1 %v4620_v17, %s4950_s16  ;;  %v443_v17 = vpack.i.b16 %v6397_v44, %v6394_v10  ;;  %v723_v44 = vpack.i.b16 %v6383_v30, %v6379_v31 }
 0x16a   : > { %747 = vrot.lane.b32.xlu0 %v4609_v0, %s4948_s10  ;;  %v346_v0 = vcombine.high %v6394_v10, %v7573_v2  ;;  %v397_v51 = vcombine.low %v388_v18, %v396_v1  ;;  %v4613_v10 = vcombine.low %v729_v42, %v729_v42  ;;  %v446_v62 = vpack.i.b16 %v445_v39, %v444_v46 }
 0x16b   : > { %v2633_v60 = vpop.permute.xlu1 %2632  ;;  %v4600_v36 = vcombine.low %v443_v17, %v443_v17  ;;  %v2652_v18 = vsel %vm502_vm8, %v2650_v50, %v6343_v32  ;;  %v4611_v32 = vcombine.low %v723_v44, %v723_v44 }
 0x16c   : > { %v6419_v14 = vpop.permute.xlu0 %2375  ;;  %v450_v63 = vshrl.u32 %v346_v0, 16  ;;  %v404_v1 = vrot.slane %v397_v51, %v5496_v56  ;;  %v2654_v31 = vsel %vm505_vm9, %v2652_v18, %v6359_v15  ;;  %v449_v42 = vpack.i.b16 %v380_v37, %v346_v0 }
 0x16d   : > { %469 = vrot.lane.b32.xlu1 %v4599_v55, %s4947_s9  ;;  %v4612_v55 = vcombine.low %v726_v59, %v726_v59  ;;  %v421_v59 = vcombine.low %v412_v20, %v420_v23  ;;  %v2656_v23 = vsel %vm508_vm10, %v2654_v31, %v6403_v26  ;;  %v7600_v31 = vld [vmem:[#allocation14_spill] sm:$0xff]  ;;  %s4959_s9 = smov 56  }
 0x16e   : > { %1016 = vrot.lane.b32.xlu0 %v4623_v9, %s4952_s20  ;;  %v452_v17 = vpack.i.b16 %v451_v58, %v450_v63  ;;  %v2658_v28 = vsel %vm511_vm11, %v2656_v23, %v2633_v60  ;;  %v456_v46 = vshrl.u32 %v404_v1, 16  ;;  %v4602_v0 = vcombine.low %v449_v42, %v449_v42 }
 0x16f   : > { %v2641_v21 = vpop.permute.xlu1 %2640  ;;  %v428_v20 = vrot.slane %v421_v59, %v5496_v56 }
 0x170   : > { %v2637_v7 = vpop.permute.xlu0 %2636 }
 0x171   : > { %759 = vrot.lane.b32.xlu1 %v4612_v55, %s4941_s18  ;;  %v4601_v55 = vcombine.low %v446_v62, %v446_v62  ;;  %v2660_v15 = vsel %vm514_vm13, %v2658_v28, %v2637_v7  ;;  %v457_v39 = vshrl.u32 %v428_v20, 16  ;;  %v2662_v26 = vsel %vm517_vm12, %v2637_v7, %v2641_v21  ;;  %v2755_v7 = vld [vmem:[%s7523_s2] sm:$0xff] }
 0x172   : > { %751 = vrot.lane.b32.xlu0 %v4610_v49, %s4949_s13  ;;  %v4603_v49 = vcombine.low %v452_v17, %v452_v17  ;;  %v2710_v60 = vsel %vm2681_vm15, %v2660_v15, 0  ;;  %v2763_v62 = vld [vmem:[%s7524_s3] sm:$0xff] }
 0x173   : > { %v6440_v43 = vpop.permute.xlu1 %2122  ;;  %v458_v51 = vpack.i.b16 %v457_v39, %v456_v46 }
 0x174   : > { %v6442_v9 = vpop.permute.xlu0 %1854 }
 0x175   : > { %473 = vrot.lane.b32.xlu1 %v4600_v36, %s4948_s10  ;;  %v455_v36 = vpack.i.b16 %v428_v20, %v404_v1  ;;  %v4605_v21 = vcombine.low %v458_v51, %v458_v51  ;;  %v2084_v1 = vpack.i.b16 %v5782_v35, %v5788_v25  ;;  %s4961_s10 = smov 20  }
 0x176   : > { %763 = vrot.lane.b32.xlu0 %v4613_v10, %s4951_s21 }
 0x177   : > { %v6456_v30 = vpop.permute.xlu1 %2387  ;;  %v4604_v37 = vcombine.low %v455_v36, %v455_v36  ;;  %v2150_v42 = vsel %vm495_vm6, %v2084_v1, %v6385_v24 }
 0x178   : > { %v2380_v57 = vpop.permute.xlu0 %2379  ;;  %v2152_v35 = vsel %vm499_vm7, %v2150_v42, %v6399_v47 }
 0x179   : > { %767 = vrot.lane.b32.xlu1 %v4614_v54, %s4952_s20  ;;  %v7601_v54 = vld [vmem:[#allocation15_spill] sm:$0xff] }
 0x17a   : > { %755 = vrot.lane.b32.xlu0 %v4611_v32, %s4950_s16  ;;  %v7602_v23 = vpack.i.b16 %v7600_v31, %v7601_v54 }
 0x17b   : > { %v2645_v63 = vpop.permute.xlu1 %2644 }
 0x17c   : > { %v2392_v58 = vpop.permute.xlu0 %2391  ;;  %v2664_v29 = vsel %vm520_vm14, %v2662_v26, %v2645_v63  ;;  %v2399_v32 = vsel %vm495_vm6, %v7602_v23, %v6347_v3  ;;  %v2154_v3 = vsel %vm502_vm8, %v2152_v35, %v6440_v43 }
 0x17d   : > { %4686 = vmatprep.subr.msk.bf16.mxu0 %vm2681_vm15, %v2664_v29  ;;  %485 = vrot.lane.b32.xlu1 %v4603_v49, %s4941_s18  ;;  %v2401_v28 = vsel %vm499_vm7, %v2399_v32, %v6361_v4  ;;  %v2413_v24 = vsel %vm517_vm12, %v6456_v30, %v2392_v58 }
 0x17e   : > { %477 = vrot.lane.b32.xlu0 %v4601_v55, %s4949_s13  ;;  %2721 = vmatpush1.bf16.msra.mxu0 %v2710_v60  ;;  %v2403_v49 = vsel %vm502_vm8, %v2401_v28, %v6375_v22  ;;  %s4954_s13 = smov 110  }
 0x17f   : > { %v2127_v59 = vpop.permute.xlu1 %2126  ;;  %v2405_v25 = vsel %vm505_vm9, %v2403_v49, %v6419_v14 }
 0x180   : > { %v1859_v52 = vpop.permute.xlu0 %1858  ;;  %v2407_v36 = vsel %vm508_vm10, %v2405_v25, %v2380_v57  ;;  %v2156_v4 = vsel %vm505_vm9, %v2154_v3, %v2127_v59  ;;  %v7604_v3 = vpack.i.b16 %v5980_v53, %v5983_v12 }
 0x181   : > { %481 = vrot.lane.b32.xlu1 %v4602_v0, %s4950_s16  ;;  %s4955_s16 = smov 2  }
 0x182   : > { %489 = vrot.lane.b32.xlu0 %v4604_v37, %s4951_s21 }
 0x183   : > { %v2396_v10 = vpop.permute.xlu1 %2395 }
 0x184   : > { %v2384_v44 = vpop.permute.xlu0 %2383  ;;  %v2415_v47 = vsel %vm520_vm14, %v2413_v24, %v2396_v10 }
 0x185   : > { %2758 = vperm.xlu1 %4820, %v2755_v7   ;;  %v2409_v46 = vsel %vm511_vm11, %v2407_v36, %v2384_v44  ;;  %v2680_v57 = vrot.slane %v2415_v47, 4 }
 0x186   : > { %493 = vrot.lane.b32.xlu0 %v4605_v21, %s4952_s20  ;;  %v2411_v43 = vsel %vm514_vm13, %v2409_v46, %v6456_v30  ;;  %s4960_s20 = smov 112  }
 0x187   : > { %v1863_v50 = vpop.permute.xlu1 %1862  ;;  %v2679_v37 = vrot.slane %v2411_v43, 4 }
 0x188   : > { %v1606_v17 = vpop.permute.xlu0 %1605 }
 0x189   : > { %v1641_v36 = vsel %vm495_vm6, %v7604_v3, %v1606_v17 }
 0x18a   : > { %2766 = vperm.xlu0 %4821, %v2763_v62  }
 0x18b   : > { %v2139_v18 = vpop.permute.xlu1 %2138 }
 0x18c   : > { %v2131_v20 = vpop.permute.xlu0 %2130 }
 0x18d   : > { %v2158_v39 = vsel %vm508_vm10, %v2156_v4, %v2131_v20 }
 0x18f   : > { %v1610_v55 = vpop.permute.xlu1 %1609 }
 0x190   : > { %v2143_v15 = vpop.permute.xlu0 %2142 }
 0x191   : > { %v2164_v29 = vsel %vm517_vm12, %v2139_v18, %v2143_v15 }
 0x193   : > { %v2135_v22 = vpop.permute.xlu1 %2134 }
 0x194   : > { %v1867_v63 = vpop.permute.xlu0 %1866  ;;  %v2160_v14 = vsel %vm511_vm11, %v2158_v39, %v2135_v22 }
 0x195   : > { %v2162_v0 = vsel %vm514_vm13, %v2160_v14, %v2139_v18  ;;  %v7603_v18 = vpack.i.b16 %v5721_v5, %v5724_v33  ;;  %v1643_v33 = vsel %vm499_vm7, %v1641_v36, %v1610_v55 }
 0x196   : > { %v2701_v59 = vsel %vm2681_vm15, %v2162_v0, %v2679_v37 }
 0x197   : > { %v6508_v26 = vpop.permute.xlu1 %1356  ;;  %v1890_v23 = vsel %vm495_vm6, %v7603_v18, %v6442_v9 }
 0x198   : > { %v2147_v60 = vpop.permute.xlu0 %2146  ;;  %v1892_v32 = vsel %vm499_vm7, %v1890_v23, %v1859_v52 }
 0x199   : > { %v2166_v58 = vsel %vm520_vm14, %v2164_v29, %v2147_v60  ;;  %v1894_v28 = vsel %vm502_vm8, %v1892_v32, %v1863_v50 }
 0x19a   : > { %v2704_v51 = vsel %vm2681_vm15, %v2166_v58, %v2680_v57  ;;  %v1896_v42 = vsel %vm505_vm9, %v1894_v28, %v1867_v63 }
 0x19b   : > { %2722 = vmatprep.subr.bf16.mxu0 %v2704_v51  ;;  %v1871_v21 = vpop.permute.xlu1 %1870 }
 0x19c   : > { %2723 = vmatpush1.bf16.msra.mxu0 %v2701_v59  ;;  %v1614_v7 = vpop.permute.xlu0 %1613  ;;  %v1898_v35 = vsel %vm508_vm10, %v1896_v42, %v1871_v21  ;;  %v7605_v42 = vpack.i.b16 %v6066_v6, %v6074_v41 }
 0x19d   : > { %v1645_v52 = vsel %vm502_vm8, %v1643_v33, %v1614_v7 }
 0x19f   : > { %v1883_v30 = vpop.permute.xlu1 %1882 }
 0x1a0   : > { %v1879_v10 = vpop.permute.xlu0 %1878 }
 0x1a1   : > { %v1904_v24 = vsel %vm517_vm12, %v1879_v10, %v1883_v30 }
 0x1a3   : > { %v1618_v44 = vpop.permute.xlu1 %1617 }
 0x1a4   : > { %v1361_v62 = vpop.permute.xlu0 %1360  ;;  %v1647_v4 = vsel %vm505_vm9, %v1645_v52, %v1618_v44 }
 0x1a7   : > { %v1887_v1 = vpop.permute.xlu1 %1886 }
 0x1a8   : > { %v1875_v20 = vpop.permute.xlu0 %1874  ;;  %v1906_v17 = vsel %vm520_vm14, %v1904_v24, %v1887_v1  ;;  %v1326_v1 = vpack.i.b16 %v6022_v11, %v6012_v27 }
 0x1a9   : > { %v1900_v25 = vsel %vm511_vm11, %v1898_v35, %v1875_v20  ;;  %v2676_v14 = vrot.slane %v1906_v17, 4 }
 0x1aa   : > { %v1902_v50 = vsel %vm514_vm13, %v1900_v25, %v1879_v10  ;;  %v1392_v23 = vsel %vm495_vm6, %v1326_v1, %v6508_v26 }
 0x1ab   : > { %v1365_v31 = vpop.permute.xlu1 %1364  ;;  %v2675_v39 = vrot.slane %v1902_v50, 4  ;;  %v1394_v32 = vsel %vm499_vm7, %v1392_v23, %v1361_v62 }
 0x1ac   : > { %v985_v54 = vpop.permute.xlu0 %984 }
 0x1af   : > { %v1630_v49 = vpop.permute.xlu1 %1629 }
 0x1b0   : > { %v1622_v15 = vpop.permute.xlu0 %1621 }
 0x1b1   : > { %v1649_v46 = vsel %vm508_vm10, %v1647_v4, %v1622_v15  ;;  %v1020_v15 = vsel %vm495_vm6, %v7605_v42, %v985_v54 }
 0x1b3   : > { %v989_v5 = vpop.permute.xlu1 %988 }
 0x1b4   : > { %v1634_v9 = vpop.permute.xlu0 %1633  ;;  %v1022_v25 = vsel %vm499_vm7, %v1020_v15, %v989_v5 }
 0x1b5   : > { %v1655_v43 = vsel %vm517_vm12, %v1630_v49, %v1634_v9 }
 0x1b7   : > { %v1626_v22 = vpop.permute.xlu1 %1625 }
 0x1b8   : > { %v1651_v53 = vsel %vm511_vm11, %v1649_v46, %v1626_v22  ;;  %v1369_v12 = vpop.permute.xlu0 %1368 }
 0x1b9   : > { %v1653_v55 = vsel %vm514_vm13, %v1651_v53, %v1630_v49  ;;  %v1396_v49 = vsel %vm502_vm8, %v1394_v32, %v1365_v31 }
 0x1ba   : > { %v2695_v63 = vsel %vm2681_vm15, %v1653_v55, %v2675_v39  ;;  %v1398_v27 = vsel %vm505_vm9, %v1396_v49, %v1369_v12 }
 0x1bb   : > { %v736_v47 = vpop.permute.xlu1 %735 }
 0x1bc   : > { %v1638_v57 = vpop.permute.xlu0 %1637 }
 0x1bd   : > { %v1657_v29 = vsel %vm520_vm14, %v1655_v43, %v1638_v57  ;;  %v431_v43 = vpack.i.b16 %v6293_v48, %v6290_v34 }
 0x1be   : > { %v2698_v60 = vsel %vm2681_vm15, %v1657_v29, %v2676_v14  ;;  %v7606_v29 = vpack.i.b16 %v6200_v13, %v6204_v19 }
 0x1bf   : > { %2724 = vmatprep.subr.bf16.mxu0 %v2698_v60  ;;  %v1373_v0 = vpop.permute.xlu1 %1372 }
 0x1c0   : > { %2725 = vmatpush1.bf16.msra.mxu0 %v2695_v63  ;;  %v993_v37 = vpop.permute.xlu0 %992  ;;  %v1400_v11 = vsel %vm508_vm10, %v1398_v27, %v1373_v0  ;;  %v771_v60 = vsel %vm495_vm6, %v7606_v29, %v736_v47  ;;  %v2706_v27 = vld [vmem:[%s7522_s1] sm:$0xf] }
 0x1c1   : > { %v1024_v3 = vsel %vm502_vm8, %v1022_v25, %v993_v37 }
 0x1c3   : > { %v1385_v58 = vpop.permute.xlu1 %1384 }
 0x1c4   : > { %v1381_v51 = vpop.permute.xlu0 %1380 }
 0x1c5   : > { %v1406_v31 = vsel %vm517_vm12, %v1381_v51, %v1385_v58 }
 0x1c7   : > { %v997_v59 = vpop.permute.xlu1 %996 }
 0x1c8   : > { %v740_v21 = vpop.permute.xlu0 %739  ;;  %v1026_v26 = vsel %vm505_vm9, %v1024_v3, %v997_v59 }
 0x1c9   : > { %v773_v0 = vsel %vm499_vm7, %v771_v60, %v740_v21 }
 0x1cb   : > { %v1389_v7 = vpop.permute.xlu1 %1388 }
 0x1cc   : > { %v1377_v30 = vpop.permute.xlu0 %1376  ;;  %v1408_v54 = vsel %vm520_vm14, %v1406_v31, %v1389_v7 }
 0x1cd   : > { %v1402_v62 = vsel %vm511_vm11, %v1400_v11, %v1377_v30  ;;  %v2672_v52 = vrot.slane %v1408_v54, 4  ;;  %v7550_v54 = vmov 0.0  }
 0x1ce   : > { %v1404_v33 = vsel %vm514_vm13, %v1402_v62, %v1381_v51  ;;  %4705 = vmatprep.subr.bf16.mxu1 %v7550_v54 }
 0x1cf   : > { %v744_v10 = vpop.permute.xlu1 %743  ;;  %v2671_v22 = vrot.slane %v1404_v33, 4 }
 0x1d0   : > { %v462_v44 = vpop.permute.xlu0 %461  ;;  %v775_v58 = vsel %vm502_vm8, %v773_v0, %v744_v10 }
 0x1d1   : > { %v498_v51 = vsel %vm495_vm6, %v431_v43, %v462_v44 }
 0x1d3   : > { %v1009_v20 = vpop.permute.xlu1 %1008 }
 0x1d4   : > { %v1001_v18 = vpop.permute.xlu0 %1000 }
 0x1d5   : > { %v1028_v6 = vsel %vm508_vm10, %v1026_v26, %v1001_v18 }
 0x1d7   : > { %v466_v28 = vpop.permute.xlu1 %465 }
 0x1d8   : > { %v1013_v35 = vpop.permute.xlu0 %1012  ;;  %v501_v7 = vsel %vm499_vm7, %v498_v51, %v466_v28 }
 0x1d9   : > { %v1034_v50 = vsel %vm517_vm12, %v1009_v20, %v1013_v35 }
 0x1db   : > { %v1005_v36 = vpop.permute.xlu1 %1004 }
 0x1dc   : > { %v748_v41 = vpop.permute.xlu0 %747  ;;  %v1030_v5 = vsel %vm511_vm11, %v1028_v6, %v1005_v36 }
 0x1dd   : > { %v1032_v46 = vsel %vm514_vm13, %v1030_v5, %v1009_v20  ;;  %v777_v30 = vsel %vm505_vm9, %v775_v58, %v748_v41 }
 0x1de   : > { %v2689_v53 = vsel %vm2681_vm15, %v1032_v46, %v2671_v22 }
 0x1df   : > { %v470_v9 = vpop.permute.xlu1 %469 }
 0x1e0   : > { %v1017_v4 = vpop.permute.xlu0 %1016  ;;  %v504_v34 = vsel %vm502_vm8, %v501_v7, %v470_v9 }
 0x1e1   : > { %v1036_v24 = vsel %vm520_vm14, %v1034_v50, %v1017_v4 }
 0x1e2   : > { %v2692_v39 = vsel %vm2681_vm15, %v1036_v24, %v2672_v52 }
 0x1e3   : > { %2726 = vmatprep.subr.bf16.mxu0 %v2692_v39  ;;  %v760_v12 = vpop.permute.xlu1 %759 }
 0x1e4   : > { %v752_v17 = vpop.permute.xlu0 %751  ;;  %2727 = vmatpush1.bf16.msra.mxu0 %v2689_v53 }
 0x1e5   : > { %v779_v48 = vsel %vm508_vm10, %v777_v30, %v752_v17 }
 0x1e7   : > { %v474_v55 = vpop.permute.xlu1 %473 }
 0x1e8   : > { %v764_v63 = vpop.permute.xlu0 %763  ;;  %v507_v13 = vsel %vm505_vm9, %v504_v34, %v474_v55 }
 0x1e9   : > { %v785_v21 = vsel %vm517_vm12, %v760_v12, %v764_v63  ;;  %v7608_v63 = vlaneseq }
 0x1eb   : > { %v768_v14 = vpop.permute.xlu1 %767 }
 0x1ec   : > { %v756_v57 = vpop.permute.xlu0 %755  ;;  %v787_v44 = vsel %vm520_vm14, %v785_v21, %v768_v14  ;;  %v3016_v14 = vand.u32 127, %v7608_v63 }
 0x1ed   : > { %v781_v19 = vsel %vm511_vm11, %v779_v48, %v756_v57  ;;  %v2668_v23 = vrot.slane %v787_v44, 4  ;;  %v7609_v57 = vld [vmem:[#allocation5_spill] sm:$0xff] }
 0x1ee   : > { %v783_v18 = vsel %vm514_vm13, %v781_v19, %v760_v12  ;;  %v3011_v29 = vadd.s32 8, %v7609_v57  ;;  %v6608_v7 = vadd.s32 4294967295, %v3016_v14 }
 0x1ef   : > { %v486_v37 = vpop.permute.xlu1 %485  ;;  %v2667_v42 = vrot.slane %v783_v18, 4 }
 0x1f0   : > { %v478_v59 = vpop.permute.xlu0 %477  ;;  %vm3024_vm3 = vcmp.ge.s32.totalorder %v6608_v7, 0  ;;  %vm3027_vm4 = vcmp.lt.s32.totalorder %v6608_v7, 16 }
 0x1f1   : > { %v510_v10 = vsel %vm508_vm10, %v507_v13, %v478_v59 }
 0x1f3   : > { %v482_v47 = vpop.permute.xlu1 %481 }
 0x1f4   : > { %v490_v1 = vpop.permute.xlu0 %489  ;;  %v513_v20 = vsel %vm511_vm11, %v510_v10, %v482_v47 }
 0x1f5   : > { %v519_v32 = vsel %vm517_vm12, %v486_v37, %v490_v1  ;;  %v516_v49 = vsel %vm514_vm13, %v513_v20, %v486_v37 }
 0x1f6   : > { %v2683_v25 = vsel %vm2681_vm15, %v516_v49, %v2667_v42 }
 0x1f8   : > { %v494_v28 = vpop.permute.xlu0 %493 }
 0x1f9   : > { %v522_v15 = vsel %vm520_vm14, %v519_v32, %v494_v28 }
 0x1fa   : > { %v2686_v35 = vsel %vm2681_vm15, %v522_v15, %v2668_v23 }
 0x1fb   : > { %2728 = vmatprep.subr.bf16.mxu0 %v2686_v35 }
 0x1fc   : > { %2729 = vmatpush1.bf16.msra.mxu0 %v2683_v25 }
 0x1ff   : > { %4687 = vmatmul.mubr.msk.bf16.vlgmr.msra.gmra.mxu0 %vm505_vm9, %v2706_v27 }
 0x200   : > { %v2759_v11 = vpop.permute.xlu1 %2758 }
 0x205   : > { %v2767_v26 = vpop.permute.xlu0 %2766 }
 0x2bf   : > { %v2748_v3 = vpop.f32.mrf.mxu0 }
 0x2c0   : > { %v2761_v62 = vmul.f32 %v2759_v11, %v2748_v3 }
 0x2c1   : > { %v2750_v36 = vpop.f32.mrf.mxu0 }
 0x2c2   : > { %v2769_v31 = vadd.f32 %v2767_v26, %v2761_v62  ;;  %v2762_v33 = vmul.f32 %v2759_v11, %v2750_v36 }
 0x2c3   : > { %v2752_v6 = vpop.f32.mrf.mxu0 }
 0x2c4   : > { %v2771_v41 = vmax.f32 %v2769_v31, 0.0  ;;  %v2770_v9 = vadd.f32 %v2767_v26, %v2762_v33 }
 0x2c5   : > { %v2753_v5 = vpop.f32.mrf.mxu0 }
 0x2c6   : > { %2774 = vrot.lane.b32.xlu0 %v2771_v41, %s4954_s13  ;;  %2793 = vrot.lane.b32.xlu1 %v2771_v41, %s4955_s16  ;;  %v2772_v52 = vmax.f32 %v2770_v9, 0.0  ;;  %s4962_s13 = smov 94  }
 0x2ca   : > { %2780 = vrot.lane.b32.xlu0 %v2771_v41, %s4956_s17  ;;  %2777 = vrot.lane.b32.xlu1 %v2771_v41, %s4957_s22  ;;  %s7607_s17 = sshll.u32 %s4922_s27, 3 }
 0x2cb   : > { %s4688_s22 = sadd.s32 4294967295, %s7607_s17 }
 0x2cc   : > { %v3012_v55 = vstv %s4688_s22 }
 0x2cd   : > { %v3013_v59 = vadd.s32 %v3012_v55, %v7609_v57  ;;  %v3014_v30 = vadd.s32 %v3012_v55, %v3011_v29 }
 0x2ce   : > { %2786 = vrot.lane.b32.xlu0 %v2771_v41, %s4958_s23  ;;  %2783 = vrot.lane.b32.xlu1 %v2771_v41, %s4959_s9  ;;  %s4964_s23 = smov 64   ;;  %s4965_s9 = smov 32  }
 0x2cf   : > { %vm3018_vm1 = vcmp.ge.s32.totalorder %v3013_v59, 0  ;;  %vm3020_vm2 = vcmp.lt.s32.totalorder %v3013_v59, 32  ;;  %vm3019_vm5 = vcmp.ge.s32.totalorder %v3014_v30, 0  ;;  %vm3021_vm6 = vcmp.lt.s32.totalorder %v3014_v30, 32 }
 0x2d0   : > { %vm3022_vm7 = vmand %vm3018_vm1, %vm3020_vm2  ;;  %vm3170_vm1 = vcmask 392192   ;;  %vm3173_vm2 = vcmask 523264  }
 0x2d1   : > { %vm3025_vm8 = vmand %vm3022_vm7, %vm3024_vm3 }
 0x2d2   : > { %2800 = vrot.lane.b32.xlu0 %v2772_v52, %s4960_s20  ;;  %2789 = vrot.lane.b32.xlu1 %v2771_v41, %s4961_s10  ;;  %vm3023_vm10 = vmand %vm3019_vm5, %vm3021_vm6  ;;  %s4966_s10 = smov 80   ;;  %vm3182_vm5 = vcmask 916480   ;;  %vm4968_vm6 = vmmov 0  }
 0x2d3   : > { %vm6637_vm11 = vmand %vm3025_vm8, %vm3027_vm4 }
 0x2d4   : > { %vm3026_vm13 = vmand %vm3023_vm10, %vm3024_vm3  ;;  %vm3176_vm3 = vcmask 654336  }
 0x2d5   : > { %vm6663_vm14 = vmand %vm3026_vm13, %vm3027_vm4  ;;  %vm3179_vm4 = vcmask 785408  }
 0x2d6   : > { %2795 = vrot.lane.b32.xlu1 %v2772_v52, %s4955_s16  ;;  %s7614_s16 = smov 127  }
 0x2da   : > { %2803 = vrot.lane.b32.xlu1 %v2772_v52, %s4962_s13  ;;  %s4967_s13 = smov 96  }
 0x338   : > { %v2775_v50 = vpop.permute.xlu0 %2774  ;;  %v2794_v4 = vpop.permute.xlu1 %2793 }
 0x33c   : > { %v2781_v46 = vpop.permute.xlu0 %2780  ;;  %v2778_v22 = vpop.permute.xlu1 %2777 }
 0x33d   : > { %v2822_v24 = vcombine.low %v2775_v50, %v2781_v46  ;;  %v2823_v39 = vcombine.high %v2775_v50, %v2781_v46  ;;  %v2806_v53 = vcombine.low %v2771_v41, %v2778_v22  ;;  %v2807_v12 = vcombine.high %v2771_v41, %v2778_v22 }
 0x33f   : > { %v2830_v60 = vrot.slane %v2822_v24, %v5181_v38  ;;  %v2837_v0 = vrot.slane %v2823_v39, %v5181_v38  ;;  %v2814_v37 = vrot.slane %v2806_v53, %v5181_v38  ;;  %v2821_v58 = vrot.slane %v2807_v12, %v5181_v38 }
 0x340   : > { %v2784_v17 = vpop.permute.xlu1 %2783  ;;  %v2787_v43 = vpop.permute.xlu0 %2786 }
 0x341   : > { %v2870_v34 = vcombine.low %v2814_v37, %v2830_v60  ;;  %v2871_v48 = vcombine.high %v2814_v37, %v2830_v60  ;;  %v2886_v13 = vcombine.low %v2821_v58, %v2837_v0  ;;  %v2887_v1 = vcombine.high %v2821_v58, %v2837_v0 }
 0x343   : > { %v2878_v23 = vrot.slane %v2870_v34, %v5496_v56  ;;  %v2885_v32 = vrot.slane %v2871_v48, %v5496_v56  ;;  %v2894_v28 = vrot.slane %v2886_v13, %v5496_v56  ;;  %v2901_v11 = vrot.slane %v2887_v1, %v5496_v56 }
 0x344   : > { %v2790_v51 = vpop.permute.xlu1 %2789  ;;  %v2801_v19 = vpop.permute.xlu0 %2800 }
 0x345   : > { %v2838_v47 = vcombine.low %v2784_v17, %v2790_v51  ;;  %v2839_v21 = vcombine.high %v2784_v17, %v2790_v51  ;;  %v2942_v49 = vcombine.high %v2801_v19, %v7550_v54  ;;  %v2949_v3 = vrot.slane %v2801_v19, %v5181_v38 }
 0x347   : > { %v2846_v42 = vrot.slane %v2838_v47, %v5181_v38  ;;  %v2853_v15 = vrot.slane %v2839_v21, %v5181_v38  ;;  %v2956_v5 = vrot.slane %v2942_v49, %v5181_v38 }
 0x348   : > { %v2796_v10 = vpop.permute.xlu1 %2795 }
 0x349   : > { %v2798_v44 = vsel %vm2797_vm0, %v2794_v4, %v2796_v10  ;;  %vm3167_vm0 = vcmask 261120  }
 0x34a   : > { %v2854_v20 = vcombine.low %v2787_v43, %v2798_v44  ;;  %v2855_v18 = vcombine.high %v2787_v43, %v2798_v44 }
 0x34c   : > { %v2862_v35 = vrot.slane %v2854_v20, %v5181_v38  ;;  %v2869_v25 = vrot.slane %v2855_v18, %v5181_v38  ;;  %v2804_v27 = vpop.permute.xlu1 %2803 }
 0x34d   : > { %v2957_v26 = vcombine.high %v2804_v27, %v7550_v54  ;;  %v2964_v62 = vrot.slane %v2804_v27, %v5181_v38 }
 0x34e   : > { %v2902_v36 = vcombine.low %v2846_v42, %v2862_v35  ;;  %v2903_v31 = vcombine.high %v2846_v42, %v2862_v35  ;;  %v2918_v6 = vcombine.low %v2853_v15, %v2869_v25  ;;  %v2919_v41 = vcombine.high %v2853_v15, %v2869_v25 }
 0x34f   : > { %v2971_v33 = vrot.slane %v2957_v26, %v5181_v38  ;;  %v2972_v9 = vcombine.low %v2949_v3, %v2964_v62  ;;  %v2973_v52 = vcombine.high %v2949_v3, %v2964_v62 }
 0x350   : > { %v2910_v50 = vrot.slane %v2902_v36, %v5496_v56  ;;  %v2917_v4 = vrot.slane %v2903_v31, %v5496_v56  ;;  %v2926_v46 = vrot.slane %v2918_v6, %v5496_v56  ;;  %v2933_v22 = vrot.slane %v2919_v41, %v5496_v56 }
 0x351   : > { %v2980_v39 = vrot.slane %v2972_v9, %v5496_v56  ;;  %v2987_v53 = vrot.slane %v2973_v52, %v5496_v56  ;;  %v2988_v12 = vcombine.low %v2956_v5, %v2971_v33  ;;  %v2989_v17 = vcombine.high %v2956_v5, %v2971_v33 }
 0x352   : > { %v2934_v55 = vcombine.low %v2878_v23, %v2910_v50  ;;  %v2935_v63 = vcombine.high %v2878_v23, %v2910_v50  ;;  %v2936_v14 = vcombine.low %v2885_v32, %v2917_v4  ;;  %v2937_v43 = vcombine.high %v2885_v32, %v2917_v4 }
 0x353   : > { %v2938_v57 = vcombine.low %v2894_v28, %v2926_v46  ;;  %v2939_v29 = vcombine.high %v2894_v28, %v2926_v46  ;;  %v2940_v60 = vcombine.low %v2901_v11, %v2933_v22  ;;  %v2941_v0 = vcombine.high %v2901_v11, %v2933_v22 }
 0x354   : > { %v3036_v37 = vsel %vm6637_vm11, %v2935_v63, 0.0  ;;  %v3040_v58 = vsel %vm6637_vm11, %v2937_v43, 0.0  ;;  %v3034_v51 = vsel %vm6637_vm11, %v2934_v55, 0.0  ;;  %v3038_v59 = vsel %vm6637_vm11, %v2936_v14, 0.0 }
 0x355   : > { %v3042_v30 = vsel %vm6637_vm11, %v2938_v57, 0.0  ;;  %v3044_v34 = vsel %vm6637_vm11, %v2939_v29, 0.0  ;;  %v3046_v48 = vsel %vm6637_vm11, %v2940_v60, 0.0  ;;  %v3048_v13 = vsel %vm6637_vm11, %v2941_v0, 0.0 }
 0x356   : > { %v4691_v19 = vpack.c.bf16 %v3044_v34, %v3036_v37  ;;  %v4692_v47 = vpack.c.bf16 %v3048_v13, %v3040_v58  ;;  %v4689_v10 = vpack.c.bf16 %v3042_v30, %v3034_v51  ;;  %v4690_v1 = vpack.c.bf16 %v3046_v48, %v3038_v59 }
 0x357   : > { %v2996_v44 = vrot.slane %v2988_v12, %v5496_v56  ;;  %v3003_v20 = vrot.slane %v2989_v17, %v5496_v56  ;;  %v3004_v18 = vcombine.high %v2980_v39, %v7550_v54  ;;  %v3005_v23 = vcombine.high %v2987_v53, %v7550_v54 }
 0x358   : > { %v6672_v32 = vrot.slane %v4691_v19, %v5181_v38  ;;  %v6675_v28 = vrot.slane %v4692_v47, %v5181_v38  ;;  %v6678_v7 = vrot.slane %v4689_v10, %v5181_v38  ;;  %v6681_v49 = vrot.slane %v4690_v1, %v5181_v38 }
 0x359   : > { %v3006_v42 = vcombine.high %v2996_v44, %v7550_v54  ;;  %v3007_v15 = vcombine.high %v3003_v20, %v7550_v54  ;;  %v3035_v35 = vsel %vm6663_vm14, %v2980_v39, 0.0  ;;  %v3037_v25 = vsel %vm6663_vm14, %v3004_v18, 0.0 }
 0x35a   : > { %v3108_v27 = vcombine.low %v6672_v32, %v6675_v28  ;;  %v3074_v11 = vcombine.low %v6678_v7, %v6681_v49  ;;  %v3039_v3 = vsel %vm6663_vm14, %v2987_v53, 0.0  ;;  %v3041_v26 = vsel %vm6663_vm14, %v3005_v23, 0.0 }
 0x35b   : > { %v3043_v62 = vsel %vm6663_vm14, %v2996_v44, 0.0  ;;  %v6699_v36 = vpack.c.bf16 %v3035_v35, %v3034_v51  ;;  %v3047_v31 = vsel %vm6663_vm14, %v3003_v20, 0.0  ;;  %v6703_v6 = vpack.c.bf16 %v3037_v25, %v3036_v37 }
 0x35c   : > { %v3045_v41 = vsel %vm6663_vm14, %v3006_v42, 0.0  ;;  %v6707_v5 = vpack.c.bf16 %v3039_v3, %v3038_v59  ;;  %v6711_v33 = vpack.c.bf16 %v3041_v26, %v3040_v58  ;;  %v6713_v9 = vpack.c.bf16 %v3043_v62, %v3042_v30 }
 0x35d   : > { %3338 = vrot.lane.b32.xlu0 %v6699_v36, %s4941_s18  ;;  %v3049_v52 = vsel %vm6663_vm14, %v3007_v15, 0.0  ;;  %3340 = vrot.lane.b32.xlu1 %v6703_v6, %s4941_s18  ;;  %v6719_v50 = vpack.c.bf16 %v3045_v41, %v3044_v34  ;;  %v6721_v4 = vpack.c.bf16 %v3047_v31, %v3046_v48  ;;  %v6726_v22 = vrot.slane %v6699_v36, 1 }
 0x35e   : > { %v6723_v46 = vpack.c.bf16 %v3049_v52, %v3048_v13  ;;  %v3486_v24 = vshll.u32 %v6699_v36, 16  ;;  %v3493_v39 = vshll.u32 %v6703_v6, 16  ;;  %v6733_v53 = vrot.slane %v6703_v6, 1 }
 0x35f   : > { %v6736_v12 = vrot.slane %v6707_v5, 1  ;;  %v6739_v17 = vrot.slane %v6711_v33, 1  ;;  %v6742_v55 = vrot.slane %v6713_v9, 1  ;;  %v3484_v63 = vshrl.u32 %v6699_v36, 16 }
 0x360   : > { %v3488_v14 = vrot.slane %v3486_v24, 1  ;;  %v3495_v43 = vrot.slane %v3493_v39, 1  ;;  %v3500_v57 = vshll.u32 %v6707_v5, 16  ;;  %v6749_v29 = vrot.slane %v6719_v50, 1 }
 0x361   : > { %3342 = vrot.lane.b32.xlu0 %v6707_v5, %s4941_s18  ;;  %3344 = vrot.lane.b32.xlu1 %v6711_v33, %s4941_s18  ;;  %v6752_v60 = vrot.slane %v6721_v4, 1  ;;  %v6755_v0 = vrot.slane %v6723_v46, 1  ;;  %v3491_v37 = vshrl.u32 %v6703_v6, 16  ;;  %v3498_v51 = vshrl.u32 %v6707_v5, 16 }
 0x362   : > { %v6758_v58 = vor.u32 %v3488_v14, %v3484_v63  ;;  %v3502_v59 = vrot.slane %v3500_v57, 1  ;;  %v3505_v30 = vshrl.u32 %v6711_v33, 16  ;;  %v3507_v48 = vshll.u32 %v6711_v33, 16 }
 0x363   : > { %v6764_v34 = vor.u32 %v3495_v43, %v3491_v37  ;;  %v3512_v13 = vshrl.u32 %v6713_v9, 16  ;;  %v3514_v19 = vshll.u32 %v6713_v9, 16  ;;  %v3519_v21 = vshrl.u32 %v6719_v50, 16 }
 0x364   : > { %v6771_v47 = vor.u32 %v3502_v59, %v3498_v51  ;;  %v3521_v10 = vshll.u32 %v6719_v50, 16  ;;  %v3528_v1 = vshll.u32 %v6721_v4, 16  ;;  %v3509_v44 = vrot.slane %v3507_v48, 1 }
 0x365   : > { %3346 = vrot.lane.b32.xlu0 %v6713_v9, %s4941_s18  ;;  %3348 = vrot.lane.b32.xlu1 %v6719_v50, %s4941_s18  ;;  %v3516_v20 = vrot.slane %v3514_v19, 1  ;;  %v3526_v18 = vshrl.u32 %v6721_v4, 16  ;;  %v3535_v23 = vshll.u32 %v6723_v46, 16  ;;  %v6779_v35 = vrot.slane %v3074_v11, %v5496_v56 }
 0x366   : > { %v3523_v42 = vrot.slane %v3521_v10, 1  ;;  %v3530_v15 = vrot.slane %v3528_v1, 1  ;;  %v6782_v25 = vrot.slane %v3108_v27, %v5496_v56  ;;  %v6786_v3 = vor.u32 %v3509_v44, %v3505_v30 }
 0x367   : > { %v3533_v26 = vshrl.u32 %v6723_v46, 16  ;;  %v3537_v62 = vrot.slane %v3535_v23, 1  ;;  %v3075_v31 = vcombine.high %v6678_v7, %v6681_v49  ;;  %v6793_v41 = vor.u32 %v3516_v20, %v3512_v13 }
 0x368   : > { %v6795_v11 = vor.u32 %v3523_v42, %v3519_v21  ;;  %v6799_v27 = vcombine.high %v6779_v35, %v7573_v2  ;;  %v6803_v52 = vcombine.high %v6782_v25, %v7573_v2  ;;  %v6805_v24 = vor.u32 %v3530_v15, %v3526_v18 }
 0x369   : > { %3350 = vrot.lane.b32.xlu0 %v6721_v4, %s4941_s18  ;;  %3352 = vrot.lane.b32.xlu1 %v6723_v46, %s4941_s18  ;;  %v6807_v39 = vor.u32 %v3537_v62, %v3533_v26  ;;  %v6810_v7 = vrot.slane %v3075_v31, %v5496_v56  ;;  %v3109_v49 = vcombine.high %v6672_v32, %v6675_v28  ;;  %v3129_v19 = vshrl.u32 %v6779_v35, 16 }
 0x36a   : > { %v4008_v63 = vcombine.low %v6733_v53, %v6749_v29  ;;  %v4016_v14 = vcombine.low %v6739_v17, %v6755_v0  ;;  %v3135_v43 = vshrl.u32 %v6799_v27, 16  ;;  %v3136_v57 = vshrl.u32 %v6803_v52, 16 }
 0x36b   : > { %v3581_v37 = vcombine.low %v6764_v34, %v6795_v11  ;;  %v3589_v51 = vcombine.low %v6786_v3, %v6807_v39  ;;  %v6827_v32 = vrot.slane %v3109_v49, %v5496_v56  ;;  %v3974_v28 = vcombine.low %v6726_v22, %v6742_v55 }
 0x36c   : > { %v3982_v59 = vcombine.low %v6736_v12, %v6752_v60  ;;  %v6835_v30 = vpack.i.b16 %v3136_v57, %v3135_v43  ;;  %v3555_v48 = vcombine.low %v6771_v47, %v6805_v24  ;;  %v6848_v21 = vrot.slane %v4016_v14, %v5181_v38 }
 0x36d   : > { %3193 = vrot.lane.b32.xlu0 %v6699_v36, %s7614_s16  ;;  %3195 = vrot.lane.b32.xlu1 %v6703_v6, %s7614_s16  ;;  %v3547_v36 = vcombine.low %v6758_v58, %v6793_v41  ;;  %v3140_v13 = vpack.i.b16 %v6827_v32, %v6810_v7  ;;  %v6845_v6 = vrot.slane %v4008_v63, %v5181_v38  ;;  %v3130_v10 = vshrl.u32 %v6782_v25, 16 }
 0x36e   : > { %v3134_v1 = vpack.i.b16 %v6803_v52, %v6799_v27  ;;  %v6856_v44 = vrot.slane %v3581_v37, %v5181_v38  ;;  %v6859_v20 = vrot.slane %v3589_v51, %v5181_v38  ;;  %v6864_v18 = vrot.slane %v3974_v28, %v5181_v38 }
 0x36f   : > { %v6867_v23 = vrot.slane %v3982_v59, %v5181_v38  ;;  %v6869_v42 = vpack.i.b16 %v3130_v10, %v3129_v19  ;;  %v6872_v15 = vrot.slane %v3547_v36, %v5181_v38  ;;  %v4024_v26 = vcombine.low %v6845_v6, %v6848_v21 }
 0x370   : > { %v3142_v57 = vshrl.u32 %v6827_v32, 16  ;;  %v6919_v37 = vcombine.high %v6810_v7, %v7573_v2  ;;  %v6923_v51 = vcombine.high %v6827_v32, %v7573_v2 }
 0x371   : > { %3197 = vrot.lane.b32.xlu0 %v6707_v5, %s7614_s16  ;;  %3199 = vrot.lane.b32.xlu1 %v6711_v33, %s7614_s16  ;;  %v6875_v5 = vrot.slane %v3555_v48, %v5181_v38  ;;  %v3597_v33 = vcombine.low %v6856_v44, %v6859_v20  ;;  %v3990_v62 = vcombine.low %v6864_v18, %v6867_v23 }
 0x372   : > { %v6890_v49 = vrot.slane %v4024_v26, %v5496_v56  ;;  %v3147_v59 = vshrl.u32 %v6919_v37, 16  ;;  %v3148_v48 = vshrl.u32 %v6923_v51, 16 }
 0x373   : > { %v3563_v31 = vcombine.low %v6872_v15, %v6875_v5 }
 0x374   : > { %v6935_v19 = vpack.i.b16 %v3148_v48, %v3147_v59  ;;  %v4040_v32 = vcombine.high %v6890_v49, %v7573_v2 }
 0x375   : > { %3201 = vrot.lane.b32.xlu0 %v6713_v9, %s7614_s16  ;;  %3203 = vrot.lane.b32.xlu1 %v6719_v50, %s7614_s16  ;;  %v6895_v9 = vrot.slane %v3597_v33, %v5496_v56  ;;  %v6900_v50 = vrot.slane %v3990_v62, %v5496_v56  ;;  %v6903_v63 = vrot.slane %v3563_v31, %v5496_v56 }
 0x376   : > { %v4052_v59 = vshrl.u32 %v4040_v32, 16 }
 0x377   : > { %v4006_v27 = vcombine.high %v6900_v50, %v7573_v2 }
 0x379   : > { %3205 = vrot.lane.b32.xlu0 %v6721_v4, %s7614_s16  ;;  %3207 = vrot.lane.b32.xlu1 %v6723_v46, %s7614_s16  ;;  %v3141_v46 = vshrl.u32 %v6810_v7, 16 }
 0x37b   : > { %v6925_v28 = vpack.i.b16 %v3142_v57, %v3141_v46 }
 0x37d   : > { %4240 = vrot.lane.b32.xlu0 %v6726_v22, %s4941_s18  ;;  %4242 = vrot.lane.b32.xlu1 %v6733_v53, %s4941_s18 }
 0x381   : > { %4244 = vrot.lane.b32.xlu0 %v6736_v12, %s4941_s18  ;;  %4246 = vrot.lane.b32.xlu1 %v6739_v17, %s4941_s18 }
 0x385   : > { %4248 = vrot.lane.b32.xlu0 %v6742_v55, %s4941_s18  ;;  %4250 = vrot.lane.b32.xlu1 %v6749_v29, %s4941_s18 }
 0x389   : > { %4252 = vrot.lane.b32.xlu0 %v6752_v60, %s4941_s18  ;;  %4254 = vrot.lane.b32.xlu1 %v6755_v0, %s4941_s18 }
 0x38d   : > { %4095 = vrot.lane.b32.xlu0 %v6726_v22, %s7614_s16  ;;  %4097 = vrot.lane.b32.xlu1 %v6733_v53, %s7614_s16  ;;  %v4046_v22 = vshrl.u32 %v6890_v49, 16  ;;  %v3598_v53 = vcombine.high %v6856_v44, %v6859_v20 }
 0x391   : > { %4099 = vrot.lane.b32.xlu0 %v6736_v12, %s7614_s16  ;;  %4101 = vrot.lane.b32.xlu1 %v6739_v17, %s7614_s16  ;;  %v4045_v12 = vshrl.u32 %v6900_v50, 16  ;;  %v3564_v17 = vcombine.high %v6872_v15, %v6875_v5 }
 0x395   : > { %4103 = vrot.lane.b32.xlu0 %v6742_v55, %s7614_s16  ;;  %4105 = vrot.lane.b32.xlu1 %v6749_v29, %s7614_s16  ;;  %v4047_v55 = vpack.i.b16 %v4046_v22, %v4045_v12  ;;  %v3612_v29 = vrot.slane %v3598_v53, %v5496_v56  ;;  %v4051_v22 = vshrl.u32 %v4006_v27, 16 }
 0x399   : > { %4107 = vrot.lane.b32.xlu0 %v6752_v60, %s7614_s16  ;;  %4109 = vrot.lane.b32.xlu1 %v6755_v0, %s7614_s16  ;;  %v4025_v60 = vcombine.high %v6845_v6, %v6848_v21  ;;  %v3578_v0 = vrot.slane %v3564_v17, %v5496_v56  ;;  %v4050_v6 = vpack.i.b16 %v4040_v32, %v4006_v27 }
 0x39b   : > { %v3630_v10 = vshrl.u32 %v3578_v0, 16  ;;  %v3580_v5 = vcombine.high %v3578_v0, %v7573_v2 }
 0x39d   : > { %3813 = vrot.lane.b32.xlu0 %v6758_v58, %s4941_s18  ;;  %3815 = vrot.lane.b32.xlu1 %v6764_v34, %s4941_s18 }
 0x3a1   : > { %3817 = vrot.lane.b32.xlu0 %v6771_v47, %s4941_s18  ;;  %3819 = vrot.lane.b32.xlu1 %v6786_v3, %s4941_s18 }
 0x3a5   : > { %3821 = vrot.lane.b32.xlu0 %v6793_v41, %s4941_s18  ;;  %3823 = vrot.lane.b32.xlu1 %v6795_v11, %s4941_s18 }
 0x3a9   : > { %3825 = vrot.lane.b32.xlu0 %v6805_v24, %s4941_s18  ;;  %3827 = vrot.lane.b32.xlu1 %v6807_v39, %s4941_s18  ;;  %s4963_s18 = smov 48  }
 0x3ad   : > { %3668 = vrot.lane.b32.xlu0 %v6758_v58, %s7614_s16  ;;  %3670 = vrot.lane.b32.xlu1 %v6764_v34, %s7614_s16  ;;  %v3991_v58 = vcombine.high %v6864_v18, %v6867_v23  ;;  %v3629_v34 = vpack.i.b16 %v3612_v29, %v3578_v0  ;;  %v3614_v18 = vcombine.high %v3612_v29, %v7573_v2  ;;  %v3636_v0 = vshrl.u32 %v3580_v5, 16 }
 0x3af   : > { %v3635_v62 = vpack.i.b16 %v3614_v18, %v3580_v5  ;;  %v3637_v17 = vshrl.u32 %v3614_v18, 16 }
 0x3b1   : > { %3672 = vrot.lane.b32.xlu0 %v6771_v47, %s7614_s16  ;;  %3674 = vrot.lane.b32.xlu1 %v6786_v3, %s7614_s16  ;;  %v3619_v47 = vshrl.u32 %v6895_v9, 16  ;;  %v4039_v3 = vrot.slane %v4025_v60, %v5496_v56 }
 0x3b3   : > { %v4058_v21 = vshrl.u32 %v4039_v3, 16  ;;  %v4041_v15 = vcombine.high %v4039_v3, %v7573_v2 }
 0x3b5   : > { %3676 = vrot.lane.b32.xlu0 %v6793_v41, %s7614_s16  ;;  %3678 = vrot.lane.b32.xlu1 %v6795_v11, %s7614_s16  ;;  %v3618_v41 = vshrl.u32 %v6903_v63, 16  ;;  %v4005_v11 = vrot.slane %v3991_v58, %v5496_v56  ;;  %v4064_v60 = vshrl.u32 %v4041_v15, 16 }
 0x3b7   : > { %v4056_v7 = vpack.i.b16 %v4039_v3, %v4005_v11  ;;  %v4007_v26 = vcombine.high %v4005_v11, %v7573_v2 }
 0x3b9   : > { %3680 = vrot.lane.b32.xlu0 %v6805_v24, %s7614_s16  ;;  %3682 = vrot.lane.b32.xlu1 %v6807_v39, %s7614_s16  ;;  %v3620_v24 = vpack.i.b16 %v3619_v47, %v3618_v41  ;;  %v3613_v39 = vcombine.high %v6895_v9, %v7573_v2  ;;  %v4062_v57 = vpack.i.b16 %v4041_v15, %v4007_v26 }
 0x3ba   : > { %v3638_v41 = vpack.i.b16 %v3637_v17, %v3636_v0 }
 0x3bb   : > { %v3625_v31 = vshrl.u32 %v3613_v39, 16 }
 0x3bd   : > { %3154 = vrot.lane.b32.xlu0 %v6835_v30, %s4963_s18  ;;  %3156 = vrot.lane.b32.xlu1 %v3140_v13, %s4964_s23  ;;  %v3579_v30 = vcombine.high %v6903_v63, %v7573_v2  ;;  %v3631_v13 = vshrl.u32 %v3612_v29, 16  ;;  %v4053_v29 = vpack.i.b16 %v4052_v59, %v4051_v22 }
 0x3bf   : > { %v3623_v52 = vpack.i.b16 %v3613_v39, %v3579_v30  ;;  %v3632_v20 = vpack.i.b16 %v3631_v13, %v3630_v10  ;;  %v3624_v48 = vshrl.u32 %v3579_v30, 16 }
 0x3c1   : > { %4066 = vrot.lane.b32.xlu0 %v4047_v55, %s4951_s21  ;;  %3150 = vrot.lane.b32.xlu1 %v6869_v42, %s4951_s21  ;;  %v3626_v12 = vpack.i.b16 %v3625_v31, %v3624_v48 }
 0x3c5   : > { %3645 = vrot.lane.b32.xlu0 %v3629_v34, %s4964_s23  ;;  %3152 = vrot.lane.b32.xlu1 %v3134_v1, %s4965_s9  ;;  %v4057_v1 = vshrl.u32 %v4005_v11, 16  ;;  %v4063_v34 = vshrl.u32 %v4007_v26, 16 }
 0x3c7   : > { %v4059_v42 = vpack.i.b16 %v4058_v21, %v4057_v1  ;;  %v4065_v39 = vpack.i.b16 %v4064_v60, %v4063_v34 }
 0x3c9   : > { %3639 = vrot.lane.b32.xlu0 %v3620_v24, %s4951_s21  ;;  %4072 = vrot.lane.b32.xlu1 %v4056_v7, %s4964_s23 }
 0x3cd   : > { %3641 = vrot.lane.b32.xlu0 %v3623_v52, %s4965_s9  ;;  %4068 = vrot.lane.b32.xlu1 %v4050_v6, %s4965_s9 }
 0x3cf   : > { %v3339_v44 = vpop.permute.xlu0 %3338  ;;  %v3341_v23 = vpop.permute.xlu1 %3340 }
 0x3d1   : > { %3647 = vrot.lane.b32.xlu0 %v3632_v20, %s4966_s10  ;;  %4074 = vrot.lane.b32.xlu1 %v4059_v42, %s4966_s10 }
 0x3d3   : > { %v3343_v33 = vpop.permute.xlu0 %3342  ;;  %v3345_v46 = vpop.permute.xlu1 %3344 }
 0x3d5   : > { %3649 = vrot.lane.b32.xlu0 %v3635_v62, %s4967_s13  ;;  %4076 = vrot.lane.b32.xlu1 %v4062_v57, %s4967_s13 }
 0x3d7   : > { %v3347_v53 = vpop.permute.xlu0 %3346  ;;  %v3349_v55 = vpop.permute.xlu1 %3348 }
 0x3d8   : > { %v3362_v58 = vcombine.low %v3339_v44, %v3347_v53  ;;  %v3396_v47 = vcombine.low %v3341_v23, %v3349_v55 }
 0x3d9   : > { %3643 = vrot.lane.b32.xlu0 %v3626_v12, %s4963_s18  ;;  %4070 = vrot.lane.b32.xlu1 %v4053_v29, %s4963_s18 }
 0x3da   : > { %v3369_v32 = vrot.slane %v3362_v58, %v5181_v38  ;;  %v3403_v27 = vrot.slane %v3396_v47, %v5181_v38 }
 0x3db   : > { %v3351_v3 = vpop.permute.xlu0 %3350  ;;  %v3353_v24 = vpop.permute.xlu1 %3352 }
 0x3dc   : > { %v3370_v11 = vcombine.low %v3343_v33, %v3351_v3  ;;  %v3404_v7 = vcombine.low %v3345_v46, %v3353_v24 }
 0x3dd   : > { %3651 = vrot.lane.b32.xlu0 %v3638_v41, %s4960_s20  ;;  %4078 = vrot.lane.b32.xlu1 %v4065_v39, %s4960_s20 }
 0x3de   : > { %v3377_v30 = vrot.slane %v3370_v11, %v5181_v38  ;;  %v3411_v52 = vrot.slane %v3404_v7, %v5181_v38 }
 0x3df   : > { %v3194_v13 = vpop.permute.xlu0 %3193  ;;  %v3196_v10 = vpop.permute.xlu1 %3195 }
 0x3e0   : > { %v3378_v6 = vcombine.low %v3369_v32, %v3377_v30  ;;  %v3379_v21 = vcombine.high %v3369_v32, %v3377_v30  ;;  %v3412_v1 = vcombine.low %v3403_v27, %v3411_v52  ;;  %v3413_v44 = vcombine.high %v3403_v27, %v3411_v52 }
 0x3e2   : > { %v7052_v20 = vrot.slane %v3378_v6, %v5496_v56  ;;  %v7055_v18 = vrot.slane %v3379_v21, %v5496_v56  ;;  %v7058_v23 = vrot.slane %v3412_v1, %v5496_v56  ;;  %v7061_v42 = vrot.slane %v3413_v44, %v5496_v56 }
 0x3e3   : > { %v3198_v15 = vpop.permute.xlu0 %3197  ;;  %v3200_v5 = vpop.permute.xlu1 %3199 }
 0x3e4   : > { %v3444_v26 = vpack.i.b16 %v7061_v42, %v7055_v18 }
 0x3e6   : > { %3460 = vrot.lane.b32.xlu1 %v3444_v26, %s4964_s23 }
 0x3e7   : > { %v3202_v62 = vpop.permute.xlu0 %3201  ;;  %v3204_v31 = vpop.permute.xlu1 %3203 }
 0x3e8   : > { %v3217_v46 = vcombine.low %v3194_v13, %v3202_v62  ;;  %v3251_v57 = vcombine.low %v3196_v10, %v3204_v31 }
 0x3ea   : > { %v3224_v12 = vrot.slane %v3217_v46, %v5181_v38  ;;  %v3258_v55 = vrot.slane %v3251_v57, %v5181_v38 }
 0x3eb   : > { %v3206_v59 = vpop.permute.xlu0 %3205  ;;  %v3208_v22 = vpop.permute.xlu1 %3207 }
 0x3ec   : > { %v3225_v48 = vcombine.low %v3198_v15, %v3206_v59  ;;  %v3259_v53 = vcombine.low %v3200_v5, %v3208_v22 }
 0x3ee   : > { %v3232_v17 = vrot.slane %v3225_v48, %v5181_v38  ;;  %v3266_v29 = vrot.slane %v3259_v53, %v5181_v38 }
 0x3ef   : > { %v4241_v60 = vpop.permute.xlu0 %4240  ;;  %v4243_v34 = vpop.permute.xlu1 %4242 }
 0x3f0   : > { %v3233_v0 = vcombine.low %v3224_v12, %v3232_v17  ;;  %v3234_v58 = vcombine.high %v3224_v12, %v3232_v17  ;;  %v3267_v47 = vcombine.low %v3258_v55, %v3266_v29  ;;  %v3268_v3 = vcombine.high %v3258_v55, %v3266_v29 }
 0x3f2   : > { %v7073_v41 = vrot.slane %v3233_v0, %v5496_v56  ;;  %v7076_v11 = vrot.slane %v3234_v58, %v5496_v56  ;;  %v7079_v24 = vrot.slane %v3267_v47, %v5496_v56  ;;  %v7082_v39 = vrot.slane %v3268_v3, %v5496_v56 }
 0x3f3   : > { %v4245_v7 = vpop.permute.xlu0 %4244  ;;  %v4247_v32 = vpop.permute.xlu1 %4246 }
 0x3f4   : > { %v7086_v30 = vcombine.high %v7076_v11, %v7573_v2  ;;  %v3299_v27 = vpack.i.b16 %v7082_v39, %v7076_v11  ;;  %v7092_v52 = vcombine.high %v7082_v39, %v7573_v2 }
 0x3f6   : > { %v3306_v13 = vshrl.u32 %v7086_v30, 16  ;;  %3315 = vrot.lane.b32.xlu0 %v3299_v27, %s4964_s23  ;;  %v3307_v44 = vshrl.u32 %v7092_v52, 16 }
 0x3f7   : > { %v4249_v21 = vpop.permute.xlu0 %4248  ;;  %v4251_v10 = vpop.permute.xlu1 %4250 }
 0x3f8   : > { %v4264_v15 = vcombine.low %v4241_v60, %v4249_v21  ;;  %v7101_v5 = vpack.i.b16 %v3307_v44, %v3306_v13  ;;  %v4298_v26 = vcombine.low %v4243_v34, %v4251_v10  ;;  %v3433_v13 = vshrl.u32 %v7052_v20, 16 }
 0x3f9   : > { %v3434_v21 = vshrl.u32 %v7058_v23, 16 }
 0x3fa   : > { %v4271_v59 = vrot.slane %v4264_v15, %v5181_v38  ;;  %v4305_v22 = vrot.slane %v4298_v26, %v5181_v38 }
 0x3fb   : > { %v4253_v62 = vpop.permute.xlu0 %4252  ;;  %v4255_v46 = vpop.permute.xlu1 %4254  ;;  %v3435_v26 = vpack.i.b16 %v3434_v21, %v3433_v13 }
 0x3fc   : > { %v4272_v31 = vcombine.low %v4245_v7, %v4253_v62  ;;  %v4306_v57 = vcombine.low %v4247_v32, %v4255_v46  ;;  %v7128_v62 = vcombine.high %v7052_v20, %v7573_v2 }
 0x3fe   : > { %v4279_v48 = vrot.slane %v4272_v31, %v5181_v38  ;;  %v4313_v53 = vrot.slane %v4306_v57, %v5181_v38  ;;  %v7132_v31 = vcombine.high %v7058_v23, %v7573_v2 }
 0x3ff   : > { %v4096_v12 = vpop.permute.xlu0 %4095  ;;  %v4098_v29 = vpop.permute.xlu1 %4097 }
 0x400   : > { %v4280_v17 = vcombine.low %v4271_v59, %v4279_v48  ;;  %v4281_v55 = vcombine.high %v4271_v59, %v4279_v48  ;;  %v4314_v60 = vcombine.low %v4305_v22, %v4313_v53  ;;  %v4315_v0 = vcombine.high %v4305_v22, %v4313_v53 }
 0x402   : > { %v7108_v58 = vrot.slane %v4280_v17, %v5496_v56  ;;  %v7111_v34 = vrot.slane %v4281_v55, %v5496_v56  ;;  %v7114_v47 = vrot.slane %v4314_v60, %v5496_v56  ;;  %v7117_v3 = vrot.slane %v4315_v0, %v5496_v56 }
 0x403   : > { %v4100_v7 = vpop.permute.xlu0 %4099  ;;  %v4102_v32 = vpop.permute.xlu1 %4101  ;;  %v3438_v17 = vpack.i.b16 %v7132_v31, %v7128_v62  ;;  %v3445_v55 = vshrl.u32 %v7055_v18, 16  ;;  %v3446_v60 = vshrl.u32 %v7061_v42, 16 }
 0x404   : > { %7615 = vst [vmem:[#allocation6_spill] sm:$0xff] %v7108_v58  ;;  %7616 = vst [vmem:[#allocation10_spill] sm:$0xff] %v7114_v47  ;;  %v4346_v27 = vpack.i.b16 %v7117_v3, %v7111_v34 }
 0x406   : > { %4362 = vrot.lane.b32.xlu1 %v4346_v27, %s4964_s23 }
 0x407   : > { %v4104_v44 = vpop.permute.xlu0 %4103  ;;  %v4106_v15 = vpop.permute.xlu1 %4105 }
 0x408   : > { %v4119_v46 = vcombine.low %v4096_v12, %v4104_v44  ;;  %v4153_v57 = vcombine.low %v4098_v29, %v4106_v15  ;;  %v7146_v44 = vcombine.high %v7055_v18, %v7573_v2  ;;  %v7150_v15 = vcombine.high %v7061_v42, %v7573_v2 }
 0x40a   : > { %3454 = vrot.lane.b32.xlu1 %v3435_v26, %s4951_s21  ;;  %v4126_v0 = vrot.slane %v4119_v46, %v5181_v38  ;;  %v4160_v12 = vrot.slane %v4153_v57, %v5181_v38 }
 0x40b   : > { %v4108_v59 = vpop.permute.xlu0 %4107  ;;  %v4110_v22 = vpop.permute.xlu1 %4109 }
 0x40c   : > { %v4127_v48 = vcombine.low %v4100_v7, %v4108_v59  ;;  %v4161_v53 = vcombine.low %v4102_v32, %v4110_v22  ;;  %v3447_v59 = vpack.i.b16 %v3446_v60, %v3445_v55  ;;  %v3300_v55 = vshrl.u32 %v7076_v11, 16 }
 0x40d   : > { %v7179_v11 = vcombine.high %v7073_v41, %v7573_v2 }
 0x40e   : > { %v4134_v27 = vrot.slane %v4127_v48, %v5181_v38  ;;  %v4168_v29 = vrot.slane %v4161_v53, %v5181_v38  ;;  %3456 = vrot.lane.b32.xlu1 %v3438_v17, %s4965_s9  ;;  %v3450_v17 = vpack.i.b16 %v7150_v15, %v7146_v44 }
 0x40f   : > { %v3814_v13 = vpop.permute.xlu0 %3813  ;;  %v3816_v21 = vpop.permute.xlu1 %3815 }
 0x410   : > { %v4135_v7 = vcombine.low %v4126_v0, %v4134_v27  ;;  %v4136_v32 = vcombine.high %v4126_v0, %v4134_v27  ;;  %v4169_v26 = vcombine.low %v4160_v12, %v4168_v29  ;;  %v4170_v46 = vcombine.high %v4160_v12, %v4168_v29 }
 0x411   : > { %v3301_v0 = vshrl.u32 %v7082_v39, 16  ;;  %v3288_v27 = vshrl.u32 %v7073_v41, 16  ;;  %v3289_v12 = vshrl.u32 %v7079_v24, 16  ;;  %v7183_v39 = vcombine.high %v7079_v24, %v7573_v2 }
 0x412   : > { %v7153_v57 = vrot.slane %v4135_v7, %v5496_v56  ;;  %v7156_v48 = vrot.slane %v4136_v32, %v5496_v56  ;;  %v7159_v22 = vrot.slane %v4169_v26, %v5496_v56  ;;  %v7162_v53 = vrot.slane %v4170_v46, %v5496_v56  ;;  %3462 = vrot.lane.b32.xlu1 %v3447_v59, %s4966_s10 }
 0x413   : > { %v3818_v18 = vpop.permute.xlu0 %3817  ;;  %v3820_v42 = vpop.permute.xlu1 %3819  ;;  %v3302_v26 = vpack.i.b16 %v3301_v0, %v3300_v55  ;;  %v3290_v46 = vpack.i.b16 %v3289_v12, %v3288_v27  ;;  %v4296_v59 = vcombine.high %v7108_v58, %v7573_v2  ;;  %v4330_v29 = vcombine.high %v7114_v47, %v7573_v2 }
 0x414   : > { %7617 = vst [vmem:[#allocation7_spill] sm:$0xff] %v7153_v57  ;;  %7618 = vst [vmem:[#allocation11_spill] sm:$0xff] %v7159_v22  ;;  %v4201_v60 = vpack.i.b16 %v7162_v53, %v7156_v48  ;;  %v3293_v1 = vpack.i.b16 %v7183_v39, %v7179_v11  ;;  %v7195_v55 = vcombine.high %v7111_v34, %v7573_v2  ;;  %v4335_v27 = vshrl.u32 %v7108_v58, 16 }
 0x415   : > { %v7199_v0 = vcombine.high %v7117_v3, %v7573_v2  ;;  %v4336_v12 = vshrl.u32 %v7114_v47, 16  ;;  %v4190_v54 = vshrl.u32 %v7153_v57, 16  ;;  %v4341_v4 = vshrl.u32 %v4296_v59, 16 }
 0x416   : > { %3464 = vrot.lane.b32.xlu1 %v3450_v17, %s4967_s13  ;;  %4217 = vrot.lane.b32.xlu0 %v4201_v60, %s4964_s23 }
 0x417   : > { %v3822_v7 = vpop.permute.xlu0 %3821  ;;  %v3824_v32 = vpop.permute.xlu1 %3823 }
 0x418   : > { %v3837_v17 = vcombine.low %v3814_v13, %v3822_v7  ;;  %v3871_v10 = vcombine.low %v3816_v21, %v3824_v32  ;;  %v4340_v21 = vpack.i.b16 %v4330_v29, %v4296_v59 }
 0x41a   : > { %3317 = vrot.lane.b32.xlu1 %v3302_v26, %s4966_s10  ;;  %3309 = vrot.lane.b32.xlu0 %v3290_v46, %s4951_s21  ;;  %v7210_v32 = vrot.slane %v3871_v10, %v5181_v38  ;;  %v3440_v10 = vshrl.u32 %v7132_v31, 16 }
 0x41b   : > { %v3826_v60 = vpop.permute.xlu0 %3825  ;;  %v3828_v33 = vpop.permute.xlu1 %3827 }
 0x41c   : > { %v3845_v6 = vcombine.low %v3818_v18, %v3826_v60  ;;  %v3879_v13 = vcombine.low %v3820_v42, %v3828_v33  ;;  %v7204_v18 = vrot.slane %v3837_v17, %v5181_v38  ;;  %v4352_v17 = vpack.i.b16 %v7199_v0, %v7195_v55 }
 0x41e   : > { %v7207_v7 = vrot.slane %v3845_v6, %v5181_v38  ;;  %v7213_v26 = vrot.slane %v3879_v13, %v5181_v38  ;;  %4358 = vrot.lane.b32.xlu1 %v4340_v21, %s4965_s9  ;;  %3311 = vrot.lane.b32.xlu0 %v3293_v1, %s4965_s9  ;;  %v3439_v6 = vshrl.u32 %v7128_v62, 16  ;;  %v4337_v13 = vpack.i.b16 %v4336_v12, %v4335_v27 }
 0x41f   : > { %v3669_v46 = vpop.permute.xlu0 %3668  ;;  %v3671_v42 = vpop.permute.xlu1 %3670  ;;  %v4191_v21 = vshrl.u32 %v7159_v22, 16  ;;  %v4342_v27 = vshrl.u32 %v4330_v29, 16  ;;  %v4151_v12 = vcombine.high %v7153_v57, %v7573_v2 }
 0x420   : > { %v3853_v33 = vcombine.low %v7204_v18, %v7207_v7  ;;  %v3887_v60 = vcombine.low %v7210_v32, %v7213_v26  ;;  %v3441_v31 = vpack.i.b16 %v3440_v10, %v3439_v6  ;;  %v4347_v6 = vshrl.u32 %v7111_v34, 16 }
 0x421   : > { %v4192_v14 = vpack.i.b16 %v4191_v21, %v4190_v54  ;;  %v4348_v54 = vshrl.u32 %v7117_v3, 16  ;;  %v4343_v29 = vpack.i.b16 %v4342_v27, %v4341_v4  ;;  %v4196_v10 = vshrl.u32 %v4151_v12, 16 }
 0x422   : > { %v7228_v1 = vrot.slane %v3853_v33, %v5496_v56  ;;  %v7231_v36 = vrot.slane %v3887_v60, %v5496_v56  ;;  %4366 = vrot.lane.b32.xlu1 %v4352_v17, %s4967_s13  ;;  %4356 = vrot.lane.b32.xlu0 %v4337_v13, %s4951_s21  ;;  %v4185_v33 = vcombine.high %v7159_v22, %v7573_v2  ;;  %v4354_v34 = vshrl.u32 %v7199_v0, 16 }
 0x423   : > { %v3673_v43 = vpop.permute.xlu0 %3672  ;;  %v3675_v62 = vpop.permute.xlu1 %3674  ;;  %v4349_v58 = vpack.i.b16 %v4348_v54, %v4347_v6  ;;  %v4202_v4 = vshrl.u32 %v7156_v48, 16  ;;  %v4203_v27 = vshrl.u32 %v7162_v53, 16 }
 0x424   : > { %v4195_v59 = vpack.i.b16 %v4185_v33, %v4151_v12  ;;  %v4197_v13 = vshrl.u32 %v4185_v33, 16  ;;  %v4152_v12 = vcombine.high %v7156_v48, %v7573_v2  ;;  %v4186_v33 = vcombine.high %v7162_v53, %v7573_v2 }
 0x425   : > { %v7619_v48 = vpack.i.b16 %v6890_v49, %v6900_v50 }
 0x426   : > { %3458 = vrot.lane.b32.xlu1 %v3441_v31, %s4963_s18  ;;  %4211 = vrot.lane.b32.xlu0 %v4192_v14, %s4951_s21  ;;  %v4353_v14 = vshrl.u32 %v7195_v55, 16  ;;  %v4198_v3 = vpack.i.b16 %v4197_v13, %v4196_v10  ;;  %v4207_v10 = vpack.i.b16 %v4186_v33, %v4152_v12  ;;  %v3294_v13 = vshrl.u32 %v7179_v11, 16 }
 0x427   : > { %v3677_v61 = vpop.permute.xlu0 %3676  ;;  %v3679_v17 = vpop.permute.xlu1 %3678 }
 0x428   : > { %v3692_v21 = vcombine.low %v3669_v46, %v3677_v61  ;;  %v3726_v57 = vcombine.low %v3671_v42, %v3679_v17  ;;  %v4355_v6 = vpack.i.b16 %v4354_v34, %v4353_v14 }
 0x42a   : > { %4360 = vrot.lane.b32.xlu1 %v4343_v29, %s4963_s18  ;;  %4213 = vrot.lane.b32.xlu0 %v4195_v59, %s4965_s9  ;;  %v3699_v61 = vrot.slane %v3692_v21, %v5181_v38  ;;  %v3733_v42 = vrot.slane %v3726_v57, %v5181_v38  ;;  %v4204_v57 = vpack.i.b16 %v4203_v27, %v4202_v4  ;;  %v3295_v21 = vshrl.u32 %v7183_v39, 16 }
 0x42b   : > { %v3681_v22 = vpop.permute.xlu0 %3680  ;;  %v3683_v31 = vpop.permute.xlu1 %3682  ;;  %v3452_v39 = vshrl.u32 %v7150_v15, 16 }
 0x42c   : > { %v3700_v60 = vcombine.low %v3673_v43, %v3681_v22  ;;  %v3734_v47 = vcombine.low %v3675_v62, %v3683_v31  ;;  %v7620_v31 = vpack.i.b16 %v6782_v25, %v6779_v35  ;;  %v3296_v35 = vpack.i.b16 %v3295_v21, %v3294_v13 }
 0x42d   : > { %v3451_v25 = vshrl.u32 %v7146_v44, 16  ;;  %v4208_v44 = vshrl.u32 %v4152_v12, 16 }
 0x42e   : > { %v3707_v46 = vrot.slane %v3700_v60, %v5181_v38  ;;  %v3741_v43 = vrot.slane %v3734_v47, %v5181_v38  ;;  %4215 = vrot.lane.b32.xlu1 %v4198_v3, %s4963_s18  ;;  %4364 = vrot.lane.b32.xlu0 %v4349_v58, %s4966_s10 }
 0x42f   : > { %v3155_v22 = vpop.permute.xlu0 %3154  ;;  %v3157_v62 = vpop.permute.xlu1 %3156 }
 0x430   : > { %v3708_v55 = vcombine.low %v3699_v61, %v3707_v46  ;;  %v3709_v0 = vcombine.high %v3699_v61, %v3707_v46  ;;  %v3742_v17 = vcombine.low %v3733_v42, %v3741_v43  ;;  %v3743_v60 = vcombine.high %v3733_v42, %v3741_v43 }
 0x432   : > { %v7262_v38 = vrot.slane %v3708_v55, %v5496_v56  ;;  %v3723_v47 = vrot.slane %v3709_v0, %v5496_v56  ;;  %v7266_v58 = vrot.slane %v3742_v17, %v5496_v56  ;;  %v3757_v54 = vrot.slane %v3743_v60, %v5496_v56  ;;  %4368 = vrot.lane.b32.xlu1 %v4355_v6, %s4960_s20 }
 0x433   : > { %v4067_v29 = vpop.permute.xlu0 %4066  ;;  %4219 = vrot.lane.b32.xlu0 %v4204_v57, %s4966_s10  ;;  %v3151_v59 = vpop.permute.xlu1 %3150  ;;  %v3854_v0 = vcombine.high %v7204_v18, %v7207_v7  ;;  %v3888_v17 = vcombine.high %v7210_v32, %v7213_v26  ;;  %v7621_v60 = vpack.i.b16 %v6895_v9, %v6903_v63  ;;  %v4209_v57 = vshrl.u32 %v4186_v33, 16 }
 0x434   : > { %v4082_v53 = vsel %vm517_vm12, %v7619_v48, %v4067_v29  ;;  %v3166_v14 = vsel %vm517_vm12, %v7620_v31, %v3151_v59  ;;  %v3774_v34 = vpack.i.b16 %v3757_v54, %v3723_v47  ;;  %v3763_v3 = vshrl.u32 %v7262_v38, 16 }
 0x435   : > { %v3764_v4 = vshrl.u32 %v7266_v58, 16  ;;  %v3762_v50 = vpack.i.b16 %v7266_v58, %v7262_v38  ;;  %v3724_v46 = vcombine.high %v7262_v38, %v7573_v2  ;;  %v3758_v42 = vcombine.high %v7266_v58, %v7573_v2 }
 0x436   : > { %3790 = vrot.lane.b32.xlu1 %v3774_v34, %s4964_s23  ;;  %v3453_v48 = vpack.i.b16 %v3452_v39, %v3451_v25  ;;  %v3775_v59 = vshrl.u32 %v3723_v47, 16  ;;  %v3776_v12 = vshrl.u32 %v3757_v54, 16  ;;  %v3868_v18 = vrot.slane %v3854_v0, %v5496_v56 }
 0x437   : > { %v7284_v49 = vpop.permute.xlu0 %3645  ;;  %4221 = vrot.lane.b32.xlu0 %v4207_v10, %s4967_s13  ;;  %v3153_v11 = vpop.permute.xlu1 %3152  ;;  %v3765_v61 = vpack.i.b16 %v3764_v4, %v3763_v3  ;;  %v3768_v29 = vpack.i.b16 %v3758_v42, %v3724_v46  ;;  %v3902_v7 = vrot.slane %v3888_v17, %v5496_v56  ;;  %v4210_v63 = vpack.i.b16 %v4209_v57, %v4208_v44 }
 0x438   : > { %v3169_v27 = vsel %vm3167_vm0, %v3166_v14, %v3153_v11  ;;  %v3777_v33 = vpack.i.b16 %v3776_v12, %v3775_v59  ;;  %v3725_v10 = vcombine.high %v3723_v47, %v7573_v2  ;;  %v3759_v13 = vcombine.high %v3757_v54, %v7573_v2 }
 0x439   : > { %v3172_v43 = vsel %vm3170_vm1, %v3169_v27, %v3155_v22  ;;  %v3919_v14 = vpack.i.b16 %v3902_v7, %v3868_v18  ;;  %v3908_v56 = vshrl.u32 %v7228_v1, 16  ;;  %v3769_v3 = vshrl.u32 %v3724_v46, 16 }
 0x43a   : > { %3784 = vrot.lane.b32.xlu1 %v3765_v61, %s4951_s21  ;;  %v7300_v15 = vsel %vm3173_vm2, %v3172_v43, %v3157_v62  ;;  %v3780_v34 = vpack.i.b16 %v3759_v13, %v3725_v10  ;;  %v3770_v4 = vshrl.u32 %v3758_v42, 16  ;;  %v3909_v11 = vshrl.u32 %v7231_v36, 16 }
 0x43b   : > { %v3640_v55 = vpop.permute.xlu0 %3639  ;;  %3313 = vrot.lane.b32.xlu0 %v3296_v35, %s4963_s18  ;;  %v4073_v6 = vpop.permute.xlu1 %4072  ;;  %v3903_v35 = vcombine.high %v7231_v36, %v7573_v2  ;;  %v3781_v27 = vshrl.u32 %v3725_v10, 16  ;;  %v3782_v61 = vshrl.u32 %v3759_v13, 16  ;;  %v3921_v44 = vshrl.u32 %v3902_v7, 16 }
 0x43c   : > { %v3655_v22 = vsel %vm517_vm12, %v7621_v60, %v3640_v55  ;;  %v3771_v25 = vpack.i.b16 %v3770_v4, %v3769_v3  ;;  %v3910_v39 = vpack.i.b16 %v3909_v11, %v3908_v56  ;;  %v3920_v55 = vshrl.u32 %v3868_v18, 16 }
 0x43d   : > { %v3783_v60 = vpack.i.b16 %v3782_v61, %v3781_v27  ;;  %v3915_v13 = vshrl.u32 %v3903_v35, 16  ;;  %v7626_v56 = vpack.i.b16 %v7092_v52, %v7086_v30  ;;  %v7627_v52 = vld [vmem:[#allocation21_spill] sm:$0xff] }
 0x43e   : > { %3786 = vrot.lane.b32.xlu1 %v3768_v29, %s4965_s9 }
 0x43f   : > { %3466 = vrot.lane.b32.xlu0 %v3453_v48, %s4960_s20  ;;  %v3642_v62 = vpop.permute.xlu0 %3641  ;;  %v4069_v9 = vpop.permute.xlu1 %4068 }
 0x440   : > { %v3657_v32 = vsel %vm3167_vm0, %v3655_v22, %v3642_v62  ;;  %v4084_v26 = vsel %vm3167_vm0, %v4082_v53, %v4069_v9  ;;  %v3869_v53 = vcombine.high %v7228_v1, %v7573_v2 }
 0x442   : > { %3792 = vrot.lane.b32.xlu1 %v3777_v33, %s4966_s10  ;;  %v3913_v22 = vpack.i.b16 %v3903_v35, %v3869_v53  ;;  %v3914_v10 = vshrl.u32 %v3869_v53, 16 }
 0x443   : > { %4223 = vrot.lane.b32.xlu0 %v4210_v63, %s4960_s20  ;;  %v3648_v21 = vpop.permute.xlu0 %3647  ;;  %v4075_v31 = vpop.permute.xlu1 %4074  ;;  %v3870_v63 = vcombine.high %v3868_v18, %v7573_v2 }
 0x446   : > { %3794 = vrot.lane.b32.xlu1 %v3780_v34, %s4967_s13  ;;  %v4481_v34 = vld [vmem:[%s7526_s5] sm:$0xff] }
 0x447   : > { %3935 = vrot.lane.b32.xlu0 %v3919_v14, %s4964_s23  ;;  %v3650_v47 = vpop.permute.xlu0 %3649  ;;  %v4077_v54 = vpop.permute.xlu1 %4076  ;;  %v3926_v14 = vshrl.u32 %v3870_v63, 16 }
 0x44a   : > { %3788 = vrot.lane.b32.xlu1 %v3771_v25, %s4963_s18 }
 0x44b   : > { %3929 = vrot.lane.b32.xlu0 %v3910_v39, %s4951_s21  ;;  %v3644_v46 = vpop.permute.xlu0 %3643  ;;  %v4071_v43 = vpop.permute.xlu1 %4070 }
 0x44c   : > { %v3659_v42 = vsel %vm3170_vm1, %v3657_v32, %v3644_v46  ;;  %v4086_v17 = vsel %vm3170_vm1, %v4084_v26, %v4071_v43  ;;  %v3904_v26 = vcombine.high %v3902_v7, %v7573_v2  ;;  %v7623_v2 = vld [vmem:[#allocation20_spill] sm:$0xff]  ;;  %v7624_v7 = vld [vmem:[#allocation19_spill] sm:$0xff]  ;;  %v7630_v43 = vld [vmem:[#allocation10_spill] sm:$0xff] }
 0x44d   : > { %v3661_v0 = vsel %vm3173_vm2, %v3659_v42, %v7284_v49  ;;  %v4088_v57 = vsel %vm3173_vm2, %v4086_v17, %v4073_v6  ;;  %v3922_v6 = vpack.i.b16 %v3921_v44, %v3920_v55  ;;  %v7631_v55 = vld [vmem:[#allocation6_spill] sm:$0xff] }
 0x44e   : > { %v3663_v29 = vsel %vm3176_vm3, %v3661_v0, %v3648_v21  ;;  %3796 = vrot.lane.b32.xlu1 %v3783_v60, %s4960_s20  ;;  %v4090_v12 = vsel %vm3176_vm3, %v4088_v57, %v4075_v31  ;;  %v3925_v33 = vpack.i.b16 %v3904_v26, %v3870_v63  ;;  %v7622_v21 = vpack.i.b16 %v6923_v51, %v6919_v37  ;;  %v4488_v37 = vld [vmem:[%s7527_s6] sm:$0xff] }
 0x44f   : > { %3931 = vrot.lane.b32.xlu0 %v3913_v22, %s4965_s9  ;;  %v3665_v48 = vsel %vm3179_vm4, %v3663_v29, %v3650_v47  ;;  %v3652_v59 = vpop.permute.xlu0 %3651  ;;  %v4092_v49 = vsel %vm3179_vm4, %v4090_v12, %v4077_v54  ;;  %v4079_v32 = vpop.permute.xlu1 %4078  ;;  %v3916_v31 = vpack.i.b16 %v3915_v13, %v3914_v10  ;;  %v3927_v18 = vshrl.u32 %v3904_v26, 16 }
 0x450   : > { %v7341_v62 = vsel %vm3182_vm5, %v3665_v48, %v3652_v59  ;;  %v7345_v9 = vsel %vm3182_vm5, %v4092_v49, %v4079_v32  ;;  %v7625_v51 = vmov 0.0   ;;  %v7632_v44 = vpack.i.b16 %v7630_v43, %v7631_v55 }
 0x451   : > { %4715 = vmatprep.mubr.msk.bf16.mxu1 %vm4968_vm6, %v7625_v51  ;;  %v7636_v55 = vpack.i.b16 %v7231_v36, %v7228_v1 }
 0x452   : > { %3158 = vrot.lane.b32.xlu1 %v6925_v28, %s4966_s10  ;;  %v3928_v28 = vpack.i.b16 %v3927_v18, %v3926_v14  ;;  %v7633_v18 = vld [vmem:[#allocation11_spill] sm:$0xff] }
 0x453   : > { %3937 = vrot.lane.b32.xlu0 %v3922_v6, %s4966_s10 }
 0x456   : > { %3160 = vrot.lane.b32.xlu1 %v7622_v21, %s4967_s13 }
 0x457   : > { %3939 = vrot.lane.b32.xlu0 %v3925_v33, %s4967_s13 }
 0x458   : > { %v3461_v30 = vpop.permute.xlu1 %3460 }
 0x45a   : > { %4451 = vrot.lane.b32.xlu1 %v7623_v2, %s4951_s21  ;;  %v7634_v2 = vld [vmem:[#allocation7_spill] sm:$0xff] }
 0x45b   : > { %3933 = vrot.lane.b32.xlu0 %v3916_v31, %s4963_s18 }
 0x45e   : > { %4453 = vrot.lane.b32.xlu1 %v7624_v7, %s4965_s9 }
 0x45f   : > { %3941 = vrot.lane.b32.xlu0 %v3928_v28, %s4960_s20  ;;  %v7635_v28 = vpack.i.b16 %v7633_v18, %v7634_v2 }
 0x462   : > { %4491 = vperm.xlu1 %4820, %v4488_v37  }
 0x463   : > { %3319 = vrot.lane.b32.xlu0 %v7626_v56, %s4967_s13 }
 0x466   : > { %4459 = vrot.lane.b32.xlu1 %v5887_v16, %s4966_s10  ;;  %s4695_s10 = sshll.u32 %s4926_s28, 2 }
 0x467   : > { %3321 = vrot.lane.b32.xlu0 %v7101_v5, %s4960_s20 }
 0x468   : > { %v3316_v11 = vpop.permute.xlu0 %3315 }
 0x46a   : > { %4463 = vrot.lane.b32.xlu1 %v5922_v45, %s4960_s20 }
 0x46b   : > { %3162 = vrot.lane.b32.xlu0 %v6935_v19, %s4960_s20  ;;  %v7628_v19 = vpack.i.b16 %v7058_v23, %v7052_v20 }
 0x46f   : > { %4484 = vperm.xlu0 %4821, %v4481_v34  }
 0x473   : > { %4455 = vrot.lane.b32.xlu0 %v5816_v8, %s4963_s18 }
 0x477   : > { %4457 = vrot.lane.b32.xlu0 %v5849_v40, %s4964_s23  ;;  %v7629_v40 = vpack.i.b16 %v7079_v24, %v7073_v41  ;;  %s283_s23 = sand.u32 1, %s4914_s25  }
 0x478   : > { %v4363_v16 = vpop.permute.xlu1 %4362  ;;  %s4593_s9 = sshll.u32 %s283_s23, 3  ;;  %s4499_s18 = scalar_lea.sflag [#allocation3], %s283_s23 }
 0x479   : > { %s285_s22 = scalar_lea.vmem [#allocation2], %s4593_s9 }
 0x47a   : > { %s4514_s21 = sshll.u32 %s285_s22, 4  ;;  %s4515_s21 = int_to_ptr.vmem [resolvable:$true] %s4514_s21 }
 0x47b   : > { %4461 = vrot.lane.b32.xlu0 %v7627_v52, %s4967_s13  ;;  %v4388_v52 = vrot.slane %v7341_v62, 4  ;;  %s4510_s13 = sadd.s32 %s4922_s27, %s4695_s10  ;;  %s4846_s0 = scalar_lea.vmem %s4515_s21, 128 }
 0x47c   : > { %v3455_v45 = vpop.permute.xlu1 %3454  ;;  %s4696_s17 = sshll.u32 %s4510_s13, 7  ;;  %p4847_p13 = scmp.ne.s32.totalorder %s4515_s21, %s4846_s0 }
 0x47d   : > { %v3470_v5 = vsel %vm517_vm12, %v7628_v19, %v3455_v45  ;;  %s4512_s28 = scalar_lea.hbm %s7528_s7, %s4696_s17  ;;  %s4969_s27 = smov [#allocation2]  }
 0x47e   : > { %p4848_p0 = pnand %p4847_p13, %p5061_p3  ;;  %s4850_s10 = sshll.u32 %s4969_s27, 4  ;;  %s4851_s10 = int_to_ptr.vmem [resolvable:$false] %s4850_s10 }
 0x47f   : > { %s4852_s9 = scalar_lea.vmem %s4851_s10, 256  ;;  %p4853_p2 = scmp.lt.s32.totalorder %s4515_s21, %s4851_s10 }
 0x480   : > { %v3457_v3 = vpop.permute.xlu1 %3456  ;;  %p4849_p1 = pneg %p4848_p0  ;;  %p4854_p4 = scmp.lt.s32.totalorder %s4852_s9, %s4846_s0 }
 0x481   : > { %v3472_v4 = vsel %vm3167_vm0, %v3470_v5, %v3457_v3 }
 0x482   : > { %p4855_p5 = por %p4854_p4, %p4853_p2 }
 0x484   : > { %v3463_v47 = vpop.permute.xlu1 %3462  ;;  %p4856_p6 = pnand %p4855_p5, %p4849_p1 }
 0x488   : > { %v3465_v8 = vpop.permute.xlu1 %3464  ;;  %v4218_v54 = vpop.permute.xlu0 %4217 }
 0x48c   : > { %v3318_v53 = vpop.permute.xlu1 %3317  ;;  %v3310_v35 = vpop.permute.xlu0 %3309 }
 0x48d   : > { %v3325_v25 = vsel %vm517_vm12, %v7629_v40, %v3310_v35 }
 0x490   : > { %v4359_v39 = vpop.permute.xlu1 %4358  ;;  %v3312_v27 = vpop.permute.xlu0 %3311 }
 0x491   : > { %v3327_v20 = vsel %vm3167_vm0, %v3325_v25, %v3312_v27 }
 0x494   : > { %v4367_v23 = vpop.permute.xlu1 %4366  ;;  %v4357_v61 = vpop.permute.xlu0 %4356 }
 0x495   : > { %v4372_v0 = vsel %vm517_vm12, %v7632_v44, %v4357_v61 }
 0x496   : > { %v4374_v22 = vsel %vm3167_vm0, %v4372_v0, %v4359_v39 }
 0x498   : > { %v3459_v46 = vpop.permute.xlu1 %3458  ;;  %v4212_v42 = vpop.permute.xlu0 %4211 }
 0x499   : > { %v3474_v17 = vsel %vm3170_vm1, %v3472_v4, %v3459_v46  ;;  %v4227_v7 = vsel %vm517_vm12, %v7635_v28, %v4212_v42 }
 0x49a   : > { %v3476_v60 = vsel %vm3173_vm2, %v3474_v17, %v3461_v30 }
 0x49b   : > { %v3478_v41 = vsel %vm3176_vm3, %v3476_v60, %v3463_v47 }
 0x49c   : > { %v4361_v24 = vpop.permute.xlu1 %4360  ;;  %v4214_v57 = vpop.permute.xlu0 %4213  ;;  %v3480_v29 = vsel %vm3179_vm4, %v3478_v41, %v3465_v8 }
 0x49d   : > { %v4376_v48 = vsel %vm3170_vm1, %v4374_v22, %v4361_v24  ;;  %v4229_v56 = vsel %vm3167_vm0, %v4227_v7, %v4214_v57 }
 0x49e   : > { %v4378_v12 = vsel %vm3173_vm2, %v4376_v48, %v4363_v16 }
 0x4a0   : > { %v4216_v59 = vpop.permute.xlu1 %4215  ;;  %v4365_v49 = vpop.permute.xlu0 %4364 }
 0x4a1   : > { %v4380_v32 = vsel %vm3176_vm3, %v4378_v12, %v4365_v49  ;;  %v4231_v30 = vsel %vm3170_vm1, %v4229_v56, %v4216_v59 }
 0x4a2   : > { %v4382_v26 = vsel %vm3179_vm4, %v4380_v32, %v4367_v23  ;;  %v4233_v5 = vsel %vm3173_vm2, %v4231_v30, %v4218_v54 }
 0x4a4   : > { %v4369_v6 = vpop.permute.xlu1 %4368 }
 0x4a5   : > { %v4220_v63 = vpop.permute.xlu0 %4219  ;;  %v4384_v33 = vsel %vm3182_vm5, %v4382_v26, %v4369_v6 }
 0x4a6   : > { %v4409_v10 = vsel %vm2681_vm15, %v4384_v33, 0  ;;  %v4235_v47 = vsel %vm3176_vm3, %v4233_v5, %v4220_v63 }
 0x4a7   : > { %4706 = vmatpush3.bf16.msra.mxu1 %v4409_v10 }
 0x4a8   : > { %v3791_v13 = vpop.permute.xlu1 %3790  ;;  %4707 = vmatprep.subr.bf16.mxu1 %v7625_v51 }
 0x4a9   : > { %v4222_v21 = vpop.permute.xlu0 %4221 }
 0x4aa   : > { %v4237_v8 = vsel %vm3179_vm4, %v4235_v47, %v4222_v21 }
 0x4ac   : > { %v3785_v31 = vpop.permute.xlu1 %3784 }
 0x4ad   : > { %v3314_v14 = vpop.permute.xlu0 %3313  ;;  %v3800_v61 = vsel %vm517_vm12, %v3762_v50, %v3785_v31 }
 0x4ae   : > { %v3329_v37 = vsel %vm3170_vm1, %v3327_v20, %v3314_v14  ;;  %v4405_v14 = vld [vmem:[%s7525_s4] sm:$0xf] }
 0x4af   : > { %v3331_v34 = vsel %vm3173_vm2, %v3329_v37, %v3316_v11  ;;  %v7637_v37 = vld [vmem:[#allocation13_spill] sm:$0xff] }
 0x4b0   : > { %v3333_v16 = vsel %vm3176_vm3, %v3331_v34, %v3318_v53  ;;  %v3787_v3 = vpop.permute.xlu1 %3786 }
 0x4b1   : > { %v3467_v45 = vpop.permute.xlu0 %3466  ;;  %v3802_v46 = vsel %vm3167_vm0, %v3800_v61, %v3787_v3 }
 0x4b2   : > { %v3482_v19 = vsel %vm3182_vm5, %v3480_v29, %v3467_v45 }
 0x4b3   : > { %v4397_v4 = vsel %vm2681_vm15, %v3482_v19, %v4388_v52 }
 0x4b4   : > { %v3793_v25 = vpop.permute.xlu1 %3792 }
 0x4b5   : > { %v4224_v35 = vpop.permute.xlu0 %4223 }
 0x4b6   : > { %v4239_v11 = vsel %vm3182_vm5, %v4237_v8, %v4224_v35 }
 0x4b7   : > { %v4392_v40 = vrot.slane %v4239_v11, 4 }
 0x4b8   : > { %v3795_v39 = vpop.permute.xlu1 %3794 }
 0x4b9   : > { %v3936_v53 = vpop.permute.xlu0 %3935  ;;  %v4403_v62 = vsel %vm2681_vm15, %v7345_v9, %v4392_v40 }
 0x4ba   : > { %4708 = vmatpush3.bf16.msra.mxu1 %v4403_v62 }
 0x4bb   : > { %4709 = vmatprep.subr.bf16.mxu1 %v7625_v51 }
 0x4bc   : > { %v3789_v20 = vpop.permute.xlu1 %3788 }
 0x4bd   : > { %v3930_v54 = vpop.permute.xlu0 %3929  ;;  %v3804_v42 = vsel %vm3170_vm1, %v3802_v46, %v3789_v20 }
 0x4be   : > { %v3806_v9 = vsel %vm3173_vm2, %v3804_v42, %v3791_v13  ;;  %v3945_v44 = vsel %vm517_vm12, %v7636_v55, %v3930_v54 }
 0x4bf   : > { %v3808_v60 = vsel %vm3176_vm3, %v3806_v9, %v3793_v25 }
 0x4c0   : > { %v3797_v38 = vpop.permute.xlu1 %3796  ;;  %v3810_v24 = vsel %vm3179_vm4, %v3808_v60, %v3795_v39 }
 0x4c1   : > { %v3932_v27 = vpop.permute.xlu0 %3931  ;;  %v3812_v29 = vsel %vm3182_vm5, %v3810_v24, %v3797_v38 }
 0x4c2   : > { %v3947_v0 = vsel %vm3167_vm0, %v3945_v44, %v3932_v27 }
 0x4c4   : > { %v3159_v48 = vpop.permute.xlu1 %3158 }
 0x4c5   : > { %v3938_v23 = vpop.permute.xlu0 %3937  ;;  %v3178_v26 = vsel %vm3176_vm3, %v7300_v15, %v3159_v48 }
 0x4c8   : > { %v3161_v6 = vpop.permute.xlu1 %3160 }
 0x4c9   : > { %v3940_v43 = vpop.permute.xlu0 %3939  ;;  %v3181_v33 = vsel %vm3179_vm4, %v3178_v26, %v3161_v6 }
 0x4cc   : > { %v4452_v18 = vpop.permute.xlu1 %4451 }
 0x4cd   : > { %v3934_v17 = vpop.permute.xlu0 %3933  ;;  %v4466_v56 = vsel %vm517_vm12, %v7637_v37, %v4452_v18 }
 0x4ce   : > { %v3949_v58 = vsel %vm3170_vm1, %v3947_v0, %v3934_v17 }
 0x4cf   : > { %v3951_v50 = vsel %vm3173_vm2, %v3949_v58, %v3936_v53 }
 0x4d0   : > { %v3953_v41 = vsel %vm3176_vm3, %v3951_v50, %v3938_v23  ;;  %v4454_v2 = vpop.permute.xlu1 %4453 }
 0x4d1   : > { %v3955_v22 = vsel %vm3179_vm4, %v3953_v41, %v3940_v43  ;;  %v3942_v57 = vpop.permute.xlu0 %3941  ;;  %v4468_v34 = vsel %vm3167_vm0, %v4466_v56, %v4454_v2 }
 0x4d2   : > { %v3957_v36 = vsel %vm3182_vm5, %v3955_v22, %v3942_v57 }
 0x4d3   : > { %v4390_v1 = vrot.slane %v3957_v36, 4 }
 0x4d5   : > { %v3320_v59 = vpop.permute.xlu0 %3319  ;;  %v4400_v12 = vsel %vm2681_vm15, %v3812_v29, %v4390_v1 }
 0x4d6   : > { %4710 = vmatpush3.bf16.msra.mxu1 %v4400_v12  ;;  %v3335_v49 = vsel %vm3179_vm4, %v3333_v16, %v3320_v59 }
 0x4d7   : > { %4711 = vmatprep.subr.bf16.mxu1 %v7625_v51 }
 0x4d9   : > { %v3322_v32 = vpop.permute.xlu0 %3321 }
 0x4da   : > { %v3337_v63 = vsel %vm3182_vm5, %v3335_v49, %v3322_v32  ;;  %4712 = vmatpush3.bf16.msra.mxu1 %v4397_v4 }
 0x4db   : > { %4713 = vmatprep.subr.bf16.mxu1 %v7625_v51  ;;  %v4386_v10 = vrot.slane %v3337_v63, 4 }
 0x4dd   : > { %v3163_v13 = vpop.permute.xlu0 %3162  ;;  %v4492_v28 = vpop.permute.xlu1 %4491 }
 0x4de   : > { %v3184_v21 = vsel %vm3182_vm5, %v3181_v33, %v3163_v13 }
 0x4df   : > { %v4394_v31 = vsel %vm2681_vm15, %v3184_v21, %v4386_v10 }
 0x4e0   : > { %4714 = vmatpush3.bf16.msra.mxu1 %v4394_v31 }
 0x4e1   : > { %v4460_v16 = vpop.permute.xlu1 %4459 }
 0x4e3   : > { %4716 = vmatmul.mubr.msk.bf16.vlgmr.msra.gmra.mxu1 %vm505_vm9, %v4405_v14 }
 0x4e5   : > { %v4464_v3 = vpop.permute.xlu1 %4463 }
 0x4ea   : > { %v4485_v51 = vpop.permute.xlu0 %4484 }
 0x4ee   : > { %v4456_v15 = vpop.permute.xlu0 %4455 }
 0x4ef   : > { %v4470_v30 = vsel %vm3170_vm1, %v4468_v34, %v4456_v15 }
 0x4f2   : > { %v4458_v7 = vpop.permute.xlu0 %4457 }
 0x4f3   : > { %v4472_v52 = vsel %vm3173_vm2, %v4470_v30, %v4458_v7 }
 0x4f4   : > { %v4474_v19 = vsel %vm3176_vm3, %v4472_v52, %v4460_v16 }
 0x4f6   : > { %v4462_v45 = vpop.permute.xlu0 %4461 }
 0x4f7   : > { %v4476_v5 = vsel %vm3179_vm4, %v4474_v19, %v4462_v45 }
 0x4f8   : > { %v4478_v4 = vsel %vm3182_vm5, %v4476_v5, %v4464_v3 }
 0x4f9   : > { %v4480_v11 = vunpack.c.l.bf16 %v4478_v4 }
 0x5a3   : > { %v4445_v47 = vpop.f32.mrf.mxu1 }
 0x5a4   : > { %v4487_v8 = vmul.f32 %v4485_v51, %v4445_v47 }
 0x5a5   : > { %v4717_v35 = vpop.f32.mrf.mxu1 }
 0x5a6   : > { %v4494_v40 = vadd.f32 %v4492_v28, %v4487_v8 }
 0x5a7   : > { %v4448_v25 = vpop.f32.mrf.mxu1 }
 0x5a8   : > { %v4495_v53 = vadd.f32 %v4494_v40, %v4480_v11 }
 0x5a9   : > { %v4718_v62 = vpop.f32.mrf.mxu1 }
 0x5aa   : > { %v4496_v54 = vmax.f32 %v4495_v53, 0.0 }
 0x5ac   : > { %4497 = vst [vmem:[%s285_s22] sm:$0xff] %v4496_v54 }
 0x5ad   : > { %4859 = shalt.err (!%p4856_p6)
}
 0x5ae   : > { %s4860_s13 = scalar_lea.hbm %s4512_s28, 128  ;;  %s4864_s22 = scalar_lea.hbm %s7528_s7, 1024 }
 0x5af   : > { %p4861_p7 = scmp.ne.s32.totalorder %s4512_s28, %s4860_s13  ;;  %p4865_p11 = scmp.lt.s32.totalorder %s4512_s28, %s7528_s7 }
 0x5b0   : > { %p4866_p12 = scmp.lt.s32.totalorder %s4864_s22, %s4860_s13 }
 0x5b1   : > { %p4862_p9 = pnand %p4861_p7, %p5061_p3 }
 0x5b2   : > { %p4867_p13 = por %p4866_p12, %p4865_p11 }
 0x5b3   : > { %p4863_p10 = pneg %p4862_p9 }
 0x5b5   : > { %p4868_p0 = pnand %p4867_p13, %p4863_p10 }
 0x5b7   : > { %4871 = shalt.err (!%p4868_p0)
}
 0x5b8   : > { %4720 = dma.vmem_to_hbm [thread:$0]  (%p5061_p3), %s4515_s21, 128, %s4512_s28, %s4499_s18  }
 0x5b9 PF: > { %p4726_p1 = scmp.ge.s32.totalorder %s4938_s8, 2  ;;  %s4526_s0 = sand.u32 1, %s4910_s24  }
 0x5ba   : > { %s4527_s27 = scalar_lea.sflag [#allocation3], %s4526_s0 }
 0x5bb   : > { %p4723_p2 = pnand %p4726_p1, %p5070_p8 }
 0x5bd   : > { %p4724_p4 = pneg %p4723_p2 }
 0x5bf   : > { %4905 = dma.done.wait (%p4724_p4), %s4527_s27, 128  }
 0x5c0   : > { %4907 = vsyncadd (%p4724_p4), %s4527_s27, 4294967168  ;;  %s20_s8 = sadd.s32 1, %s4938_s8   ;;  %s7638_s24 = smov %s4914_s25 }
 0x5c1   : > { %p17_p5 = scmp.ge.s32.totalorder %s20_s8, 10   ;;  %s7639_s25 = smov %s4918_s26 }
 0x5c2   : > { %s7640_s26 = smov %s5079_s19  ;;  %s7641_s27 = smov %s4930_s29 }
 0x5c3   : > { %s7642_s28 = smov %s4934_s30  ;;  %s7643_s29 = smov %s7646_s11 }
 0x5c4   : > { %s7644_s30 = smov %s7650_s12  ;;  %19 = sbr.rel (!%p17_p5) target bundleno = 7 (0x7), region = 84 }
 0x5c9   :  { %4532 = vsyncpa [#allocation3], 1 }
 0x5ca   :  { %4534 = vsyncpa [#allocation3 + $0x1], 1 }

</bundles_post_ra>
